<compile_context>
chip_gen: v7x
topology: tpu7x:2x2x1
jax: 0.10.0
libtpu: 0.0.40
codegen_flags: <defaults>
</compile_context>

<pallas_src>
import functools

import jax
import jax.numpy as jnp
from jax.experimental import pallas as pl
from jax.experimental.pallas import tpu as pltpu


# -----------------------------------------------------------------------------
# Small helpers
# -----------------------------------------------------------------------------
def _round_up(x, m):
    return (x + m - 1) // m * m


def _pad_axis(x, axis, new_size, value=0.0):
    pad = new_size - x.shape[axis]
    if pad <= 0:
        return x
    widths = [(0, 0)] * x.ndim
    widths[axis] = (0, pad)
    return jnp.pad(x, widths, constant_values=value)


def _vmem_capacity_bytes():
    """Physical VMEM per core; conservative (v7x-sized) fallback if unavailable."""
    try:
        cap = getattr(pltpu.get_tpu_info(), "vmem_capacity_bytes", None)
        if cap:
            return int(cap)
    except Exception:
        pass
    return 64 << 20


def _spec(shape, index_map, *, buffers=None):
    """BlockSpec, optionally with an explicit pipeline buffer count.

    Buffered(1) removes double-buffering where it cannot help (2-step grid or
    constant index_map) and halves that operand's VMEM footprint.  Guarded so
    the script still runs on jax versions without `pipeline_mode`.
    """
    if buffers is not None:
        try:
            return pl.BlockSpec(shape, index_map,
                                pipeline_mode=pl.Buffered(buffers))
        except Exception:
            pass
    return pl.BlockSpec(shape, index_map)


# -----------------------------------------------------------------------------
# RefineNet, fused path: one grid step = one full (B*V, D) input.
# -----------------------------------------------------------------------------
def _refine_fused_kernel(x_ref, w1_ref, g1_ref, be1_ref, w2_ref, g2_ref,
                         be2_ref, o_ref, *, n_blocks, eps, compute_dtype):
    x = x_ref[0]                                    # (N, Dp), compute_dtype
    inv_n = 1.0 / x.shape[0]

    def bn_scale_shift(h32, gamma, beta):
        # Train-mode BatchNorm (biased variance), one-pass stats in f32.
        s1 = jnp.sum(h32, axis=0, keepdims=True)
        s2 = jnp.sum(h32 * h32, axis=0, keepdims=True)
        mean = s1 * inv_n
        var = s2 * inv_n - mean * mean
        scale = jax.lax.rsqrt(var + eps) * gamma    # (1, Dp) row math: cheap
        shift = beta - mean * scale
        return scale.astype(compute_dtype), shift.astype(compute_dtype)

    for i in range(n_blocks):                       # static unroll over blocks
        # NOTE: Linear biases are provably redundant before train-mode BN.
        h32 = jnp.dot(x, w1_ref[i], preferred_element_type=jnp.float32)
        scale, shift = bn_scale_shift(h32, g1_ref[i], be1_ref[i])
        h = jnp.maximum(h32.astype(compute_dtype) * scale + shift, 0)
        h32 = jnp.dot(h, w2_ref[i], preferred_element_type=jnp.float32)
        scale, shift = bn_scale_shift(h32, g2_ref[i], be2_ref[i])
        x = jnp.maximum(h32.astype(compute_dtype) * scale + shift + x, 0)

    o_ref[0] = x.astype(o_ref.dtype)


def _refine_pair_fused(xs, w1, w2, g1, be1, g2, be2, *, n_blocks, eps,
                       compute_dtype, vmem_cap, est_bytes):
    two, N, Dp = xs.shape
    x_spec = _spec((1, N, Dp), lambda s: (s, 0, 0), buffers=1)
    w_spec = _spec((n_blocks, Dp, Dp), lambda s: (0, 0, 0), buffers=1)
    p_spec = _spec((n_blocks, 1, Dp), lambda s: (0, 0, 0), buffers=1)

    vmem_limit = int(min(vmem_cap - (4 << 20),
                         max(int(est_bytes * 1.25), 32 << 20)))

    return pl.pallas_call(
        functools.partial(_refine_fused_kernel, n_blocks=n_blocks, eps=eps,
                          compute_dtype=compute_dtype),
        grid=(2,),
        in_specs=[x_spec, w_spec, p_spec, p_spec, w_spec, p_spec, p_spec],
        out_specs=x_spec,
        out_shape=jax.ShapeDtypeStruct((2, N, Dp), compute_dtype),
        compiler_params=pltpu.CompilerParams(
            dimension_semantics=("parallel",),
            vmem_limit_bytes=vmem_limit),
    )(xs, w1, g1, be1, w2, g2, be2)


# -----------------------------------------------------------------------------
# RefineNet, N-tiled two-pass-BN path (VMEM light; the v7x path).
# -----------------------------------------------------------------------------
def _linear_stats_kernel(x_ref, w_ref, h_ref, stats_ref):
    t = pl.program_id(1)

    @pl.when(t == 0)
    def _init():
        stats_ref[...] = jnp.zeros_like(stats_ref)

    h = jnp.dot(x_ref[0], w_ref[...], preferred_element_type=jnp.float32)
    h_ref[0] = h
    s1 = jnp.sum(h, axis=0, keepdims=True)
    s2 = jnp.sum(h * h, axis=0, keepdims=True)
    stats_ref[0] += jnp.concatenate([s1, s2], axis=0)


def _bn_act_kernel(h_ref, sc_ref, sh_ref, o_ref, *, row_tile, n_valid, n_pad):
    o = jnp.maximum(h_ref[0].astype(o_ref.dtype) * sc_ref[0] + sh_ref[0], 0)
    if n_pad != n_valid:  # keep padded rows at exact zero (they feed the next stats)
        t = pl.program_id(1)
        rows = jax.lax.broadcasted_iota(jnp.int32, o.shape, 0) + t * row_tile
        o = jnp.where(rows < n_valid, o, 0)
    o_ref[0] = o


def _bn_res_act_kernel(h_ref, x_ref, sc_ref, sh_ref, o_ref, *, row_tile,
                       n_valid, n_pad):
    o = jnp.maximum(
        h_ref[0].astype(o_ref.dtype) * sc_ref[0] + sh_ref[0] + x_ref[0], 0)
    if n_pad != n_valid:
        t = pl.program_id(1)
        rows = jax.lax.broadcasted_iota(jnp.int32, o.shape, 0) + t * row_tile
        o = jnp.where(rows < n_valid, o, 0)
    o_ref[0] = o


def _refine_pair_tiled(xs, w1, w2, g1, be1, g2, be2, *, n_valid, eps,
                       compute_dtype, row_tile):
    """Per residual block: linear(+stats) -> [scale/shift on (1,D) in JAX]
    -> bn+relu -> linear(+stats) -> bn+residual+relu, all N-tiled."""
    two, _, Dp = xs.shape
    n_blocks = w1.shape[0]
    tn = _round_up(min(row_tile, n_valid), 8)
    n_pad = _round_up(n_valid, tn)
    xs = _pad_axis(xs, 1, n_pad)
    n_t = n_pad // tn

    act_spec = _spec((1, tn, Dp), lambda s, t: (s, t, 0))
    w_spec = _spec((Dp, Dp), lambda s, t: (0, 0), buffers=1)
    row_spec = _spec((1, 1, Dp), lambda s, t: (s, 0, 0), buffers=1)
    stats_spec = _spec((1, 2, Dp), lambda s, t: (s, 0, 0))
    cparams = pltpu.CompilerParams(
        dimension_semantics=("parallel", "arbitrary"))

    def linear_stats(x, w):
        return pl.pallas_call(
            _linear_stats_kernel,
            grid=(2, n_t),
            in_specs=[act_spec, w_spec],
            out_specs=[act_spec, stats_spec],
            out_shape=[jax.ShapeDtypeStruct((2, n_pad, Dp), jnp.float32),
                       jax.ShapeDtypeStruct((2, 2, Dp), jnp.float32)],
            compiler_params=cparams,
        )(x, w)

    def scale_shift(stats, gamma, beta):
        mean = stats[:, 0:1, :] / n_valid
        var = stats[:, 1:2, :] / n_valid - mean * mean
        scale = jax.lax.rsqrt(var + eps) * gamma        # (2, 1, Dp)
        shift = beta - mean * scale
        return scale.astype(compute_dtype), shift.astype(compute_dtype)

    def bn_act(h, scale, shift, residual=None):
        kern = _bn_act_kernel if residual is None else _bn_res_act_kernel
        ins = [h] if residual is None else [h, residual]
        in_specs = [act_spec] * len(ins) + [row_spec, row_spec]
        return pl.pallas_call(
            functools.partial(kern, row_tile=tn, n_valid=n_valid, n_pad=n_pad),
            grid=(2, n_t),
            in_specs=in_specs,
            out_specs=act_spec,
            out_shape=jax.ShapeDtypeStruct((2, n_pad, Dp), compute_dtype),
            compiler_params=cparams,
        )(*ins, scale, shift)

    x = xs
    for i in range(n_blocks):
        h, stats = linear_stats(x, w1[i])
        sc, sh = scale_shift(stats, g1[i], be1[i])
        a = bn_act(h, sc, sh)
        h, stats = linear_stats(a, w2[i])
        sc, sh = scale_shift(stats, g2[i], be2[i])
        x = bn_act(h, sc, sh, residual=x)

    return x[:, :n_valid, :]


# -----------------------------------------------------------------------------
# RefineNet wrapper (padding, casting, fused/tiled dispatch)
# -----------------------------------------------------------------------------
def refine_net_pair(feat_x, feat_y, params, *, eps=1e-3,
                    compute_dtype=jnp.bfloat16, force_tiled=False,
                    row_tile=1024):
    """RefineNet on both inputs.  Returns (fx, fy), each (B, V, Dp) in
    compute_dtype, with the feature dim zero-padded to Dp (lane-dense)."""
    B, V, D = feat_x.shape
    n_blocks = params["w1"].shape[0]
    N = B * V
    Dp = _round_up(D, 128) if D > 128 else D
    cd = jnp.dtype(compute_dtype)

    # Lane-dense feature padding: zero-padded weights keep padded channels at
    # exact zero through every block.
    w1 = _pad_axis(_pad_axis(params["w1"], 1, Dp), 2, Dp).astype(cd)
    w2 = _pad_axis(_pad_axis(params["w2"], 1, Dp), 2, Dp).astype(cd)
    g1 = _pad_axis(params["g1"], 2, Dp, 1.0)
    g2 = _pad_axis(params["g2"], 2, Dp, 1.0)
    be1 = _pad_axis(params["be1"], 2, Dp)
    be2 = _pad_axis(params["be2"], 2, Dp)
    # params["b1"] / params["b2"] are intentionally unused: a Linear bias
    # followed by train-mode BatchNorm cancels exactly.

    xs = jnp.stack([feat_x, feat_y], axis=0).reshape(2, N, D)
    xs = _pad_axis(xs, 2, Dp).astype(cd)

    cap = _vmem_capacity_bytes()
    # Rough fused-path VMEM estimate: single-buffered in/out blocks, the
    # simultaneously live (N, Dp) temporaries, and the resident weights.
    est = int(N * Dp * (4 * cd.itemsize + 4)
              + 2 * n_blocks * Dp * Dp * cd.itemsize
              + 4 * n_blocks * Dp * 4)
    est = int(est * 1.3) + (2 << 20)

    if force_tiled or est > cap - (8 << 20):
        out = _refine_pair_tiled(xs, w1, w2, g1, be1, g2, be2, n_valid=N,
                                 eps=eps, compute_dtype=cd, row_tile=row_tile)
    else:
        out = _refine_pair_fused(xs, w1, w2, g1, be1, g2, be2,
                                 n_blocks=n_blocks, eps=eps, compute_dtype=cd,
                                 vmem_cap=cap, est_bytes=est)

    out = out.reshape(2, B, V, Dp)
    return out[0], out[1]


# -----------------------------------------------------------------------------
# FunctionalMapNet: V-tiled spectral projection + packed grams.
# -----------------------------------------------------------------------------
def _funcmap_kernel(fx_ref, fy_ref, etx_ref, ety_ref, out_ref, acc_ref):
    v = pl.program_id(1)

    @pl.when(v == 0)
    def _init():
        acc_ref[...] = jnp.zeros_like(acc_ref)

    # acc[0] = F = evecs_trans_x @ feat_x, acc[1] = G = evecs_trans_y @ feat_y.
    acc_ref[0] += jnp.dot(etx_ref[0], fx_ref[0],
                          preferred_element_type=jnp.float32)
    acc_ref[1] += jnp.dot(ety_ref[0], fy_ref[0],
                          preferred_element_type=jnp.float32)

    @pl.when(v == pl.num_programs(1) - 1)
    def _emit():
        f = acc_ref[0]
        g = acc_ref[1]
        dims = (((1,), (1,)), ((), ()))
        out_ref[0, 0] = jax.lax.dot_general(f, f, dims,
                                            preferred_element_type=jnp.float32)
        out_ref[0, 1] = jax.lax.dot_general(f, g, dims,
                                            preferred_element_type=jnp.float32)
        out_ref[0, 2] = jax.lax.dot_general(g, g, dims,
                                            preferred_element_type=jnp.float32)
        out_ref[0, 3] = jax.lax.dot_general(g, f, dims,
                                            preferred_element_type=jnp.float32)


def functional_map_net(feat_x, feat_y, evecs_trans_x, evecs_trans_y, *,
                       compute_dtype=jnp.bfloat16):
    B, V, D = feat_x.shape
    K = evecs_trans_x.shape[1]
    cd = jnp.dtype(compute_dtype)

    # Fixed V tile; pad V with zeros (zero vertices contribute nothing).
    tv = 512 if V > 1024 else _round_up(V, 8)
    v_pad = _round_up(V, tv)
    n_v = v_pad // tv

    fx = _pad_axis(feat_x, 1, v_pad).astype(cd)
    fy = _pad_axis(feat_y, 1, v_pad).astype(cd)
    etx = _pad_axis(evecs_trans_x, 2, v_pad).astype(cd)
    ety = _pad_axis(evecs_trans_y, 2, v_pad).astype(cd)

    feat_spec = pl.BlockSpec((1, tv, D), lambda b, v: (b, v, 0))
    ev_spec = pl.BlockSpec((1, K, tv), lambda b, v: (b, 0, v))
    out_spec = pl.BlockSpec((1, 4, K, K), lambda b, v: (b, 0, 0, 0))

    cap = _vmem_capacity_bytes()
    est = (2 * 2 * tv * D * cd.itemsize + 2 * 2 * K * tv * cd.itemsize
           + 2 * K * D * 4 + 2 * 4 * K * K * 4) + (2 << 20)
    vmem_limit = int(min(cap - (4 << 20), max(2 * est, 16 << 20)))

    grams = pl.pallas_call(
        _funcmap_kernel,
        grid=(B, n_v),
        in_specs=[feat_spec, feat_spec, ev_spec, ev_spec],
        out_specs=out_spec,
        out_shape=jax.ShapeDtypeStruct((B, 4, K, K), jnp.float32),
        scratch_shapes=[pltpu.VMEM((2, K, D), jnp.float32)],
        compiler_params=pltpu.CompilerParams(
            dimension_semantics=("parallel", "arbitrary"),
            vmem_limit_bytes=vmem_limit),
    )(fx, fy, etx, ety)

    m1, n1, m2, n2 = grams[:, 0], grams[:, 1], grams[:, 2], grams[:, 3]
    # C = inv(M) @ N, returned transposed (torch reference returns C.t()).
    # TODO(synk): torch.inverse -> jnp.linalg.solve in plain JAX (tiny K x K).
    c1 = jnp.swapaxes(jnp.linalg.solve(m1, n1), 1, 2)
    c2 = jnp.swapaxes(jnp.linalg.solve(m2, n2), 1, 2)
    return c1, c2


# -----------------------------------------------------------------------------
# SURFMNet forward
# -----------------------------------------------------------------------------
def surfmnet_forward(params, feat_x, feat_y, evecs_trans_x, evecs_trans_y, *,
                     compute_dtype=jnp.bfloat16, force_tiled_refine=False,
                     refine_row_tile=1024):
    D = feat_x.shape[-1]
    fx_p, fy_p = refine_net_pair(feat_x, feat_y, params,
                                 compute_dtype=compute_dtype,
                                 force_tiled=force_tiled_refine,
                                 row_tile=refine_row_tile)
    # Funcmap consumes the lane-dense (possibly D-padded) activations directly:
    # padded channels are exact zeros and contribute nothing to the grams.
    c1, c2 = functional_map_net(fx_p, fy_p, evecs_trans_x, evecs_trans_y,
                                compute_dtype=compute_dtype)
    fx = fx_p[..., :D].astype(jnp.float32)
    fy = fy_p[..., :D].astype(jnp.float32)
    return c1, c2, fx, fy


# -----------------------------------------------------------------------------
# Parameters (torch-compatible shapes; weights stored pre-transposed (in, out))
# -----------------------------------------------------------------------------
def init_params(key, n_blocks, in_dim):
    keys = jax.random.split(key, 4)
    bound = float(in_dim) ** -0.5
    w1 = jax.random.uniform(keys[0], (n_blocks, in_dim, in_dim),
                            minval=-bound, maxval=bound, dtype=jnp.float32)
    w2 = jax.random.uniform(keys[1], (n_blocks, in_dim, in_dim),
                            minval=-bound, maxval=bound, dtype=jnp.float32)
    b1 = jax.random.uniform(keys[2], (n_blocks, 1, in_dim),
                            minval=-bound, maxval=bound, dtype=jnp.float32)
    b2 = jax.random.uniform(keys[3], (n_blocks, 1, in_dim),
                            minval=-bound, maxval=bound, dtype=jnp.float32)
    g = jnp.ones((n_blocks, 1, in_dim), jnp.float32)
    be = jnp.zeros((n_blocks, 1, in_dim), jnp.float32)
    return {"w1": w1, "b1": b1, "g1": g, "be1": be,
            "w2": w2, "b2": b2, "g2": g, "be2": be}


# -----------------------------------------------------------------------------
# Pure-JAX reference mirroring the torch module (including the Linear biases)
# -----------------------------------------------------------------------------
def reference_forward(params, feat_x, feat_y, evecs_trans_x, evecs_trans_y,
                      eps=1e-3):
    n_blocks = params["w1"].shape[0]

    def refine(x):
        h = x
        for i in range(n_blocks):
            def bn(t, gamma, beta):
                flat = t.reshape(-1, t.shape[-1])
                m = jnp.mean(flat, axis=0)
                v = jnp.mean((flat - m) ** 2, axis=0)
                return (t - m) * jax.lax.rsqrt(v + eps) * gamma[0] + beta[0]

            y = h @ params["w1"][i] + params["b1"][i]
            y = jax.nn.relu(bn(y, params["g1"][i], params["be1"][i]))
            y = y @ params["w2"][i] + params["b2"][i]
            y = bn(y, params["g2"][i], params["be2"][i])
            h = jax.nn.relu(y + h)
        return h

    fx, fy = refine(feat_x), refine(feat_y)
    F = jnp.einsum("bkv,bvd->bkd", evecs_trans_x, fx)
    G = jnp.einsum("bkv,bvd->bkd", evecs_trans_y, fy)
    m1 = jnp.einsum("bkd,bld->bkl", F, F)
    n1 = jnp.einsum("bkd,bld->bkl", F, G)
    m2 = jnp.einsum("bkd,bld->bkl", G, G)
    n2 = jnp.einsum("bkd,bld->bkl", G, F)
    c1 = jnp.swapaxes(jnp.linalg.solve(m1, n1), 1, 2)
    c2 = jnp.swapaxes(jnp.linalg.solve(m2, n2), 1, 2)
    return c1, c2, fx, fy


if __name__ == "__main__":
    B, V, D, K = 2, 20, 32, 8          # batch, vertices, features, eigenvectors
    N_BLOCKS = 7

    key = jax.random.PRNGKey(0)
    kp, kx, ky, kex, key_ = jax.random.split(key, 5)
    params = init_params(kp, N_BLOCKS, D)
    feat_x = jax.random.normal(kx, (B, V, D), dtype=jnp.float32)
    feat_y = jax.random.normal(ky, (B, V, D), dtype=jnp.float32)
    evecs_trans_x = jax.random.normal(kex, (B, K, V), dtype=jnp.float32)
    evecs_trans_y = jax.random.normal(key_, (B, K, V), dtype=jnp.float32)

    # 1) Default config (bf16 elementwise / matmul operands).
    fwd = jax.jit(surfmnet_forward)
    c1, c2, fx, fy = jax.block_until_ready(
        fwd(params, feat_x, feat_y, evecs_trans_x, evecs_trans_y))
    assert c1.shape == (B, K, K) and c2.shape == (B, K, K)
    assert fx.shape == (B, V, D) and fy.shape == (B, V, D)
    for t in (c1, c2, fx, fy):
        assert bool(jnp.all(jnp.isfinite(t)))

    # 2) f32 config vs pure-JAX reference (validates the fused refine kernel,
    #    the dropped Linear biases, and the funcmap gram kernel).
    fwd32 = jax.jit(functools.partial(surfmnet_forward,
                                      compute_dtype=jnp.float32))
    c1f, c2f, fxf, fyf = jax.block_until_ready(
        fwd32(params, feat_x, feat_y, evecs_trans_x, evecs_trans_y))
    rc1, rc2, rfx, rfy = reference_forward(params, feat_x, feat_y,
                                           evecs_trans_x, evecs_trans_y)
    assert bool(jnp.allclose(fxf, rfx, rtol=2e-3, atol=2e-3))
    assert bool(jnp.allclose(fyf, rfy, rtol=2e-3, atol=2e-3))
    # C goes through a K x K solve -> compare with solve-conditioning slack.
    assert bool(jnp.allclose(c1f, rc1, rtol=5e-2, atol=5e-2))
    assert bool(jnp.allclose(c2f, rc2, rtol=5e-2, atol=5e-2))

    # 3) N-tiled two-pass-BN refine path (the VMEM-light v7x path) vs fused,
    #    on a 2-block parameter subset (exercises row padding/masking too).
    params_small = {k: v[:2] for k, v in params.items()}
    refine_fused = jax.jit(functools.partial(refine_net_pair,
                                             compute_dtype=jnp.float32))
    refine_tiled = jax.jit(functools.partial(refine_net_pair,
                                             compute_dtype=jnp.float32,
                                             force_tiled=True, row_tile=16))
    a_x, a_y = jax.block_until_ready(refine_fused(feat_x, feat_y, params_small))
    b_x, b_y = jax.block_until_ready(refine_tiled(feat_x, feat_y, params_small))
    assert bool(jnp.allclose(a_x, b_x, rtol=1e-3, atol=1e-3))
    assert bool(jnp.allclose(a_y, b_y, rtol=1e-3, atol=1e-3))

    print("KERNEL_OK")
</pallas_src>

<mosaic_0001>
module attributes {stable_mosaic.version = 11 : i64} {
  func.func @_refine_fused_kernel(%arg0: i32, %arg1: memref<1x40x32xbf16, #tpu.memory_space<vmem>>, %arg2: memref<7x32x32xbf16, #tpu.memory_space<vmem>>, %arg3: memref<7x1x32xf32, #tpu.memory_space<vmem>>, %arg4: memref<7x1x32xf32, #tpu.memory_space<vmem>>, %arg5: memref<7x32x32xbf16, #tpu.memory_space<vmem>>, %arg6: memref<7x1x32xf32, #tpu.memory_space<vmem>>, %arg7: memref<7x1x32xf32, #tpu.memory_space<vmem>>, %arg8: memref<1x40x32xbf16, #tpu.memory_space<vmem>>) attributes {dimension_semantics = [#tpu.dimension_semantics<parallel>], iteration_bounds = array<i64: 2>, scalar_prefetch = 0 : i64, scratch_operands = 0 : i64, tpu.core_type = #tpu.core_type<tc>, window_params = [{pipeline_mode = #tpu.pipeline_mode<synchronous>, transform_indices = @transform_0, window_bounds = array<i64: 1, 40, 32>}, {pipeline_mode = #tpu.pipeline_mode<synchronous>, transform_indices = @transform_1, window_bounds = array<i64: 7, 32, 32>}, {pipeline_mode = #tpu.pipeline_mode<synchronous>, transform_indices = @transform_2, window_bounds = array<i64: 7, 1, 32>}, {pipeline_mode = #tpu.pipeline_mode<synchronous>, transform_indices = @transform_3, window_bounds = array<i64: 7, 1, 32>}, {pipeline_mode = #tpu.pipeline_mode<synchronous>, transform_indices = @transform_4, window_bounds = array<i64: 7, 32, 32>}, {pipeline_mode = #tpu.pipeline_mode<synchronous>, transform_indices = @transform_5, window_bounds = array<i64: 7, 1, 32>}, {pipeline_mode = #tpu.pipeline_mode<synchronous>, transform_indices = @transform_6, window_bounds = array<i64: 7, 1, 32>}, {pipeline_mode = #tpu.pipeline_mode<synchronous>, transform_indices = @transform_7, window_bounds = array<i64: 1, 40, 32>}]} {
    %c0 = arith.constant 0 : index
    %c0_0 = arith.constant 0 : index
    %c0_1 = arith.constant 0 : index
    %0 = vector.load %arg1[%c0, %c0_0, %c0_1] : memref<1x40x32xbf16, #tpu.memory_space<vmem>>, vector<1x40x32xbf16>
    %1 = vector.shape_cast %0 : vector<1x40x32xbf16> to vector<40x32xbf16>
    %c0_2 = arith.constant 0 : index
    %c0_3 = arith.constant 0 : index
    %c0_4 = arith.constant 0 : index
    %2 = vector.load %arg2[%c0_2, %c0_3, %c0_4] : memref<7x32x32xbf16, #tpu.memory_space<vmem>>, vector<1x32x32xbf16>
    %3 = vector.shape_cast %2 : vector<1x32x32xbf16> to vector<32x32xbf16>
    %cst = arith.constant dense<0.000000e+00> : vector<40x32xf32>
    %4 = tpu.matmul %1, %3, %cst {dimension_numbers = #tpu.dot_dimension_numbers<[1], [0], [0], [1], [0, 0, 1, 1], [], []>} : vector<40x32xbf16>, vector<32x32xbf16>, vector<40x32xf32> -> vector<40x32xf32>
    %c0_5 = arith.constant 0 : index
    %c0_6 = arith.constant 0 : index
    %c0_7 = arith.constant 0 : index
    %5 = vector.load %arg3[%c0_5, %c0_6, %c0_7] : memref<7x1x32xf32, #tpu.memory_space<vmem>>, vector<1x1x32xf32>
    %6 = vector.shape_cast %5 : vector<1x1x32xf32> to vector<1x32xf32>
    %c0_8 = arith.constant 0 : index
    %c0_9 = arith.constant 0 : index
    %c0_10 = arith.constant 0 : index
    %7 = vector.load %arg4[%c0_8, %c0_9, %c0_10] : memref<7x1x32xf32, #tpu.memory_space<vmem>>, vector<1x1x32xf32>
    %8 = vector.shape_cast %7 : vector<1x1x32xf32> to vector<1x32xf32>
    %cst_11 = arith.constant dense<0.000000e+00> : vector<32xf32>
    %9 = vector.multi_reduction <add>, %4, %cst_11 [0] : vector<40x32xf32> to vector<32xf32>
    %10 = vector.shape_cast %9 : vector<32xf32> to vector<1x32xf32>
    %11 = arith.mulf %4, %4 : vector<40x32xf32>
    %cst_12 = arith.constant dense<0.000000e+00> : vector<32xf32>
    %12 = vector.multi_reduction <add>, %11, %cst_12 [0] : vector<40x32xf32> to vector<32xf32>
    %13 = vector.shape_cast %12 : vector<32xf32> to vector<1x32xf32>
    %cst_13 = arith.constant 2.500000e-02 : f32
    %14 = vector.broadcast %cst_13 : f32 to vector<1x32xf32>
    %15 = arith.mulf %10, %14 : vector<1x32xf32>
    %cst_14 = arith.constant 2.500000e-02 : f32
    %16 = vector.broadcast %cst_14 : f32 to vector<1x32xf32>
    %17 = arith.mulf %13, %16 : vector<1x32xf32>
    %18 = arith.mulf %15, %15 : vector<1x32xf32>
    %19 = arith.subf %17, %18 : vector<1x32xf32>
    %cst_15 = arith.constant 1.000000e-03 : f32
    %20 = vector.broadcast %cst_15 : f32 to vector<1x32xf32>
    %21 = arith.addf %19, %20 : vector<1x32xf32>
    %22 = math.rsqrt %21 : vector<1x32xf32>
    %23 = arith.mulf %22, %6 : vector<1x32xf32>
    %24 = arith.mulf %15, %23 : vector<1x32xf32>
    %25 = arith.subf %8, %24 : vector<1x32xf32>
    %26 = arith.truncf %23 : vector<1x32xf32> to vector<1x32xbf16>
    %27 = arith.truncf %25 : vector<1x32xf32> to vector<1x32xbf16>
    %28 = arith.truncf %4 : vector<40x32xf32> to vector<40x32xbf16>
    %29 = vector.broadcast %26 : vector<1x32xbf16> to vector<40x32xbf16>
    %30 = arith.mulf %28, %29 : vector<40x32xbf16>
    %31 = vector.broadcast %27 : vector<1x32xbf16> to vector<40x32xbf16>
    %32 = arith.addf %30, %31 : vector<40x32xbf16>
    %cst_16 = arith.constant 0.000000e+00 : bf16
    %33 = vector.broadcast %cst_16 : bf16 to vector<40x32xbf16>
    %34 = arith.maximumf %32, %33 : vector<40x32xbf16>
    %c0_17 = arith.constant 0 : index
    %c0_18 = arith.constant 0 : index
    %c0_19 = arith.constant 0 : index
    %35 = vector.load %arg5[%c0_17, %c0_18, %c0_19] : memref<7x32x32xbf16, #tpu.memory_space<vmem>>, vector<1x32x32xbf16>
    %36 = vector.shape_cast %35 : vector<1x32x32xbf16> to vector<32x32xbf16>
    %cst_20 = arith.constant dense<0.000000e+00> : vector<40x32xf32>
    %37 = tpu.matmul %34, %36, %cst_20 {dimension_numbers = #tpu.dot_dimension_numbers<[1], [0], [0], [1], [0, 0, 1, 1], [], []>} : vector<40x32xbf16>, vector<32x32xbf16>, vector<40x32xf32> -> vector<40x32xf32>
    %c0_21 = arith.constant 0 : index
    %c0_22 = arith.constant 0 : index
    %c0_23 = arith.constant 0 : index
    %38 = vector.load %arg6[%c0_21, %c0_22, %c0_23] : memref<7x1x32xf32, #tpu.memory_space<vmem>>, vector<1x1x32xf32>
    %39 = vector.shape_cast %38 : vector<1x1x32xf32> to vector<1x32xf32>
    %c0_24 = arith.constant 0 : index
    %c0_25 = arith.constant 0 : index
    %c0_26 = arith.constant 0 : index
    %40 = vector.load %arg7[%c0_24, %c0_25, %c0_26] : memref<7x1x32xf32, #tpu.memory_space<vmem>>, vector<1x1x32xf32>
    %41 = vector.shape_cast %40 : vector<1x1x32xf32> to vector<1x32xf32>
    %cst_27 = arith.constant dense<0.000000e+00> : vector<32xf32>
    %42 = vector.multi_reduction <add>, %37, %cst_27 [0] : vector<40x32xf32> to vector<32xf32>
    %43 = vector.shape_cast %42 : vector<32xf32> to vector<1x32xf32>
    %44 = arith.mulf %37, %37 : vector<40x32xf32>
    %cst_28 = arith.constant dense<0.000000e+00> : vector<32xf32>
    %45 = vector.multi_reduction <add>, %44, %cst_28 [0] : vector<40x32xf32> to vector<32xf32>
    %46 = vector.shape_cast %45 : vector<32xf32> to vector<1x32xf32>
    %cst_29 = arith.constant 2.500000e-02 : f32
    %47 = vector.broadcast %cst_29 : f32 to vector<1x32xf32>
    %48 = arith.mulf %43, %47 : vector<1x32xf32>
    %cst_30 = arith.constant 2.500000e-02 : f32
    %49 = vector.broadcast %cst_30 : f32 to vector<1x32xf32>
    %50 = arith.mulf %46, %49 : vector<1x32xf32>
    %51 = arith.mulf %48, %48 : vector<1x32xf32>
    %52 = arith.subf %50, %51 : vector<1x32xf32>
    %cst_31 = arith.constant 1.000000e-03 : f32
    %53 = vector.broadcast %cst_31 : f32 to vector<1x32xf32>
    %54 = arith.addf %52, %53 : vector<1x32xf32>
    %55 = math.rsqrt %54 : vector<1x32xf32>
    %56 = arith.mulf %55, %39 : vector<1x32xf32>
    %57 = arith.mulf %48, %56 : vector<1x32xf32>
    %58 = arith.subf %41, %57 : vector<1x32xf32>
    %59 = arith.truncf %56 : vector<1x32xf32> to vector<1x32xbf16>
    %60 = arith.truncf %58 : vector<1x32xf32> to vector<1x32xbf16>
    %61 = arith.truncf %37 : vector<40x32xf32> to vector<40x32xbf16>
    %62 = vector.broadcast %59 : vector<1x32xbf16> to vector<40x32xbf16>
    %63 = arith.mulf %61, %62 : vector<40x32xbf16>
    %64 = vector.broadcast %60 : vector<1x32xbf16> to vector<40x32xbf16>
    %65 = arith.addf %63, %64 : vector<40x32xbf16>
    %66 = arith.addf %65, %1 : vector<40x32xbf16>
    %cst_32 = arith.constant 0.000000e+00 : bf16
    %67 = vector.broadcast %cst_32 : bf16 to vector<40x32xbf16>
    %68 = arith.maximumf %66, %67 : vector<40x32xbf16>
    %c1 = arith.constant 1 : index
    %c0_33 = arith.constant 0 : index
    %c0_34 = arith.constant 0 : index
    %69 = vector.load %arg2[%c1, %c0_33, %c0_34] : memref<7x32x32xbf16, #tpu.memory_space<vmem>>, vector<1x32x32xbf16>
    %70 = vector.shape_cast %69 : vector<1x32x32xbf16> to vector<32x32xbf16>
    %cst_35 = arith.constant dense<0.000000e+00> : vector<40x32xf32>
    %71 = tpu.matmul %68, %70, %cst_35 {dimension_numbers = #tpu.dot_dimension_numbers<[1], [0], [0], [1], [0, 0, 1, 1], [], []>} : vector<40x32xbf16>, vector<32x32xbf16>, vector<40x32xf32> -> vector<40x32xf32>
    %c1_36 = arith.constant 1 : index
    %c0_37 = arith.constant 0 : index
    %c0_38 = arith.constant 0 : index
    %72 = vector.load %arg3[%c1_36, %c0_37, %c0_38] : memref<7x1x32xf32, #tpu.memory_space<vmem>>, vector<1x1x32xf32>
    %73 = vector.shape_cast %72 : vector<1x1x32xf32> to vector<1x32xf32>
    %c1_39 = arith.constant 1 : index
    %c0_40 = arith.constant 0 : index
    %c0_41 = arith.constant 0 : index
    %74 = vector.load %arg4[%c1_39, %c0_40, %c0_41] : memref<7x1x32xf32, #tpu.memory_space<vmem>>, vector<1x1x32xf32>
    %75 = vector.shape_cast %74 : vector<1x1x32xf32> to vector<1x32xf32>
    %cst_42 = arith.constant dense<0.000000e+00> : vector<32xf32>
    %76 = vector.multi_reduction <add>, %71, %cst_42 [0] : vector<40x32xf32> to vector<32xf32>
    %77 = vector.shape_cast %76 : vector<32xf32> to vector<1x32xf32>
    %78 = arith.mulf %71, %71 : vector<40x32xf32>
    %cst_43 = arith.constant dense<0.000000e+00> : vector<32xf32>
    %79 = vector.multi_reduction <add>, %78, %cst_43 [0] : vector<40x32xf32> to vector<32xf32>
    %80 = vector.shape_cast %79 : vector<32xf32> to vector<1x32xf32>
    %cst_44 = arith.constant 2.500000e-02 : f32
    %81 = vector.broadcast %cst_44 : f32 to vector<1x32xf32>
    %82 = arith.mulf %77, %81 : vector<1x32xf32>
    %cst_45 = arith.constant 2.500000e-02 : f32
    %83 = vector.broadcast %cst_45 : f32 to vector<1x32xf32>
    %84 = arith.mulf %80, %83 : vector<1x32xf32>
    %85 = arith.mulf %82, %82 : vector<1x32xf32>
    %86 = arith.subf %84, %85 : vector<1x32xf32>
    %cst_46 = arith.constant 1.000000e-03 : f32
    %87 = vector.broadcast %cst_46 : f32 to vector<1x32xf32>
    %88 = arith.addf %86, %87 : vector<1x32xf32>
    %89 = math.rsqrt %88 : vector<1x32xf32>
    %90 = arith.mulf %89, %73 : vector<1x32xf32>
    %91 = arith.mulf %82, %90 : vector<1x32xf32>
    %92 = arith.subf %75, %91 : vector<1x32xf32>
    %93 = arith.truncf %90 : vector<1x32xf32> to vector<1x32xbf16>
    %94 = arith.truncf %92 : vector<1x32xf32> to vector<1x32xbf16>
    %95 = arith.truncf %71 : vector<40x32xf32> to vector<40x32xbf16>
    %96 = vector.broadcast %93 : vector<1x32xbf16> to vector<40x32xbf16>
    %97 = arith.mulf %95, %96 : vector<40x32xbf16>
    %98 = vector.broadcast %94 : vector<1x32xbf16> to vector<40x32xbf16>
    %99 = arith.addf %97, %98 : vector<40x32xbf16>
    %cst_47 = arith.constant 0.000000e+00 : bf16
    %100 = vector.broadcast %cst_47 : bf16 to vector<40x32xbf16>
    %101 = arith.maximumf %99, %100 : vector<40x32xbf16>
    %c1_48 = arith.constant 1 : index
    %c0_49 = arith.constant 0 : index
    %c0_50 = arith.constant 0 : index
    %102 = vector.load %arg5[%c1_48, %c0_49, %c0_50] : memref<7x32x32xbf16, #tpu.memory_space<vmem>>, vector<1x32x32xbf16>
    %103 = vector.shape_cast %102 : vector<1x32x32xbf16> to vector<32x32xbf16>
    %cst_51 = arith.constant dense<0.000000e+00> : vector<40x32xf32>
    %104 = tpu.matmul %101, %103, %cst_51 {dimension_numbers = #tpu.dot_dimension_numbers<[1], [0], [0], [1], [0, 0, 1, 1], [], []>} : vector<40x32xbf16>, vector<32x32xbf16>, vector<40x32xf32> -> vector<40x32xf32>
    %c1_52 = arith.constant 1 : index
    %c0_53 = arith.constant 0 : index
    %c0_54 = arith.constant 0 : index
    %105 = vector.load %arg6[%c1_52, %c0_53, %c0_54] : memref<7x1x32xf32, #tpu.memory_space<vmem>>, vector<1x1x32xf32>
    %106 = vector.shape_cast %105 : vector<1x1x32xf32> to vector<1x32xf32>
    %c1_55 = arith.constant 1 : index
    %c0_56 = arith.constant 0 : index
    %c0_57 = arith.constant 0 : index
    %107 = vector.load %arg7[%c1_55, %c0_56, %c0_57] : memref<7x1x32xf32, #tpu.memory_space<vmem>>, vector<1x1x32xf32>
    %108 = vector.shape_cast %107 : vector<1x1x32xf32> to vector<1x32xf32>
    %cst_58 = arith.constant dense<0.000000e+00> : vector<32xf32>
    %109 = vector.multi_reduction <add>, %104, %cst_58 [0] : vector<40x32xf32> to vector<32xf32>
    %110 = vector.shape_cast %109 : vector<32xf32> to vector<1x32xf32>
    %111 = arith.mulf %104, %104 : vector<40x32xf32>
    %cst_59 = arith.constant dense<0.000000e+00> : vector<32xf32>
    %112 = vector.multi_reduction <add>, %111, %cst_59 [0] : vector<40x32xf32> to vector<32xf32>
    %113 = vector.shape_cast %112 : vector<32xf32> to vector<1x32xf32>
    %cst_60 = arith.constant 2.500000e-02 : f32
    %114 = vector.broadcast %cst_60 : f32 to vector<1x32xf32>
    %115 = arith.mulf %110, %114 : vector<1x32xf32>
    %cst_61 = arith.constant 2.500000e-02 : f32
    %116 = vector.broadcast %cst_61 : f32 to vector<1x32xf32>
    %117 = arith.mulf %113, %116 : vector<1x32xf32>
    %118 = arith.mulf %115, %115 : vector<1x32xf32>
    %119 = arith.subf %117, %118 : vector<1x32xf32>
    %cst_62 = arith.constant 1.000000e-03 : f32
    %120 = vector.broadcast %cst_62 : f32 to vector<1x32xf32>
    %121 = arith.addf %119, %120 : vector<1x32xf32>
    %122 = math.rsqrt %121 : vector<1x32xf32>
    %123 = arith.mulf %122, %106 : vector<1x32xf32>
    %124 = arith.mulf %115, %123 : vector<1x32xf32>
    %125 = arith.subf %108, %124 : vector<1x32xf32>
    %126 = arith.truncf %123 : vector<1x32xf32> to vector<1x32xbf16>
    %127 = arith.truncf %125 : vector<1x32xf32> to vector<1x32xbf16>
    %128 = arith.truncf %104 : vector<40x32xf32> to vector<40x32xbf16>
    %129 = vector.broadcast %126 : vector<1x32xbf16> to vector<40x32xbf16>
    %130 = arith.mulf %128, %129 : vector<40x32xbf16>
    %131 = vector.broadcast %127 : vector<1x32xbf16> to vector<40x32xbf16>
    %132 = arith.addf %130, %131 : vector<40x32xbf16>
    %133 = arith.addf %132, %68 : vector<40x32xbf16>
    %cst_63 = arith.constant 0.000000e+00 : bf16
    %134 = vector.broadcast %cst_63 : bf16 to vector<40x32xbf16>
    %135 = arith.maximumf %133, %134 : vector<40x32xbf16>
    %c2 = arith.constant 2 : index
    %c0_64 = arith.constant 0 : index
    %c0_65 = arith.constant 0 : index
    %136 = vector.load %arg2[%c2, %c0_64, %c0_65] : memref<7x32x32xbf16, #tpu.memory_space<vmem>>, vector<1x32x32xbf16>
    %137 = vector.shape_cast %136 : vector<1x32x32xbf16> to vector<32x32xbf16>
    %cst_66 = arith.constant dense<0.000000e+00> : vector<40x32xf32>
    %138 = tpu.matmul %135, %137, %cst_66 {dimension_numbers = #tpu.dot_dimension_numbers<[1], [0], [0], [1], [0, 0, 1, 1], [], []>} : vector<40x32xbf16>, vector<32x32xbf16>, vector<40x32xf32> -> vector<40x32xf32>
    %c2_67 = arith.constant 2 : index
    %c0_68 = arith.constant 0 : index
    %c0_69 = arith.constant 0 : index
    %139 = vector.load %arg3[%c2_67, %c0_68, %c0_69] : memref<7x1x32xf32, #tpu.memory_space<vmem>>, vector<1x1x32xf32>
    %140 = vector.shape_cast %139 : vector<1x1x32xf32> to vector<1x32xf32>
    %c2_70 = arith.constant 2 : index
    %c0_71 = arith.constant 0 : index
    %c0_72 = arith.constant 0 : index
    %141 = vector.load %arg4[%c2_70, %c0_71, %c0_72] : memref<7x1x32xf32, #tpu.memory_space<vmem>>, vector<1x1x32xf32>
    %142 = vector.shape_cast %141 : vector<1x1x32xf32> to vector<1x32xf32>
    %cst_73 = arith.constant dense<0.000000e+00> : vector<32xf32>
    %143 = vector.multi_reduction <add>, %138, %cst_73 [0] : vector<40x32xf32> to vector<32xf32>
    %144 = vector.shape_cast %143 : vector<32xf32> to vector<1x32xf32>
    %145 = arith.mulf %138, %138 : vector<40x32xf32>
    %cst_74 = arith.constant dense<0.000000e+00> : vector<32xf32>
    %146 = vector.multi_reduction <add>, %145, %cst_74 [0] : vector<40x32xf32> to vector<32xf32>
    %147 = vector.shape_cast %146 : vector<32xf32> to vector<1x32xf32>
    %cst_75 = arith.constant 2.500000e-02 : f32
    %148 = vector.broadcast %cst_75 : f32 to vector<1x32xf32>
    %149 = arith.mulf %144, %148 : vector<1x32xf32>
    %cst_76 = arith.constant 2.500000e-02 : f32
    %150 = vector.broadcast %cst_76 : f32 to vector<1x32xf32>
    %151 = arith.mulf %147, %150 : vector<1x32xf32>
    %152 = arith.mulf %149, %149 : vector<1x32xf32>
    %153 = arith.subf %151, %152 : vector<1x32xf32>
    %cst_77 = arith.constant 1.000000e-03 : f32
    %154 = vector.broadcast %cst_77 : f32 to vector<1x32xf32>
    %155 = arith.addf %153, %154 : vector<1x32xf32>
    %156 = math.rsqrt %155 : vector<1x32xf32>
    %157 = arith.mulf %156, %140 : vector<1x32xf32>
    %158 = arith.mulf %149, %157 : vector<1x32xf32>
    %159 = arith.subf %142, %158 : vector<1x32xf32>
    %160 = arith.truncf %157 : vector<1x32xf32> to vector<1x32xbf16>
    %161 = arith.truncf %159 : vector<1x32xf32> to vector<1x32xbf16>
    %162 = arith.truncf %138 : vector<40x32xf32> to vector<40x32xbf16>
    %163 = vector.broadcast %160 : vector<1x32xbf16> to vector<40x32xbf16>
    %164 = arith.mulf %162, %163 : vector<40x32xbf16>
    %165 = vector.broadcast %161 : vector<1x32xbf16> to vector<40x32xbf16>
    %166 = arith.addf %164, %165 : vector<40x32xbf16>
    %cst_78 = arith.constant 0.000000e+00 : bf16
    %167 = vector.broadcast %cst_78 : bf16 to vector<40x32xbf16>
    %168 = arith.maximumf %166, %167 : vector<40x32xbf16>
    %c2_79 = arith.constant 2 : index
    %c0_80 = arith.constant 0 : index
    %c0_81 = arith.constant 0 : index
    %169 = vector.load %arg5[%c2_79, %c0_80, %c0_81] : memref<7x32x32xbf16, #tpu.memory_space<vmem>>, vector<1x32x32xbf16>
    %170 = vector.shape_cast %169 : vector<1x32x32xbf16> to vector<32x32xbf16>
    %cst_82 = arith.constant dense<0.000000e+00> : vector<40x32xf32>
    %171 = tpu.matmul %168, %170, %cst_82 {dimension_numbers = #tpu.dot_dimension_numbers<[1], [0], [0], [1], [0, 0, 1, 1], [], []>} : vector<40x32xbf16>, vector<32x32xbf16>, vector<40x32xf32> -> vector<40x32xf32>
    %c2_83 = arith.constant 2 : index
    %c0_84 = arith.constant 0 : index
    %c0_85 = arith.constant 0 : index
    %172 = vector.load %arg6[%c2_83, %c0_84, %c0_85] : memref<7x1x32xf32, #tpu.memory_space<vmem>>, vector<1x1x32xf32>
    %173 = vector.shape_cast %172 : vector<1x1x32xf32> to vector<1x32xf32>
    %c2_86 = arith.constant 2 : index
    %c0_87 = arith.constant 0 : index
    %c0_88 = arith.constant 0 : index
    %174 = vector.load %arg7[%c2_86, %c0_87, %c0_88] : memref<7x1x32xf32, #tpu.memory_space<vmem>>, vector<1x1x32xf32>
    %175 = vector.shape_cast %174 : vector<1x1x32xf32> to vector<1x32xf32>
    %cst_89 = arith.constant dense<0.000000e+00> : vector<32xf32>
    %176 = vector.multi_reduction <add>, %171, %cst_89 [0] : vector<40x32xf32> to vector<32xf32>
    %177 = vector.shape_cast %176 : vector<32xf32> to vector<1x32xf32>
    %178 = arith.mulf %171, %171 : vector<40x32xf32>
    %cst_90 = arith.constant dense<0.000000e+00> : vector<32xf32>
    %179 = vector.multi_reduction <add>, %178, %cst_90 [0] : vector<40x32xf32> to vector<32xf32>
    %180 = vector.shape_cast %179 : vector<32xf32> to vector<1x32xf32>
    %cst_91 = arith.constant 2.500000e-02 : f32
    %181 = vector.broadcast %cst_91 : f32 to vector<1x32xf32>
    %182 = arith.mulf %177, %181 : vector<1x32xf32>
    %cst_92 = arith.constant 2.500000e-02 : f32
    %183 = vector.broadcast %cst_92 : f32 to vector<1x32xf32>
    %184 = arith.mulf %180, %183 : vector<1x32xf32>
    %185 = arith.mulf %182, %182 : vector<1x32xf32>
    %186 = arith.subf %184, %185 : vector<1x32xf32>
    %cst_93 = arith.constant 1.000000e-03 : f32
    %187 = vector.broadcast %cst_93 : f32 to vector<1x32xf32>
    %188 = arith.addf %186, %187 : vector<1x32xf32>
    %189 = math.rsqrt %188 : vector<1x32xf32>
    %190 = arith.mulf %189, %173 : vector<1x32xf32>
    %191 = arith.mulf %182, %190 : vector<1x32xf32>
    %192 = arith.subf %175, %191 : vector<1x32xf32>
    %193 = arith.truncf %190 : vector<1x32xf32> to vector<1x32xbf16>
    %194 = arith.truncf %192 : vector<1x32xf32> to vector<1x32xbf16>
    %195 = arith.truncf %171 : vector<40x32xf32> to vector<40x32xbf16>
    %196 = vector.broadcast %193 : vector<1x32xbf16> to vector<40x32xbf16>
    %197 = arith.mulf %195, %196 : vector<40x32xbf16>
    %198 = vector.broadcast %194 : vector<1x32xbf16> to vector<40x32xbf16>
    %199 = arith.addf %197, %198 : vector<40x32xbf16>
    %200 = arith.addf %199, %135 : vector<40x32xbf16>
    %cst_94 = arith.constant 0.000000e+00 : bf16
    %201 = vector.broadcast %cst_94 : bf16 to vector<40x32xbf16>
    %202 = arith.maximumf %200, %201 : vector<40x32xbf16>
    %c3 = arith.constant 3 : index
    %c0_95 = arith.constant 0 : index
    %c0_96 = arith.constant 0 : index
    %203 = vector.load %arg2[%c3, %c0_95, %c0_96] : memref<7x32x32xbf16, #tpu.memory_space<vmem>>, vector<1x32x32xbf16>
    %204 = vector.shape_cast %203 : vector<1x32x32xbf16> to vector<32x32xbf16>
    %cst_97 = arith.constant dense<0.000000e+00> : vector<40x32xf32>
    %205 = tpu.matmul %202, %204, %cst_97 {dimension_numbers = #tpu.dot_dimension_numbers<[1], [0], [0], [1], [0, 0, 1, 1], [], []>} : vector<40x32xbf16>, vector<32x32xbf16>, vector<40x32xf32> -> vector<40x32xf32>
    %c3_98 = arith.constant 3 : index
    %c0_99 = arith.constant 0 : index
    %c0_100 = arith.constant 0 : index
    %206 = vector.load %arg3[%c3_98, %c0_99, %c0_100] : memref<7x1x32xf32, #tpu.memory_space<vmem>>, vector<1x1x32xf32>
    %207 = vector.shape_cast %206 : vector<1x1x32xf32> to vector<1x32xf32>
    %c3_101 = arith.constant 3 : index
    %c0_102 = arith.constant 0 : index
    %c0_103 = arith.constant 0 : index
    %208 = vector.load %arg4[%c3_101, %c0_102, %c0_103] : memref<7x1x32xf32, #tpu.memory_space<vmem>>, vector<1x1x32xf32>
    %209 = vector.shape_cast %208 : vector<1x1x32xf32> to vector<1x32xf32>
    %cst_104 = arith.constant dense<0.000000e+00> : vector<32xf32>
    %210 = vector.multi_reduction <add>, %205, %cst_104 [0] : vector<40x32xf32> to vector<32xf32>
    %211 = vector.shape_cast %210 : vector<32xf32> to vector<1x32xf32>
    %212 = arith.mulf %205, %205 : vector<40x32xf32>
    %cst_105 = arith.constant dense<0.000000e+00> : vector<32xf32>
    %213 = vector.multi_reduction <add>, %212, %cst_105 [0] : vector<40x32xf32> to vector<32xf32>
    %214 = vector.shape_cast %213 : vector<32xf32> to vector<1x32xf32>
    %cst_106 = arith.constant 2.500000e-02 : f32
    %215 = vector.broadcast %cst_106 : f32 to vector<1x32xf32>
    %216 = arith.mulf %211, %215 : vector<1x32xf32>
    %cst_107 = arith.constant 2.500000e-02 : f32
    %217 = vector.broadcast %cst_107 : f32 to vector<1x32xf32>
    %218 = arith.mulf %214, %217 : vector<1x32xf32>
    %219 = arith.mulf %216, %216 : vector<1x32xf32>
    %220 = arith.subf %218, %219 : vector<1x32xf32>
    %cst_108 = arith.constant 1.000000e-03 : f32
    %221 = vector.broadcast %cst_108 : f32 to vector<1x32xf32>
    %222 = arith.addf %220, %221 : vector<1x32xf32>
    %223 = math.rsqrt %222 : vector<1x32xf32>
    %224 = arith.mulf %223, %207 : vector<1x32xf32>
    %225 = arith.mulf %216, %224 : vector<1x32xf32>
    %226 = arith.subf %209, %225 : vector<1x32xf32>
    %227 = arith.truncf %224 : vector<1x32xf32> to vector<1x32xbf16>
    %228 = arith.truncf %226 : vector<1x32xf32> to vector<1x32xbf16>
    %229 = arith.truncf %205 : vector<40x32xf32> to vector<40x32xbf16>
    %230 = vector.broadcast %227 : vector<1x32xbf16> to vector<40x32xbf16>
    %231 = arith.mulf %229, %230 : vector<40x32xbf16>
    %232 = vector.broadcast %228 : vector<1x32xbf16> to vector<40x32xbf16>
    %233 = arith.addf %231, %232 : vector<40x32xbf16>
    %cst_109 = arith.constant 0.000000e+00 : bf16
    %234 = vector.broadcast %cst_109 : bf16 to vector<40x32xbf16>
    %235 = arith.maximumf %233, %234 : vector<40x32xbf16>
    %c3_110 = arith.constant 3 : index
    %c0_111 = arith.constant 0 : index
    %c0_112 = arith.constant 0 : index
    %236 = vector.load %arg5[%c3_110, %c0_111, %c0_112] : memref<7x32x32xbf16, #tpu.memory_space<vmem>>, vector<1x32x32xbf16>
    %237 = vector.shape_cast %236 : vector<1x32x32xbf16> to vector<32x32xbf16>
    %cst_113 = arith.constant dense<0.000000e+00> : vector<40x32xf32>
    %238 = tpu.matmul %235, %237, %cst_113 {dimension_numbers = #tpu.dot_dimension_numbers<[1], [0], [0], [1], [0, 0, 1, 1], [], []>} : vector<40x32xbf16>, vector<32x32xbf16>, vector<40x32xf32> -> vector<40x32xf32>
    %c3_114 = arith.constant 3 : index
    %c0_115 = arith.constant 0 : index
    %c0_116 = arith.constant 0 : index
    %239 = vector.load %arg6[%c3_114, %c0_115, %c0_116] : memref<7x1x32xf32, #tpu.memory_space<vmem>>, vector<1x1x32xf32>
    %240 = vector.shape_cast %239 : vector<1x1x32xf32> to vector<1x32xf32>
    %c3_117 = arith.constant 3 : index
    %c0_118 = arith.constant 0 : index
    %c0_119 = arith.constant 0 : index
    %241 = vector.load %arg7[%c3_117, %c0_118, %c0_119] : memref<7x1x32xf32, #tpu.memory_space<vmem>>, vector<1x1x32xf32>
    %242 = vector.shape_cast %241 : vector<1x1x32xf32> to vector<1x32xf32>
    %cst_120 = arith.constant dense<0.000000e+00> : vector<32xf32>
    %243 = vector.multi_reduction <add>, %238, %cst_120 [0] : vector<40x32xf32> to vector<32xf32>
    %244 = vector.shape_cast %243 : vector<32xf32> to vector<1x32xf32>
    %245 = arith.mulf %238, %238 : vector<40x32xf32>
    %cst_121 = arith.constant dense<0.000000e+00> : vector<32xf32>
    %246 = vector.multi_reduction <add>, %245, %cst_121 [0] : vector<40x32xf32> to vector<32xf32>
    %247 = vector.shape_cast %246 : vector<32xf32> to vector<1x32xf32>
    %cst_122 = arith.constant 2.500000e-02 : f32
    %248 = vector.broadcast %cst_122 : f32 to vector<1x32xf32>
    %249 = arith.mulf %244, %248 : vector<1x32xf32>
    %cst_123 = arith.constant 2.500000e-02 : f32
    %250 = vector.broadcast %cst_123 : f32 to vector<1x32xf32>
    %251 = arith.mulf %247, %250 : vector<1x32xf32>
    %252 = arith.mulf %249, %249 : vector<1x32xf32>
    %253 = arith.subf %251, %252 : vector<1x32xf32>
    %cst_124 = arith.constant 1.000000e-03 : f32
    %254 = vector.broadcast %cst_124 : f32 to vector<1x32xf32>
    %255 = arith.addf %253, %254 : vector<1x32xf32>
    %256 = math.rsqrt %255 : vector<1x32xf32>
    %257 = arith.mulf %256, %240 : vector<1x32xf32>
    %258 = arith.mulf %249, %257 : vector<1x32xf32>
    %259 = arith.subf %242, %258 : vector<1x32xf32>
    %260 = arith.truncf %257 : vector<1x32xf32> to vector<1x32xbf16>
    %261 = arith.truncf %259 : vector<1x32xf32> to vector<1x32xbf16>
    %262 = arith.truncf %238 : vector<40x32xf32> to vector<40x32xbf16>
    %263 = vector.broadcast %260 : vector<1x32xbf16> to vector<40x32xbf16>
    %264 = arith.mulf %262, %263 : vector<40x32xbf16>
    %265 = vector.broadcast %261 : vector<1x32xbf16> to vector<40x32xbf16>
    %266 = arith.addf %264, %265 : vector<40x32xbf16>
    %267 = arith.addf %266, %202 : vector<40x32xbf16>
    %cst_125 = arith.constant 0.000000e+00 : bf16
    %268 = vector.broadcast %cst_125 : bf16 to vector<40x32xbf16>
    %269 = arith.maximumf %267, %268 : vector<40x32xbf16>
    %c4 = arith.constant 4 : index
    %c0_126 = arith.constant 0 : index
    %c0_127 = arith.constant 0 : index
    %270 = vector.load %arg2[%c4, %c0_126, %c0_127] : memref<7x32x32xbf16, #tpu.memory_space<vmem>>, vector<1x32x32xbf16>
    %271 = vector.shape_cast %270 : vector<1x32x32xbf16> to vector<32x32xbf16>
    %cst_128 = arith.constant dense<0.000000e+00> : vector<40x32xf32>
    %272 = tpu.matmul %269, %271, %cst_128 {dimension_numbers = #tpu.dot_dimension_numbers<[1], [0], [0], [1], [0, 0, 1, 1], [], []>} : vector<40x32xbf16>, vector<32x32xbf16>, vector<40x32xf32> -> vector<40x32xf32>
    %c4_129 = arith.constant 4 : index
    %c0_130 = arith.constant 0 : index
    %c0_131 = arith.constant 0 : index
    %273 = vector.load %arg3[%c4_129, %c0_130, %c0_131] : memref<7x1x32xf32, #tpu.memory_space<vmem>>, vector<1x1x32xf32>
    %274 = vector.shape_cast %273 : vector<1x1x32xf32> to vector<1x32xf32>
    %c4_132 = arith.constant 4 : index
    %c0_133 = arith.constant 0 : index
    %c0_134 = arith.constant 0 : index
    %275 = vector.load %arg4[%c4_132, %c0_133, %c0_134] : memref<7x1x32xf32, #tpu.memory_space<vmem>>, vector<1x1x32xf32>
    %276 = vector.shape_cast %275 : vector<1x1x32xf32> to vector<1x32xf32>
    %cst_135 = arith.constant dense<0.000000e+00> : vector<32xf32>
    %277 = vector.multi_reduction <add>, %272, %cst_135 [0] : vector<40x32xf32> to vector<32xf32>
    %278 = vector.shape_cast %277 : vector<32xf32> to vector<1x32xf32>
    %279 = arith.mulf %272, %272 : vector<40x32xf32>
    %cst_136 = arith.constant dense<0.000000e+00> : vector<32xf32>
    %280 = vector.multi_reduction <add>, %279, %cst_136 [0] : vector<40x32xf32> to vector<32xf32>
    %281 = vector.shape_cast %280 : vector<32xf32> to vector<1x32xf32>
    %cst_137 = arith.constant 2.500000e-02 : f32
    %282 = vector.broadcast %cst_137 : f32 to vector<1x32xf32>
    %283 = arith.mulf %278, %282 : vector<1x32xf32>
    %cst_138 = arith.constant 2.500000e-02 : f32
    %284 = vector.broadcast %cst_138 : f32 to vector<1x32xf32>
    %285 = arith.mulf %281, %284 : vector<1x32xf32>
    %286 = arith.mulf %283, %283 : vector<1x32xf32>
    %287 = arith.subf %285, %286 : vector<1x32xf32>
    %cst_139 = arith.constant 1.000000e-03 : f32
    %288 = vector.broadcast %cst_139 : f32 to vector<1x32xf32>
    %289 = arith.addf %287, %288 : vector<1x32xf32>
    %290 = math.rsqrt %289 : vector<1x32xf32>
    %291 = arith.mulf %290, %274 : vector<1x32xf32>
    %292 = arith.mulf %283, %291 : vector<1x32xf32>
    %293 = arith.subf %276, %292 : vector<1x32xf32>
    %294 = arith.truncf %291 : vector<1x32xf32> to vector<1x32xbf16>
    %295 = arith.truncf %293 : vector<1x32xf32> to vector<1x32xbf16>
    %296 = arith.truncf %272 : vector<40x32xf32> to vector<40x32xbf16>
    %297 = vector.broadcast %294 : vector<1x32xbf16> to vector<40x32xbf16>
    %298 = arith.mulf %296, %297 : vector<40x32xbf16>
    %299 = vector.broadcast %295 : vector<1x32xbf16> to vector<40x32xbf16>
    %300 = arith.addf %298, %299 : vector<40x32xbf16>
    %cst_140 = arith.constant 0.000000e+00 : bf16
    %301 = vector.broadcast %cst_140 : bf16 to vector<40x32xbf16>
    %302 = arith.maximumf %300, %301 : vector<40x32xbf16>
    %c4_141 = arith.constant 4 : index
    %c0_142 = arith.constant 0 : index
    %c0_143 = arith.constant 0 : index
    %303 = vector.load %arg5[%c4_141, %c0_142, %c0_143] : memref<7x32x32xbf16, #tpu.memory_space<vmem>>, vector<1x32x32xbf16>
    %304 = vector.shape_cast %303 : vector<1x32x32xbf16> to vector<32x32xbf16>
    %cst_144 = arith.constant dense<0.000000e+00> : vector<40x32xf32>
    %305 = tpu.matmul %302, %304, %cst_144 {dimension_numbers = #tpu.dot_dimension_numbers<[1], [0], [0], [1], [0, 0, 1, 1], [], []>} : vector<40x32xbf16>, vector<32x32xbf16>, vector<40x32xf32> -> vector<40x32xf32>
    %c4_145 = arith.constant 4 : index
    %c0_146 = arith.constant 0 : index
    %c0_147 = arith.constant 0 : index
    %306 = vector.load %arg6[%c4_145, %c0_146, %c0_147] : memref<7x1x32xf32, #tpu.memory_space<vmem>>, vector<1x1x32xf32>
    %307 = vector.shape_cast %306 : vector<1x1x32xf32> to vector<1x32xf32>
    %c4_148 = arith.constant 4 : index
    %c0_149 = arith.constant 0 : index
    %c0_150 = arith.constant 0 : index
    %308 = vector.load %arg7[%c4_148, %c0_149, %c0_150] : memref<7x1x32xf32, #tpu.memory_space<vmem>>, vector<1x1x32xf32>
    %309 = vector.shape_cast %308 : vector<1x1x32xf32> to vector<1x32xf32>
    %cst_151 = arith.constant dense<0.000000e+00> : vector<32xf32>
    %310 = vector.multi_reduction <add>, %305, %cst_151 [0] : vector<40x32xf32> to vector<32xf32>
    %311 = vector.shape_cast %310 : vector<32xf32> to vector<1x32xf32>
    %312 = arith.mulf %305, %305 : vector<40x32xf32>
    %cst_152 = arith.constant dense<0.000000e+00> : vector<32xf32>
    %313 = vector.multi_reduction <add>, %312, %cst_152 [0] : vector<40x32xf32> to vector<32xf32>
    %314 = vector.shape_cast %313 : vector<32xf32> to vector<1x32xf32>
    %cst_153 = arith.constant 2.500000e-02 : f32
    %315 = vector.broadcast %cst_153 : f32 to vector<1x32xf32>
    %316 = arith.mulf %311, %315 : vector<1x32xf32>
    %cst_154 = arith.constant 2.500000e-02 : f32
    %317 = vector.broadcast %cst_154 : f32 to vector<1x32xf32>
    %318 = arith.mulf %314, %317 : vector<1x32xf32>
    %319 = arith.mulf %316, %316 : vector<1x32xf32>
    %320 = arith.subf %318, %319 : vector<1x32xf32>
    %cst_155 = arith.constant 1.000000e-03 : f32
    %321 = vector.broadcast %cst_155 : f32 to vector<1x32xf32>
    %322 = arith.addf %320, %321 : vector<1x32xf32>
    %323 = math.rsqrt %322 : vector<1x32xf32>
    %324 = arith.mulf %323, %307 : vector<1x32xf32>
    %325 = arith.mulf %316, %324 : vector<1x32xf32>
    %326 = arith.subf %309, %325 : vector<1x32xf32>
    %327 = arith.truncf %324 : vector<1x32xf32> to vector<1x32xbf16>
    %328 = arith.truncf %326 : vector<1x32xf32> to vector<1x32xbf16>
    %329 = arith.truncf %305 : vector<40x32xf32> to vector<40x32xbf16>
    %330 = vector.broadcast %327 : vector<1x32xbf16> to vector<40x32xbf16>
    %331 = arith.mulf %329, %330 : vector<40x32xbf16>
    %332 = vector.broadcast %328 : vector<1x32xbf16> to vector<40x32xbf16>
    %333 = arith.addf %331, %332 : vector<40x32xbf16>
    %334 = arith.addf %333, %269 : vector<40x32xbf16>
    %cst_156 = arith.constant 0.000000e+00 : bf16
    %335 = vector.broadcast %cst_156 : bf16 to vector<40x32xbf16>
    %336 = arith.maximumf %334, %335 : vector<40x32xbf16>
    %c5 = arith.constant 5 : index
    %c0_157 = arith.constant 0 : index
    %c0_158 = arith.constant 0 : index
    %337 = vector.load %arg2[%c5, %c0_157, %c0_158] : memref<7x32x32xbf16, #tpu.memory_space<vmem>>, vector<1x32x32xbf16>
    %338 = vector.shape_cast %337 : vector<1x32x32xbf16> to vector<32x32xbf16>
    %cst_159 = arith.constant dense<0.000000e+00> : vector<40x32xf32>
    %339 = tpu.matmul %336, %338, %cst_159 {dimension_numbers = #tpu.dot_dimension_numbers<[1], [0], [0], [1], [0, 0, 1, 1], [], []>} : vector<40x32xbf16>, vector<32x32xbf16>, vector<40x32xf32> -> vector<40x32xf32>
    %c5_160 = arith.constant 5 : index
    %c0_161 = arith.constant 0 : index
    %c0_162 = arith.constant 0 : index
    %340 = vector.load %arg3[%c5_160, %c0_161, %c0_162] : memref<7x1x32xf32, #tpu.memory_space<vmem>>, vector<1x1x32xf32>
    %341 = vector.shape_cast %340 : vector<1x1x32xf32> to vector<1x32xf32>
    %c5_163 = arith.constant 5 : index
    %c0_164 = arith.constant 0 : index
    %c0_165 = arith.constant 0 : index
    %342 = vector.load %arg4[%c5_163, %c0_164, %c0_165] : memref<7x1x32xf32, #tpu.memory_space<vmem>>, vector<1x1x32xf32>
    %343 = vector.shape_cast %342 : vector<1x1x32xf32> to vector<1x32xf32>
    %cst_166 = arith.constant dense<0.000000e+00> : vector<32xf32>
    %344 = vector.multi_reduction <add>, %339, %cst_166 [0] : vector<40x32xf32> to vector<32xf32>
    %345 = vector.shape_cast %344 : vector<32xf32> to vector<1x32xf32>
    %346 = arith.mulf %339, %339 : vector<40x32xf32>
    %cst_167 = arith.constant dense<0.000000e+00> : vector<32xf32>
    %347 = vector.multi_reduction <add>, %346, %cst_167 [0] : vector<40x32xf32> to vector<32xf32>
    %348 = vector.shape_cast %347 : vector<32xf32> to vector<1x32xf32>
    %cst_168 = arith.constant 2.500000e-02 : f32
    %349 = vector.broadcast %cst_168 : f32 to vector<1x32xf32>
    %350 = arith.mulf %345, %349 : vector<1x32xf32>
    %cst_169 = arith.constant 2.500000e-02 : f32
    %351 = vector.broadcast %cst_169 : f32 to vector<1x32xf32>
    %352 = arith.mulf %348, %351 : vector<1x32xf32>
    %353 = arith.mulf %350, %350 : vector<1x32xf32>
    %354 = arith.subf %352, %353 : vector<1x32xf32>
    %cst_170 = arith.constant 1.000000e-03 : f32
    %355 = vector.broadcast %cst_170 : f32 to vector<1x32xf32>
    %356 = arith.addf %354, %355 : vector<1x32xf32>
    %357 = math.rsqrt %356 : vector<1x32xf32>
    %358 = arith.mulf %357, %341 : vector<1x32xf32>
    %359 = arith.mulf %350, %358 : vector<1x32xf32>
    %360 = arith.subf %343, %359 : vector<1x32xf32>
    %361 = arith.truncf %358 : vector<1x32xf32> to vector<1x32xbf16>
    %362 = arith.truncf %360 : vector<1x32xf32> to vector<1x32xbf16>
    %363 = arith.truncf %339 : vector<40x32xf32> to vector<40x32xbf16>
    %364 = vector.broadcast %361 : vector<1x32xbf16> to vector<40x32xbf16>
    %365 = arith.mulf %363, %364 : vector<40x32xbf16>
    %366 = vector.broadcast %362 : vector<1x32xbf16> to vector<40x32xbf16>
    %367 = arith.addf %365, %366 : vector<40x32xbf16>
    %cst_171 = arith.constant 0.000000e+00 : bf16
    %368 = vector.broadcast %cst_171 : bf16 to vector<40x32xbf16>
    %369 = arith.maximumf %367, %368 : vector<40x32xbf16>
    %c5_172 = arith.constant 5 : index
    %c0_173 = arith.constant 0 : index
    %c0_174 = arith.constant 0 : index
    %370 = vector.load %arg5[%c5_172, %c0_173, %c0_174] : memref<7x32x32xbf16, #tpu.memory_space<vmem>>, vector<1x32x32xbf16>
    %371 = vector.shape_cast %370 : vector<1x32x32xbf16> to vector<32x32xbf16>
    %cst_175 = arith.constant dense<0.000000e+00> : vector<40x32xf32>
    %372 = tpu.matmul %369, %371, %cst_175 {dimension_numbers = #tpu.dot_dimension_numbers<[1], [0], [0], [1], [0, 0, 1, 1], [], []>} : vector<40x32xbf16>, vector<32x32xbf16>, vector<40x32xf32> -> vector<40x32xf32>
    %c5_176 = arith.constant 5 : index
    %c0_177 = arith.constant 0 : index
    %c0_178 = arith.constant 0 : index
    %373 = vector.load %arg6[%c5_176, %c0_177, %c0_178] : memref<7x1x32xf32, #tpu.memory_space<vmem>>, vector<1x1x32xf32>
    %374 = vector.shape_cast %373 : vector<1x1x32xf32> to vector<1x32xf32>
    %c5_179 = arith.constant 5 : index
    %c0_180 = arith.constant 0 : index
    %c0_181 = arith.constant 0 : index
    %375 = vector.load %arg7[%c5_179, %c0_180, %c0_181] : memref<7x1x32xf32, #tpu.memory_space<vmem>>, vector<1x1x32xf32>
    %376 = vector.shape_cast %375 : vector<1x1x32xf32> to vector<1x32xf32>
    %cst_182 = arith.constant dense<0.000000e+00> : vector<32xf32>
    %377 = vector.multi_reduction <add>, %372, %cst_182 [0] : vector<40x32xf32> to vector<32xf32>
    %378 = vector.shape_cast %377 : vector<32xf32> to vector<1x32xf32>
    %379 = arith.mulf %372, %372 : vector<40x32xf32>
    %cst_183 = arith.constant dense<0.000000e+00> : vector<32xf32>
    %380 = vector.multi_reduction <add>, %379, %cst_183 [0] : vector<40x32xf32> to vector<32xf32>
    %381 = vector.shape_cast %380 : vector<32xf32> to vector<1x32xf32>
    %cst_184 = arith.constant 2.500000e-02 : f32
    %382 = vector.broadcast %cst_184 : f32 to vector<1x32xf32>
    %383 = arith.mulf %378, %382 : vector<1x32xf32>
    %cst_185 = arith.constant 2.500000e-02 : f32
    %384 = vector.broadcast %cst_185 : f32 to vector<1x32xf32>
    %385 = arith.mulf %381, %384 : vector<1x32xf32>
    %386 = arith.mulf %383, %383 : vector<1x32xf32>
    %387 = arith.subf %385, %386 : vector<1x32xf32>
    %cst_186 = arith.constant 1.000000e-03 : f32
    %388 = vector.broadcast %cst_186 : f32 to vector<1x32xf32>
    %389 = arith.addf %387, %388 : vector<1x32xf32>
    %390 = math.rsqrt %389 : vector<1x32xf32>
    %391 = arith.mulf %390, %374 : vector<1x32xf32>
    %392 = arith.mulf %383, %391 : vector<1x32xf32>
    %393 = arith.subf %376, %392 : vector<1x32xf32>
    %394 = arith.truncf %391 : vector<1x32xf32> to vector<1x32xbf16>
    %395 = arith.truncf %393 : vector<1x32xf32> to vector<1x32xbf16>
    %396 = arith.truncf %372 : vector<40x32xf32> to vector<40x32xbf16>
    %397 = vector.broadcast %394 : vector<1x32xbf16> to vector<40x32xbf16>
    %398 = arith.mulf %396, %397 : vector<40x32xbf16>
    %399 = vector.broadcast %395 : vector<1x32xbf16> to vector<40x32xbf16>
    %400 = arith.addf %398, %399 : vector<40x32xbf16>
    %401 = arith.addf %400, %336 : vector<40x32xbf16>
    %cst_187 = arith.constant 0.000000e+00 : bf16
    %402 = vector.broadcast %cst_187 : bf16 to vector<40x32xbf16>
    %403 = arith.maximumf %401, %402 : vector<40x32xbf16>
    %c6 = arith.constant 6 : index
    %c0_188 = arith.constant 0 : index
    %c0_189 = arith.constant 0 : index
    %404 = vector.load %arg2[%c6, %c0_188, %c0_189] : memref<7x32x32xbf16, #tpu.memory_space<vmem>>, vector<1x32x32xbf16>
    %405 = vector.shape_cast %404 : vector<1x32x32xbf16> to vector<32x32xbf16>
    %cst_190 = arith.constant dense<0.000000e+00> : vector<40x32xf32>
    %406 = tpu.matmul %403, %405, %cst_190 {dimension_numbers = #tpu.dot_dimension_numbers<[1], [0], [0], [1], [0, 0, 1, 1], [], []>} : vector<40x32xbf16>, vector<32x32xbf16>, vector<40x32xf32> -> vector<40x32xf32>
    %c6_191 = arith.constant 6 : index
    %c0_192 = arith.constant 0 : index
    %c0_193 = arith.constant 0 : index
    %407 = vector.load %arg3[%c6_191, %c0_192, %c0_193] : memref<7x1x32xf32, #tpu.memory_space<vmem>>, vector<1x1x32xf32>
    %408 = vector.shape_cast %407 : vector<1x1x32xf32> to vector<1x32xf32>
    %c6_194 = arith.constant 6 : index
    %c0_195 = arith.constant 0 : index
    %c0_196 = arith.constant 0 : index
    %409 = vector.load %arg4[%c6_194, %c0_195, %c0_196] : memref<7x1x32xf32, #tpu.memory_space<vmem>>, vector<1x1x32xf32>
    %410 = vector.shape_cast %409 : vector<1x1x32xf32> to vector<1x32xf32>
    %cst_197 = arith.constant dense<0.000000e+00> : vector<32xf32>
    %411 = vector.multi_reduction <add>, %406, %cst_197 [0] : vector<40x32xf32> to vector<32xf32>
    %412 = vector.shape_cast %411 : vector<32xf32> to vector<1x32xf32>
    %413 = arith.mulf %406, %406 : vector<40x32xf32>
    %cst_198 = arith.constant dense<0.000000e+00> : vector<32xf32>
    %414 = vector.multi_reduction <add>, %413, %cst_198 [0] : vector<40x32xf32> to vector<32xf32>
    %415 = vector.shape_cast %414 : vector<32xf32> to vector<1x32xf32>
    %cst_199 = arith.constant 2.500000e-02 : f32
    %416 = vector.broadcast %cst_199 : f32 to vector<1x32xf32>
    %417 = arith.mulf %412, %416 : vector<1x32xf32>
    %cst_200 = arith.constant 2.500000e-02 : f32
    %418 = vector.broadcast %cst_200 : f32 to vector<1x32xf32>
    %419 = arith.mulf %415, %418 : vector<1x32xf32>
    %420 = arith.mulf %417, %417 : vector<1x32xf32>
    %421 = arith.subf %419, %420 : vector<1x32xf32>
    %cst_201 = arith.constant 1.000000e-03 : f32
    %422 = vector.broadcast %cst_201 : f32 to vector<1x32xf32>
    %423 = arith.addf %421, %422 : vector<1x32xf32>
    %424 = math.rsqrt %423 : vector<1x32xf32>
    %425 = arith.mulf %424, %408 : vector<1x32xf32>
    %426 = arith.mulf %417, %425 : vector<1x32xf32>
    %427 = arith.subf %410, %426 : vector<1x32xf32>
    %428 = arith.truncf %425 : vector<1x32xf32> to vector<1x32xbf16>
    %429 = arith.truncf %427 : vector<1x32xf32> to vector<1x32xbf16>
    %430 = arith.truncf %406 : vector<40x32xf32> to vector<40x32xbf16>
    %431 = vector.broadcast %428 : vector<1x32xbf16> to vector<40x32xbf16>
    %432 = arith.mulf %430, %431 : vector<40x32xbf16>
    %433 = vector.broadcast %429 : vector<1x32xbf16> to vector<40x32xbf16>
    %434 = arith.addf %432, %433 : vector<40x32xbf16>
    %cst_202 = arith.constant 0.000000e+00 : bf16
    %435 = vector.broadcast %cst_202 : bf16 to vector<40x32xbf16>
    %436 = arith.maximumf %434, %435 : vector<40x32xbf16>
    %c6_203 = arith.constant 6 : index
    %c0_204 = arith.constant 0 : index
    %c0_205 = arith.constant 0 : index
    %437 = vector.load %arg5[%c6_203, %c0_204, %c0_205] : memref<7x32x32xbf16, #tpu.memory_space<vmem>>, vector<1x32x32xbf16>
    %438 = vector.shape_cast %437 : vector<1x32x32xbf16> to vector<32x32xbf16>
    %cst_206 = arith.constant dense<0.000000e+00> : vector<40x32xf32>
    %439 = tpu.matmul %436, %438, %cst_206 {dimension_numbers = #tpu.dot_dimension_numbers<[1], [0], [0], [1], [0, 0, 1, 1], [], []>} : vector<40x32xbf16>, vector<32x32xbf16>, vector<40x32xf32> -> vector<40x32xf32>
    %c6_207 = arith.constant 6 : index
    %c0_208 = arith.constant 0 : index
    %c0_209 = arith.constant 0 : index
    %440 = vector.load %arg6[%c6_207, %c0_208, %c0_209] : memref<7x1x32xf32, #tpu.memory_space<vmem>>, vector<1x1x32xf32>
    %441 = vector.shape_cast %440 : vector<1x1x32xf32> to vector<1x32xf32>
    %c6_210 = arith.constant 6 : index
    %c0_211 = arith.constant 0 : index
    %c0_212 = arith.constant 0 : index
    %442 = vector.load %arg7[%c6_210, %c0_211, %c0_212] : memref<7x1x32xf32, #tpu.memory_space<vmem>>, vector<1x1x32xf32>
    %443 = vector.shape_cast %442 : vector<1x1x32xf32> to vector<1x32xf32>
    %cst_213 = arith.constant dense<0.000000e+00> : vector<32xf32>
    %444 = vector.multi_reduction <add>, %439, %cst_213 [0] : vector<40x32xf32> to vector<32xf32>
    %445 = vector.shape_cast %444 : vector<32xf32> to vector<1x32xf32>
    %446 = arith.mulf %439, %439 : vector<40x32xf32>
    %cst_214 = arith.constant dense<0.000000e+00> : vector<32xf32>
    %447 = vector.multi_reduction <add>, %446, %cst_214 [0] : vector<40x32xf32> to vector<32xf32>
    %448 = vector.shape_cast %447 : vector<32xf32> to vector<1x32xf32>
    %cst_215 = arith.constant 2.500000e-02 : f32
    %449 = vector.broadcast %cst_215 : f32 to vector<1x32xf32>
    %450 = arith.mulf %445, %449 : vector<1x32xf32>
    %cst_216 = arith.constant 2.500000e-02 : f32
    %451 = vector.broadcast %cst_216 : f32 to vector<1x32xf32>
    %452 = arith.mulf %448, %451 : vector<1x32xf32>
    %453 = arith.mulf %450, %450 : vector<1x32xf32>
    %454 = arith.subf %452, %453 : vector<1x32xf32>
    %cst_217 = arith.constant 1.000000e-03 : f32
    %455 = vector.broadcast %cst_217 : f32 to vector<1x32xf32>
    %456 = arith.addf %454, %455 : vector<1x32xf32>
    %457 = math.rsqrt %456 : vector<1x32xf32>
    %458 = arith.mulf %457, %441 : vector<1x32xf32>
    %459 = arith.mulf %450, %458 : vector<1x32xf32>
    %460 = arith.subf %443, %459 : vector<1x32xf32>
    %461 = arith.truncf %458 : vector<1x32xf32> to vector<1x32xbf16>
    %462 = arith.truncf %460 : vector<1x32xf32> to vector<1x32xbf16>
    %463 = arith.truncf %439 : vector<40x32xf32> to vector<40x32xbf16>
    %464 = vector.broadcast %461 : vector<1x32xbf16> to vector<40x32xbf16>
    %465 = arith.mulf %463, %464 : vector<40x32xbf16>
    %466 = vector.broadcast %462 : vector<1x32xbf16> to vector<40x32xbf16>
    %467 = arith.addf %465, %466 : vector<40x32xbf16>
    %468 = arith.addf %467, %403 : vector<40x32xbf16>
    %cst_218 = arith.constant 0.000000e+00 : bf16
    %469 = vector.broadcast %cst_218 : bf16 to vector<40x32xbf16>
    %470 = arith.maximumf %468, %469 : vector<40x32xbf16>
    %c0_219 = arith.constant 0 : index
    %c0_220 = arith.constant 0 : index
    %c0_221 = arith.constant 0 : index
    %471 = vector.load %arg8[%c0_219, %c0_220, %c0_221] : memref<1x40x32xbf16, #tpu.memory_space<vmem>>, vector<1x40x32xbf16>
    %472 = vector.shape_cast %471 : vector<1x40x32xbf16> to vector<40x32xbf16>
    %473 = vector.shape_cast %470 : vector<40x32xbf16> to vector<1x40x32xbf16>
    tpu.vector_store %arg8[%c0_219, %c0_220, %c0_221], %473 {strides = array<i32>} : memref<1x40x32xbf16, #tpu.memory_space<vmem>>, vector<1x40x32xbf16>,
    return
  }
  func.func @transform_0(%arg0: i32) -> (i32, i32, i32) {
    %c0_i32 = arith.constant 0 : i32
    %c0_i32_0 = arith.constant 0 : i32
    %c0_i32_1 = arith.constant 0 : i32
    return %arg0, %c0_i32, %c0_i32_0 : i32, i32, i32
  }
  func.func @transform_1(%arg0: i32) -> (i32, i32, i32) {
    %c0_i32 = arith.constant 0 : i32
    %c0_i32_0 = arith.constant 0 : i32
    %c0_i32_1 = arith.constant 0 : i32
    %c0_i32_2 = arith.constant 0 : i32
    return %c0_i32, %c0_i32_0, %c0_i32_1 : i32, i32, i32
  }
  func.func @transform_2(%arg0: i32) -> (i32, i32, i32) {
    %c0_i32 = arith.constant 0 : i32
    %c0_i32_0 = arith.constant 0 : i32
    %c0_i32_1 = arith.constant 0 : i32
    %c0_i32_2 = arith.constant 0 : i32
    return %c0_i32, %c0_i32_0, %c0_i32_1 : i32, i32, i32
  }
  func.func @transform_3(%arg0: i32) -> (i32, i32, i32) {
    %c0_i32 = arith.constant 0 : i32
    %c0_i32_0 = arith.constant 0 : i32
    %c0_i32_1 = arith.constant 0 : i32
    %c0_i32_2 = arith.constant 0 : i32
    return %c0_i32, %c0_i32_0, %c0_i32_1 : i32, i32, i32
  }
  func.func @transform_4(%arg0: i32) -> (i32, i32, i32) {
    %c0_i32 = arith.constant 0 : i32
    %c0_i32_0 = arith.constant 0 : i32
    %c0_i32_1 = arith.constant 0 : i32
    %c0_i32_2 = arith.constant 0 : i32
    return %c0_i32, %c0_i32_0, %c0_i32_1 : i32, i32, i32
  }
  func.func @transform_5(%arg0: i32) -> (i32, i32, i32) {
    %c0_i32 = arith.constant 0 : i32
    %c0_i32_0 = arith.constant 0 : i32
    %c0_i32_1 = arith.constant 0 : i32
    %c0_i32_2 = arith.constant 0 : i32
    return %c0_i32, %c0_i32_0, %c0_i32_1 : i32, i32, i32
  }
  func.func @transform_6(%arg0: i32) -> (i32, i32, i32) {
    %c0_i32 = arith.constant 0 : i32
    %c0_i32_0 = arith.constant 0 : i32
    %c0_i32_1 = arith.constant 0 : i32
    %c0_i32_2 = arith.constant 0 : i32
    return %c0_i32, %c0_i32_0, %c0_i32_1 : i32, i32, i32
  }
  func.func @transform_7(%arg0: i32) -> (i32, i32, i32) {
    %c0_i32 = arith.constant 0 : i32
    %c0_i32_0 = arith.constant 0 : i32
    %c0_i32_1 = arith.constant 0 : i32
    return %arg0, %c0_i32, %c0_i32_0 : i32, i32, i32
  }
}

module attributes {stable_mosaic.version = 11 : i64} {
  func.func @_funcmap_kernel(%arg0: i32, %arg1: i32, %arg2: memref<1x24x32xbf16, #tpu.memory_space<vmem>>, %arg3: memref<1x24x32xbf16, #tpu.memory_space<vmem>>, %arg4: memref<1x8x24xbf16, #tpu.memory_space<vmem>>, %arg5: memref<1x8x24xbf16, #tpu.memory_space<vmem>>, %arg6: memref<1x4x8x8xf32, #tpu.memory_space<vmem>>, %arg7: memref<2x8x32xf32, #tpu.memory_space<vmem>>) attributes {dimension_semantics = [#tpu.dimension_semantics<parallel>, #tpu.dimension_semantics<arbitrary>], iteration_bounds = array<i64: 2, 1>, scalar_prefetch = 0 : i64, scratch_operands = 1 : i64, tpu.core_type = #tpu.core_type<tc>, window_params = [{transform_indices = @transform_0, window_bounds = array<i64: 1, 24, 32>}, {transform_indices = @transform_1, window_bounds = array<i64: 1, 24, 32>}, {transform_indices = @transform_2, window_bounds = array<i64: 1, 8, 24>}, {transform_indices = @transform_3, window_bounds = array<i64: 1, 8, 24>}, {transform_indices = @transform_4, window_bounds = array<i64: 1, 4, 8, 8>}]} {
    %c0_i32 = arith.constant 0 : i32
    %0 = arith.cmpi eq, %arg1, %c0_i32 : i32
    %1 = arith.extui %0 : i1 to i32
    %c0_i32_0 = arith.constant 0 : i32
    %2 = arith.cmpi ne, %1, %c0_i32_0 : i32
    scf.if %2 {
      %cst_26 = arith.constant 0.000000e+00 : f32
      %28 = vector.broadcast %cst_26 : f32 to vector<2x8x32xf32>
      %c0_27 = arith.constant 0 : index
      %c0_28 = arith.constant 0 : index
      %c0_29 = arith.constant 0 : index
      %29 = vector.load %arg7[%c0_27, %c0_28, %c0_29] : memref<2x8x32xf32, #tpu.memory_space<vmem>>, vector<2x8x32xf32>
      tpu.vector_store %arg7[%c0_27, %c0_28, %c0_29], %28 {strides = array<i32>} : memref<2x8x32xf32, #tpu.memory_space<vmem>>, vector<2x8x32xf32>,
    } else {
    }
    %c0 = arith.constant 0 : index
    %c0_1 = arith.constant 0 : index
    %c0_2 = arith.constant 0 : index
    %3 = vector.load %arg7[%c0, %c0_1, %c0_2] : memref<2x8x32xf32, #tpu.memory_space<vmem>>, vector<1x8x32xf32>
    %4 = vector.shape_cast %3 : vector<1x8x32xf32> to vector<8x32xf32>
    %c0_3 = arith.constant 0 : index
    %c0_4 = arith.constant 0 : index
    %c0_5 = arith.constant 0 : index
    %5 = vector.load %arg4[%c0_3, %c0_4, %c0_5] : memref<1x8x24xbf16, #tpu.memory_space<vmem>>, vector<1x8x24xbf16>
    %6 = vector.shape_cast %5 : vector<1x8x24xbf16> to vector<8x24xbf16>
    %c0_6 = arith.constant 0 : index
    %c0_7 = arith.constant 0 : index
    %c0_8 = arith.constant 0 : index
    %7 = vector.load %arg2[%c0_6, %c0_7, %c0_8] : memref<1x24x32xbf16, #tpu.memory_space<vmem>>, vector<1x24x32xbf16>
    %8 = vector.shape_cast %7 : vector<1x24x32xbf16> to vector<24x32xbf16>
    %cst = arith.constant dense<0.000000e+00> : vector<8x32xf32>
    %9 = tpu.matmul %6, %8, %cst {dimension_numbers = #tpu.dot_dimension_numbers<[1], [0], [0], [1], [0, 0, 1, 1], [], []>} : vector<8x24xbf16>, vector<24x32xbf16>, vector<8x32xf32> -> vector<8x32xf32>
    %10 = arith.addf %4, %9 : vector<8x32xf32>
    %c0_9 = arith.constant 0 : index
    %c0_10 = arith.constant 0 : index
    %c0_11 = arith.constant 0 : index
    %11 = vector.load %arg7[%c0_9, %c0_10, %c0_11] : memref<2x8x32xf32, #tpu.memory_space<vmem>>, vector<1x8x32xf32>
    %12 = vector.shape_cast %11 : vector<1x8x32xf32> to vector<8x32xf32>
    %13 = vector.shape_cast %10 : vector<8x32xf32> to vector<1x8x32xf32>
    tpu.vector_store %arg7[%c0_9, %c0_10, %c0_11], %13 {strides = array<i32>} : memref<2x8x32xf32, #tpu.memory_space<vmem>>, vector<1x8x32xf32>,
    %c1 = arith.constant 1 : index
    %c0_12 = arith.constant 0 : index
    %c0_13 = arith.constant 0 : index
    %14 = vector.load %arg7[%c1, %c0_12, %c0_13] : memref<2x8x32xf32, #tpu.memory_space<vmem>>, vector<1x8x32xf32>
    %15 = vector.shape_cast %14 : vector<1x8x32xf32> to vector<8x32xf32>
    %c0_14 = arith.constant 0 : index
    %c0_15 = arith.constant 0 : index
    %c0_16 = arith.constant 0 : index
    %16 = vector.load %arg5[%c0_14, %c0_15, %c0_16] : memref<1x8x24xbf16, #tpu.memory_space<vmem>>, vector<1x8x24xbf16>
    %17 = vector.shape_cast %16 : vector<1x8x24xbf16> to vector<8x24xbf16>
    %c0_17 = arith.constant 0 : index
    %c0_18 = arith.constant 0 : index
    %c0_19 = arith.constant 0 : index
    %18 = vector.load %arg3[%c0_17, %c0_18, %c0_19] : memref<1x24x32xbf16, #tpu.memory_space<vmem>>, vector<1x24x32xbf16>
    %19 = vector.shape_cast %18 : vector<1x24x32xbf16> to vector<24x32xbf16>
    %cst_20 = arith.constant dense<0.000000e+00> : vector<8x32xf32>
    %20 = tpu.matmul %17, %19, %cst_20 {dimension_numbers = #tpu.dot_dimension_numbers<[1], [0], [0], [1], [0, 0, 1, 1], [], []>} : vector<8x24xbf16>, vector<24x32xbf16>, vector<8x32xf32> -> vector<8x32xf32>
    %21 = arith.addf %15, %20 : vector<8x32xf32>
    %c1_21 = arith.constant 1 : index
    %c0_22 = arith.constant 0 : index
    %c0_23 = arith.constant 0 : index
    %22 = vector.load %arg7[%c1_21, %c0_22, %c0_23] : memref<2x8x32xf32, #tpu.memory_space<vmem>>, vector<1x8x32xf32>
    %23 = vector.shape_cast %22 : vector<1x8x32xf32> to vector<8x32xf32>
    %24 = vector.shape_cast %21 : vector<8x32xf32> to vector<1x8x32xf32>
    tpu.vector_store %arg7[%c1_21, %c0_22, %c0_23], %24 {strides = array<i32>} : memref<2x8x32xf32, #tpu.memory_space<vmem>>, vector<1x8x32xf32>,
    %c0_i32_24 = arith.constant 0 : i32
    %25 = arith.cmpi eq, %arg1, %c0_i32_24 : i32
    %26 = arith.extui %25 : i1 to i32
    %c0_i32_25 = arith.constant 0 : i32
    %27 = arith.cmpi ne, %26, %c0_i32_25 : i32
    scf.if %27 {
      %c0_26 = arith.constant 0 : index
      %c0_27 = arith.constant 0 : index
      %c0_28 = arith.constant 0 : index
      %28 = vector.load %arg7[%c0_26, %c0_27, %c0_28] : memref<2x8x32xf32, #tpu.memory_space<vmem>>, vector<1x8x32xf32>
      %29 = vector.shape_cast %28 : vector<1x8x32xf32> to vector<8x32xf32>
      %c1_29 = arith.constant 1 : index
      %c0_30 = arith.constant 0 : index
      %c0_31 = arith.constant 0 : index
      %30 = vector.load %arg7[%c1_29, %c0_30, %c0_31] : memref<2x8x32xf32, #tpu.memory_space<vmem>>, vector<1x8x32xf32>
      %31 = vector.shape_cast %30 : vector<1x8x32xf32> to vector<8x32xf32>
      %cst_32 = arith.constant dense<0.000000e+00> : vector<8x8xf32>
      %32 = tpu.matmul %29, %29, %cst_32 {dimension_numbers = #tpu.dot_dimension_numbers<[1], [1], [0], [0], [0, 0, 1, 0], [], []>} : vector<8x32xf32>, vector<8x32xf32>, vector<8x8xf32> -> vector<8x8xf32>
      %c0_33 = arith.constant 0 : index
      %c0_34 = arith.constant 0 : index
      %c0_35 = arith.constant 0 : index
      %c0_36 = arith.constant 0 : index
      %33 = vector.load %arg6[%c0_33, %c0_34, %c0_35, %c0_36] : memref<1x4x8x8xf32, #tpu.memory_space<vmem>>, vector<1x1x8x8xf32>
      %34 = vector.shape_cast %33 : vector<1x1x8x8xf32> to vector<8x8xf32>
      %35 = vector.shape_cast %32 : vector<8x8xf32> to vector<1x1x8x8xf32>
      tpu.vector_store %arg6[%c0_33, %c0_34, %c0_35, %c0_36], %35 {strides = array<i32>} : memref<1x4x8x8xf32, #tpu.memory_space<vmem>>, vector<1x1x8x8xf32>,
      %cst_37 = arith.constant dense<0.000000e+00> : vector<8x8xf32>
      %36 = tpu.matmul %29, %31, %cst_37 {dimension_numbers = #tpu.dot_dimension_numbers<[1], [1], [0], [0], [0, 0, 1, 0], [], []>} : vector<8x32xf32>, vector<8x32xf32>, vector<8x8xf32> -> vector<8x8xf32>
      %c0_38 = arith.constant 0 : index
      %c1_39 = arith.constant 1 : index
      %c0_40 = arith.constant 0 : index
      %c0_41 = arith.constant 0 : index
      %37 = vector.load %arg6[%c0_38, %c1_39, %c0_40, %c0_41] : memref<1x4x8x8xf32, #tpu.memory_space<vmem>>, vector<1x1x8x8xf32>
      %38 = vector.shape_cast %37 : vector<1x1x8x8xf32> to vector<8x8xf32>
      %39 = vector.shape_cast %36 : vector<8x8xf32> to vector<1x1x8x8xf32>
      tpu.vector_store %arg6[%c0_38, %c1_39, %c0_40, %c0_41], %39 {strides = array<i32>} : memref<1x4x8x8xf32, #tpu.memory_space<vmem>>, vector<1x1x8x8xf32>,
      %cst_42 = arith.constant dense<0.000000e+00> : vector<8x8xf32>
      %40 = tpu.matmul %31, %31, %cst_42 {dimension_numbers = #tpu.dot_dimension_numbers<[1], [1], [0], [0], [0, 0, 1, 0], [], []>} : vector<8x32xf32>, vector<8x32xf32>, vector<8x8xf32> -> vector<8x8xf32>
      %c0_43 = arith.constant 0 : index
      %c2 = arith.constant 2 : index
      %c0_44 = arith.constant 0 : index
      %c0_45 = arith.constant 0 : index
      %41 = vector.load %arg6[%c0_43, %c2, %c0_44, %c0_45] : memref<1x4x8x8xf32, #tpu.memory_space<vmem>>, vector<1x1x8x8xf32>
      %42 = vector.shape_cast %41 : vector<1x1x8x8xf32> to vector<8x8xf32>
      %43 = vector.shape_cast %40 : vector<8x8xf32> to vector<1x1x8x8xf32>
      tpu.vector_store %arg6[%c0_43, %c2, %c0_44, %c0_45], %43 {strides = array<i32>} : memref<1x4x8x8xf32, #tpu.memory_space<vmem>>, vector<1x1x8x8xf32>,
      %cst_46 = arith.constant dense<0.000000e+00> : vector<8x8xf32>
      %44 = tpu.matmul %31, %29, %cst_46 {dimension_numbers = #tpu.dot_dimension_numbers<[1], [1], [0], [0], [0, 0, 1, 0], [], []>} : vector<8x32xf32>, vector<8x32xf32>, vector<8x8xf32> -> vector<8x8xf32>
      %c0_47 = arith.constant 0 : index
      %c3 = arith.constant 3 : index
      %c0_48 = arith.constant 0 : index
      %c0_49 = arith.constant 0 : index
      %45 = vector.load %arg6[%c0_47, %c3, %c0_48, %c0_49] : memref<1x4x8x8xf32, #tpu.memory_space<vmem>>, vector<1x1x8x8xf32>
      %46 = vector.shape_cast %45 : vector<1x1x8x8xf32> to vector<8x8xf32>
      %47 = vector.shape_cast %44 : vector<8x8xf32> to vector<1x1x8x8xf32>
      tpu.vector_store %arg6[%c0_47, %c3, %c0_48, %c0_49], %47 {strides = array<i32>} : memref<1x4x8x8xf32, #tpu.memory_space<vmem>>, vector<1x1x8x8xf32>,
    } else {
    }
    return
  }
  func.func @transform_0(%arg0: i32, %arg1: i32) -> (i32, i32, i32) {
    %c0_i32 = arith.constant 0 : i32
    %c0_i32_0 = arith.constant 0 : i32
    return %arg0, %arg1, %c0_i32 : i32, i32, i32
  }
  func.func @transform_1(%arg0: i32, %arg1: i32) -> (i32, i32, i32) {
    %c0_i32 = arith.constant 0 : i32
    %c0_i32_0 = arith.constant 0 : i32
    return %arg0, %arg1, %c0_i32 : i32, i32, i32
  }
  func.func @transform_2(%arg0: i32, %arg1: i32) -> (i32, i32, i32) {
    %c0_i32 = arith.constant 0 : i32
    %c0_i32_0 = arith.constant 0 : i32
    return %arg0, %c0_i32, %arg1 : i32, i32, i32
  }
  func.func @transform_3(%arg0: i32, %arg1: i32) -> (i32, i32, i32) {
    %c0_i32 = arith.constant 0 : i32
    %c0_i32_0 = arith.constant 0 : i32
    return %arg0, %c0_i32, %arg1 : i32, i32, i32
  }
  func.func @transform_4(%arg0: i32, %arg1: i32) -> (i32, i32, i32, i32) {
    %c0_i32 = arith.constant 0 : i32
    %c0_i32_0 = arith.constant 0 : i32
    %c0_i32_1 = arith.constant 0 : i32
    %c0_i32_2 = arith.constant 0 : i32
    return %arg0, %c0_i32, %c0_i32_0, %c0_i32_1 : i32, i32, i32, i32
  }
}

</mosaic_0001>

<bundles_post_ra>
// kernel: squeeze.8
= control target key start
LH: loop header
LB: loop body
LE: loop exit
PB: predicated region body
PF: predicated region fallthrough
CT: control target
= control target key end

     0   :  { %vm82_vm0 = vcmask 261120   ;;  %s218_s0 = inlined_call_operand.vmem [shape: bf16[1,40,32], index: 0, kind: input, shape index: {}]   ;;  %s219_s1 = inlined_call_operand.vmem [shape: bf16[2,20,32], index: 1, kind: output, shape index: {}]  }
   0x1   :  { %v155_v0 = vld [vmem:[%s218_s0 + $0x10] sm:$0xf]  ;;  %v187_v1 = vld [vmem:[%s218_s0 + $0x8] sm:$0xff]   ;;  %v169_v2 = vld [vmem:[%s218_s0] sm:$0xff]  }
   0x2   :  { %v17_v3 = vunpack.c.l.bf16 %v155_v0  ;;  %v166_v4 = vunpack.c.l.bf16 %v187_v1  ;;  %v167_v5 = vunpack.c.h.bf16 %v187_v1  ;;  %v170_v6 = vunpack.c.l.bf16 %v169_v2 }
   0x3   :  { %v171_v7 = vunpack.c.h.bf16 %v169_v2 }
   0x4   :  { %83 = vst.msk [vmem:[#allocation0] sm:$0xff] %vm82_vm0, %v170_v6   ;;  %93 = vst.msk [vmem:[#allocation0 + $0x10] sm:$0xf] %vm82_vm0, %v166_v4  }
   0x5   :  { %95 = vst.msk [vmem:[#allocation0 + $0x14] sm:$0xf0] %vm82_vm0, %v166_v4   ;;  %100 = vst.msk [vmem:[#allocation0 + $0x1c] sm:$0xff] %vm82_vm0, %v167_v5  }
   0x6   :  { %105 = vst.msk [vmem:[#allocation0 + $0x24] sm:$0xff] %vm82_vm0, %v17_v3   ;;  %88 = vst.msk [vmem:[#allocation0 + $0x8] sm:$0xff] %vm82_vm0, %v171_v7  }
   0xb   :  { %v110_v8 = vld [vmem:[#allocation0] sm:$0xff]  ;;  %v121_v9 = vld [vmem:[#allocation0 + $0x10] sm:$0xff] }
   0xc   :  { %v128_v10 = vld [vmem:[#allocation0 + $0x18] sm:$0xff] }
   0xd   :  { %v115_v11 = vld [vmem:[#allocation0 + $0x8] sm:$0xff]  ;;  %v180_v12 = vpack.c.bf16 %v128_v10, %v121_v9  ;;  %v135_v13 = vld [vmem:[#allocation0 + $0x20] sm:$0xff] }
   0xe   :  { %v142_v14 = vld [vmem:[#allocation0 + $0x28] sm:$0xff]  ;;  %v175_v15 = vpack.c.bf16 %v115_v11, %v110_v8 }
   0xf   :  { %v185_v16 = vpack.c.bf16 %v142_v14, %v135_v13  ;;  %188 = vst [vmem:[%s219_s1 + $0x8] sm:$0xff] %v180_v12  }
  0x10   :  { %176 = vst [vmem:[%s219_s1] sm:$0xff] %v175_v15  }
  0x11   :  { %189 = vst [vmem:[%s219_s1 + $0x10] sm:$0xff] %v185_v16  }

// kernel: custom-call.24
= control target key start
LH: loop header
LB: loop body
LE: loop exit
PB: predicated region body
PF: predicated region fallthrough
CT: control target
= control target key end

     0   :  { %5 = vsyncpa [#allocation4], 0  ;;  %s888_s0 = inlined_call_operand.vmem [shape: f32[2,8,8], index: 0, kind: input, shape index: {}]   ;;  %s889_s1 = inlined_call_operand.vmem [shape: f32[2,8,8], index: 1, kind: output, shape index: {0}]   ;;  %s890_s2 = inlined_call_operand.hbm [shape: s32[2,8], index: 2, kind: output, shape index: {1}]   ;;  %s891_s3 = inlined_call_operand.vmem [shape: s32[2,8], index: 3, kind: output, shape index: {2}]  }
   0x1   :  { %7 = vsyncpa [#allocation4 + $0x1], 0  ;;  %s707_s12 = smov 0   ;;  %s709_s13 = smov 0  }
   0x2   :  { %s711_s14 = smov 0   ;;  %s713_s15 = smov 0  }
   0x3 LB: > { %s728_s16 = sadd.s32 4294967295, %s679_s15   ;;  %s542_s17 = sadd.s32 4294967294, %s679_s15   ;;  %s679_s15 = sphi %s713_s15, %s899_s15   ;;  %s675_s14 = sphi %s711_s14, %s898_s14   ;;  %s671_s13 = sphi %s709_s13, %s897_s13   ;;  %s667_s12 = sphi %s707_s12, %s896_s12  }
   0x4   : > { %s732_s18 = sadd.s32 1, %s679_s15   ;;  %s17_s19 = sshrl.u32 %s679_s15, 3 }
   0x5   : > { %s18_s20 = sshrl.u32 %s732_s18, 3  ;;  %s22_s21 = sadd.s32 1, %s675_s14 }
   0x6   : > { %s19_s22 = ssub.s32 %s17_s19, %s18_s20  ;;  %p32_p0 = scmp.ne.s32.totalorder %s675_s14, %s671_s13 }
   0x7   : > { %p20_p1 = scmp.eq.s32.totalorder %s19_s22, 0  ;;  %p33_p2 = scmp.eq.s32.totalorder %s728_s16, 1 }
   0x8   : > { %p38_p3 = scmp.ne.s32.totalorder %s671_s13, %s667_s12  ;;  %p39_p4 = scmp.eq.s32.totalorder %s542_s17, 1 }
   0x9   : > { %s743_s23 = scalar_select %p20_p1, %s675_s14, %s22_s21  }
   0xa   : > { %p745_p5 = por %p33_p2, %p32_p0  ;;  %p749_p6 = por %p39_p4, %p38_p3 }
   0xb   : > { %p544_p7 = scmp.ge.s32.totalorder %s679_s15, 2 }
   0xc   : > { %s85_s26 = sand.u32 (!%p544_p7), 1, %s679_s15   ;;  %s546_s27 = sshll.u32 (!%p544_p7), %s679_s15, 3 }
   0xd   : > { %83 = sbr.rel (%p544_p7) target bundleno = 20 (0x14), region = 16  ;;  %s545_s28 = sshll.u32 (!%p544_p7), %s85_s26, 3 }
   0xe   : > { %s89_s4 = scalar_lea.vmem (!%p544_p7), %s888_s0, %s546_s27  ;;  %s87_s5 = scalar_lea.vmem (!%p544_p7), [#allocation0], %s545_s28 }
   0xf   : > { %v117_v0 = vld [vmem:[%s89_s4] sm:$0xff] (!%p544_p7) }
  0x10   : > { %118 = vst [vmem:[%s87_s5] sm:$0xff] (!%p544_p7), %v117_v0 }
  0x14 PF: > { %p547_p8 = scmp.ge.s32.totalorder %s679_s15, 1  ;;  %p123_p9 = scmp.lt.s32.totalorder %s679_s15, 3 }
  0x16   : > { %p124_p10 = pnand %p547_p8, %p123_p9 }
  0x18   : > { %127 = sbr.rel (%p124_p10) target bundleno = 441 (0x1b9), region = 54 }
  0x1f   : > { %s130_s6 = sand.u32 1, %s728_s16   ;;  %s145_s7 = sand.u32 1, %s671_s13   ;;  %v163_v1 = vlaneseq  ;;  %v685_v4 = vmov 0  }
  0x20   : > { %s548_s8 = sshll.u32 %s130_s6, 3  ;;  %s767_s9 = sshll.u32 %s145_s7, 1 }
  0x21   : > { %v770_v2 = vshrl.u32 %v163_v1, 7  ;;  %s132_s10 = scalar_lea.vmem [#allocation0], %s548_s8  ;;  %s772_s11 = scalar_lea.vmem [#allocation1], %s548_s8 }
  0x22   : > { %v156_v3 = vld [vmem:[%s132_s10] sm:$0xff]  ;;  %s158_s17 = sand.u32 7, %s728_s16   ;;  %s147_s20 = scalar_lea.vmem [#allocation3], %s767_s9 }
  0x23   : > { %157 = vst [vmem:[%s772_s11] sm:$0xff] %v156_v3  ;;  %167 = vst [vmem:[#allocation7] sm:$0xff] %v770_v2  ;;  %s777_s19 = scalar_lea.vmem [#allocation2], %s158_s17  ;;  %s153_s21 = scalar_lea.vmem [#allocation6], %s767_s9 }
  0x24   : > { %162 = vst [vmem:[%s777_s19] sm:$0x1] %v685_v4  ;;  %s782_s22 = scalar_lea.vmem [#allocation5], %s158_s17  ;;  %s784_s26 = smov 0  }
  0x25 LB: >> { %v791_v7 = vstv %s683_s26  ;;  %s224_s27 = ssub.s32 128, %s683_s26  ;;  %v230_v37 = vand.u32 127, %v163_v1  ;;  %s236_s28 = scalar_lea.vmem %s772_s11, %s683_s26 [#allocation1]  ;;  %s683_s26 = sphi %s784_s26, %s173_s26  }
  0x26   : >> { %vm182_vm0 = vcmp.ge.s32.totalorder %v770_v2, %v791_v7  ;;  %s242_s30 = scalar_lea.vmem [#allocation7], %s683_s26  ;;  %vm262_vm13 = vcmp.gt.s32.totalorder %v770_v2, %v791_v7  ;;  %s173_s26 = sadd.s32 1, %s683_s26  }
  0x27   : >> { %vm254_vm10 = vcmp.gt.s32.totalorder %v230_v37, %v791_v7  ;;  %vm231_vm11 = vcmp.eq.s32.totalorder %v230_v37, %v791_v7  ;;  %p170_p11 = scmp.ge.s32.totalorder %s173_s26, 8  }
  0x28   : >> { %vm266_vm15 = vmand %vm262_vm13, %vm231_vm11  ;;  %s892_s6 = sshrl.u32 (%p170_p11), %s728_s16, 3  ;;  %s556_s8 = sshll.u32 (%p170_p11), %s728_s16, 3 }
  0x29   : > { %s557_s10 = sshll.u32 (%p170_p11), %s892_s6, 5  ;;  %s686_s6 = smov (%p170_p11), [#allocation3]  }
  0x2a   : >> { %v178_v5 = vld [vmem:[%s772_s11] sm:$0xff]  ;;  %v238_v40 = vld [vmem:[%s236_s28] ss:$0 sm:$0xff]  ;;  %s617_s17 = sshll.u32 (%p170_p11), %s686_s6, 4  ;;  %s618_s17 = int_to_ptr.vmem [resolvable:$false] %s617_s17 }
  0x2b   : >> { %v179_v6 = vand.u32 2147483647, %v178_v5  ;;  %v233_v39 = vld [vmem:[%s777_s19] ss:$0 sm:$0xff] }
  0x2c   : >> { %v244_v41 = vld [vmem:[%s242_s30] ss:$0 sm:$0xff] }
  0x2d   : >> { %vm552_vm1 = vcmp.gt.f32.partialorder %v179_v6, -inf }
  0x2e   : >> { %vm186_vm2 = vmand %vm182_vm0, %vm552_vm1 }
  0x2f   : >> { %v187_v8 = vsel %vm186_vm2, %v770_v2, %v791_v7  ;;  %v188_v9 = vsel %vm186_vm2, %v179_v6, -inf }
  0x30   : >> { %v189_v10 = vrot.slane %v188_v9, 1  ;;  %v190_v11 = vrot.slane %v187_v8, 1 }
  0x32   : >> { %vm191_vm3 = vcmp.ge.f32.partialorder %v189_v10, %v188_v9  ;;  %v194_v12 = vrot.slane %v189_v10, 1  ;;  %v195_v13 = vrot.slane %v190_v11, 1 }
  0x33   : >> { %v192_v14 = vsel %vm191_vm3, %v189_v10, %v188_v9  ;;  %v193_v15 = vsel %vm191_vm3, %v190_v11, %v187_v8 }
  0x34   : >> { %vm196_vm4 = vcmp.ge.f32.partialorder %v194_v12, %v192_v14  ;;  %v199_v16 = vrot.slane %v194_v12, 1  ;;  %v200_v17 = vrot.slane %v195_v13, 1 }
  0x35   : >> { %v197_v18 = vsel %vm196_vm4, %v194_v12, %v192_v14  ;;  %v198_v19 = vsel %vm196_vm4, %v195_v13, %v193_v15 }
  0x36   : >> { %vm201_vm5 = vcmp.ge.f32.partialorder %v199_v16, %v197_v18  ;;  %v204_v20 = vrot.slane %v199_v16, 1  ;;  %v205_v21 = vrot.slane %v200_v17, 1 }
  0x37   : >> { %v202_v22 = vsel %vm201_vm5, %v199_v16, %v197_v18  ;;  %v203_v23 = vsel %vm201_vm5, %v200_v17, %v198_v19 }
  0x38   : >> { %vm206_vm6 = vcmp.ge.f32.partialorder %v204_v20, %v202_v22  ;;  %v209_v24 = vrot.slane %v204_v20, 1  ;;  %v210_v25 = vrot.slane %v205_v21, 1 }
  0x39   : >> { %v207_v26 = vsel %vm206_vm6, %v204_v20, %v202_v22  ;;  %v208_v27 = vsel %vm206_vm6, %v205_v21, %v203_v23 }
  0x3a   : >> { %vm211_vm7 = vcmp.ge.f32.partialorder %v209_v24, %v207_v26  ;;  %v214_v28 = vrot.slane %v209_v24, 1  ;;  %v215_v29 = vrot.slane %v210_v25, 1 }
  0x3b   : >> { %v212_v30 = vsel %vm211_vm7, %v209_v24, %v207_v26  ;;  %v213_v31 = vsel %vm211_vm7, %v210_v25, %v208_v27 }
  0x3c   : >> { %vm216_vm8 = vcmp.ge.f32.partialorder %v214_v28, %v212_v30  ;;  %v219_v32 = vrot.slane %v214_v28, 1  ;;  %v220_v33 = vrot.slane %v215_v29, 1 }
  0x3d   : >> { %v217_v34 = vsel %vm216_vm8, %v214_v28, %v212_v30  ;;  %v218_v35 = vsel %vm216_vm8, %v215_v29, %v213_v31 }
  0x3e   : >> { %vm221_vm9 = vcmp.ge.f32.partialorder %v219_v32, %v217_v34 }
  0x3f   : >> { %v223_v36 = vsel %vm221_vm9, %v220_v33, %v218_v35 }
  0x40   : >> { %225 = vrot.lane.b32.xlu0 %v223_v36, %s224_s27 }
  0xb2   : >> { %v226_v38 = vpop.permute.xlu0 %225 }
  0xb3   : >> { %561 = vpush %v226_v38 }
  0xe4   : >> { %s562_s29 = spop %561 }
  0xe5   : >> { %v232_v42 = vstv %s562_s29  ;;  %s237_s4 = scalar_lea.vmem %s772_s11, %s562_s29 [#allocation1]  ;;  %s243_s5 = scalar_lea.vmem [#allocation7], %s562_s29 }
  0xe6   : >> { %v239_v43 = vld [vmem:[%s237_s4] ss:$0 sm:$0xff]  ;;  %v234_v45 = vsel %vm231_vm11, %v232_v42, %v233_v39  ;;  %s835_s29 = scalar_lea.hbm (%p170_p11), %s890_s2, %s557_s10 }
  0xe7   : >> { %v245_v44 = vld [vmem:[%s243_s5] ss:$0 sm:$0xff]  ;;  %240 = vst [vmem:[%s237_s4] sm:$0x1] %v238_v40  ;;  %vm248_vm12 = vcmp.ne.f32.partialorder %v239_v43, 0.0  ;;  %235 = vst [vmem:[%s777_s19] sm:$0x1] %v234_v45  ;;  %v255_v52 = vsel %vm254_vm10, %v239_v43, 0.0  ;;  %s348_s19 = scalar_lea.vmem (%p170_p11), %s889_s1, %s556_s8 }
  0xe8   : >> { %246 = vst [vmem:[%s243_s5] sm:$0x1] %v244_v41  ;;  %241 = vst [vmem:[%s236_s28] sm:$0x1] %v239_v43  ;;  %s339_s4 = scalar_lea.sflag (%p170_p11), [#allocation4], %s145_s7 }
  0xe9   : >> { %247 = vst [vmem:[%s242_s30] sm:$0x1] %v245_v44  ;;  %vm249_vm14 = vmand %vm231_vm11, %vm248_vm12  ;;  %s391_s30 = sshll.u32 (%p170_p11), %s147_s20, 4  ;;  %s392_s30 = int_to_ptr.vmem [resolvable:$true] %s391_s30 }
  0xea   : >> { %v250_v46 = vsel %vm249_vm14, %v239_v43, 1.0  ;;  %s613_s5 = scalar_lea.vmem (%p170_p11), %s392_s30, 32  ;;  %p620_p1 = scmp.lt.s32.totalorder (%p170_p11), %s392_s30, %s618_s17 }
  0xeb   : >> { %v263_v47 = vsel %vm262_vm13, %v250_v46, 1.0  ;;  %p614_p12 = scmp.ne.s32.totalorder (%p170_p11), %s392_s30, %s613_s5 }
  0xec   : >> { %611 = vrcp.f32 %v263_v47 }
  0xed   : > { %p615_p13 = pnand (%p170_p11), %p614_p12, %p745_p5 }
  0xee   : > { %v325_v57 = vld [vmem:[#allocation2] sm:$0x3] (%p170_p11) }
  0xef   : >> { %v259_v49 = vld [vmem:[%s772_s11] sm:$0xff]  ;;  %327 = vst [vmem:[%s147_s20] sm:$0x3] (%p170_p11), %v325_v57  ;;  %p616_p0 = pneg (%p170_p11), %p615_p13 }
  0xf0   : > { %v273_v56 = vld [vmem:[#allocation7] sm:$0xff] (%p170_p11) }
  0xf6   : >> { %v612_v48 = vpop.eup %611 }
  0xf7   : >> { %v265_v50 = vmul.f32 %v612_v48, %v259_v49 }
  0xf9   : >> { %v267_v51 = vsel %vm266_vm15, %v265_v50, 0.0 }
  0xfa   : >> { %268 = vadd.xlane.f32.xlu0 %v267_v51 }
 0x127   : > { %289 = vxpose.xlu0.b32.start.end [1/1] (short) (narrow) (%p170_p11), %v273_v56, 8 }
 0x186   : > { %172 = sbr.rel (!%p170_p11) target bundleno = 37 (0x25), region = 210 }
 0x187   : >> { %v269_v53 = vpop.xlane.xlu0 %268 }
 0x188   : >> { %v270_v54 = vmul.f32 %v269_v53, %v255_v52 }
 0x18a   : >> { %v271_v55 = vsub.f32 %v265_v50, %v270_v54 }
 0x18c   : >> { %272 = vst [vmem:[%s772_s11] sm:$0xff] %v271_v55 }
 0x193   : > { %v376_v58 = vld [vmem:[%s772_s11] sm:$0xff]  ;;  %s619_s11 = scalar_lea.vmem %s618_s17, 64 }
 0x194   : > { %377 = vst [vmem:[%s348_s19] sm:$0xff] %v376_v58  ;;  %p621_p2 = scmp.lt.s32.totalorder %s619_s11, %s613_s5 }
 0x196   : > { %p622_p3 = por %p621_p2, %p620_p1 }
 0x198   : > { %p623_p4 = pnand %p622_p3, %p616_p0 }
 0x19a   : > { %626 = shalt.err (!%p623_p4)
}
 0x19b   : > { %s627_s7 = scalar_lea.hbm %s835_s29, 32  ;;  %s631_s6 = scalar_lea.hbm %s890_s2, 32 }
 0x19c   : > { %p628_p8 = scmp.ne.s32.totalorder %s835_s29, %s627_s7  ;;  %p632_p11 = scmp.lt.u32.totalorder %s835_s29, %s890_s2 }
 0x19d   : > { %p633_p12 = scmp.lt.u32.totalorder %s631_s6, %s627_s7  ;;  %p635_p0 = scmp.lt.u32.totalorder %s627_s7, %s835_s29 }
 0x19e   : > { %p629_p9 = pnand %p628_p8, %p745_p5 }
 0x19f   : > { %p634_p13 = por %p633_p12, %p632_p11 }
 0x1a0   : > { %p630_p10 = pneg %p629_p9 }
 0x1a1   : > { %p636_p1 = por %p635_p0, %p634_p13 }
 0x1a3   : > { %p637_p2 = pnand %p636_p1, %p630_p10 }
 0x1a5   : > { %640 = shalt.err (!%p637_p2)
}
 0x1a6   : > { %563 = dma.vmem_to_hbm [thread:$0]  (%p745_p5), %s392_s30, 32, %s835_s29, %s339_s4  }
 0x1a7   : > { %v305_v59 = vpop.trf.xlu0  ;;  %s895_s19 = sshrl.u32 (%p745_p5), %s728_s16, 3 }
 0x1a8   : > { %321 = vst [vmem:[%s782_s22] sm:$0x1] %v305_v59  ;;  %s558_s27 = sshll.u32 (%p745_p5), %s895_s19, 1 }
 0x1a9   : > { %s400_s17 = scalar_lea.vmem (%p745_p5), %s891_s3, %s558_s27 }
 0x1aa   : > { %397 = sbr.rel (!%p745_p5) target bundleno = 441 (0x1b9), region = 104 }
 0x1af   : > { %v331_v60 = vld [vmem:[#allocation5] sm:$0x3] }
 0x1b0   : > { %333 = vst [vmem:[%s153_s21] sm:$0x3] %v331_v60 }
 0x1b7   : > { %v416_v61 = vld [vmem:[%s153_s21] sm:$0x3] }
 0x1b8   : > { %417 = vst [vmem:[%s400_s17] sm:$0x3] %v416_v61 }
 0x1b9 PF: > { %s444_s22 = sand.u32 1, %s667_s12   ;;  %p566_p5 = pnand %p544_p7, %p749_p6 }
 0x1ba   : > { %s445_s24 = scalar_lea.sflag [#allocation4], %s444_s22 }
 0x1bb   : > { %662 = dma.done.wait (!%p566_p5), %s445_s24, 32  }
 0x1bc   : > { %664 = vsyncadd (!%p566_p5), %s445_s24, 4294967264  ;;  %p10_p3 = scmp.ge.s32.totalorder %s732_s18, 4   ;;  %s896_s12 = smov %s671_s13 }
 0x1bd   : > { %s897_s13 = smov %s675_s14  ;;  %s898_s14 = smov %s743_s23 }
 0x1be   : > { %s899_s15 = smov %s732_s18  ;;  %12 = sbr.rel (!%p10_p3) target bundleno = 3 (0x3), region = 221 }
 0x1c5   :  { %457 = vsyncpa [#allocation4], 1 }
 0x1c6   :  { %459 = vsyncpa [#allocation4 + $0x1], 1 }

// kernel: custom-call.26
= control target key start
LH: loop header
LB: loop body
LE: loop exit
PB: predicated region body
PF: predicated region fallthrough
CT: control target
= control target key end

     0   :  { %s385_s6 = smov 0   ;;  %s387_s7 = smov 0   ;;  %s443_s0 = inlined_call_operand.vmem [shape: f32[2,1,8,8], index: 0, kind: input, shape index: {}]   ;;  %s444_s1 = inlined_call_operand.vmem [shape: f32[2,1,8,8], index: 1, kind: output, shape index: {}]  }
   0x1   :  { %s389_s8 = smov 0  }
   0x2 LB: > { %s311_s9 = sadd.s32 4294967295, %s372_s8   ;;  %s33_s10 = sadd.s32 1, %s368_s7  ;;  %s372_s8 = sphi %s389_s8, %s7_s8   ;;  %s368_s7 = sphi %s387_s7, %s446_s7   ;;  %s364_s6 = sphi %s385_s6, %s445_s6  }
   0x3   : > { %p35_p0 = scmp.ge.s32.totalorder %s33_s10, 2  ;;  %p313_p1 = scmp.ge.s32.totalorder %s372_s8, 2 }
   0x4   : > { %s49_s11 = sand.u32 (!%p313_p1), 1, %s372_s8   ;;  %s315_s12 = sshll.u32 (!%p313_p1), %s368_s7, 3 }
   0x5   : > { %s448_s10 = smov (%p35_p0, %s33_s10), 0  ;;  %47 = sbr.rel (%p313_p1) target bundleno = 12 (0xc), region = 16 }
   0x6   : > { %s314_s13 = sshll.u32 (!%p313_p1), %s49_s11, 3  ;;  %s56_s16 = scalar_lea.vmem (!%p313_p1), %s443_s0, %s315_s12 }
   0x7   : > { %v84_v0 = vld [vmem:[%s56_s16] sm:$0xff] (!%p313_p1)  ;;  %s51_s17 = scalar_lea.vmem (!%p313_p1), [#allocation0], %s314_s13 }
   0x8   : > { %85 = vst [vmem:[%s51_s17] sm:$0xff] (!%p313_p1), %v84_v0 }
   0xc PF: > { %p316_p2 = scmp.ge.s32.totalorder %s372_s8, 1  ;;  %p90_p3 = scmp.lt.s32.totalorder %s372_s8, 3 }
   0xe   : > { %p91_p4 = pnand %p316_p2, %p90_p3 }
  0x10   : > { %94 = sbr.rel (%p91_p4) target bundleno = 1213 (0x4bd), region = 54 }
  0x17   : > { %s97_s18 = sand.u32 1, %s311_s9   ;;  %v108_v1 = vlaneseq  ;;  %v374_v10 = vmov -1.0   ;;  %s320_s21 = sshll.u32 %s364_s6, 3 }
  0x18   : > { %s317_s19 = sshll.u32 %s97_s18, 3  ;;  %s219_s24 = scalar_lea.vmem %s444_s1, %s320_s21 }
  0x19   : > { %v412_v2 = vand.u32 127, %v108_v1  ;;  %v112_v3 = vshrl.u32 %v108_v1, 7  ;;  %s99_s20 = scalar_lea.vmem [#allocation0], %s317_s19 }
  0x1a   : > { %v115_v4 = vld [vmem:[%s99_s20] sm:$0xff] }
  0x1b   : > { %vm110_vm0 = vcmp.lt.s32.totalorder %v412_v2, 8  ;;  %vm114_vm1 = vcmp.eq.s32.totalorder %v112_v3, %v412_v2  ;;  %vm119_vm2 = vcmp.ge.s32.totalorder %v112_v3, %v412_v2  ;;  %vm133_vm4 = vcmp.eq.s32.totalorder %v412_v2, 0 }
  0x1c   : > { %v116_v5 = vsel %vm114_vm1, %v115_v4, 0.0  ;;  %vm120_vm3 = vmand %vm119_vm2, %vm110_vm0  ;;  %vm130_vm5 = vcmp.eq.s32.totalorder %v412_v2, %v112_v3  ;;  %v134_v11 = vsel %vm133_vm4, 1.0, %v374_v10  ;;  %vm141_vm6 = vcmp.eq.s32.totalorder %v412_v2, 1 }
  0x1d   : > { %v121_v6 = vsel %vm120_vm3, %v115_v4, 0.0  ;;  %117 = vadd.xlane.f32.xlu0 %v116_v5  ;;  %v135_v12 = vsel %vm130_vm5, %v134_v11, 0.0  ;;  %vm151_vm7 = vcmp.eq.s32.totalorder %v412_v2, 2  ;;  %vm161_vm8 = vcmp.eq.s32.totalorder %v412_v2, 3 }
  0x1e   : > { %vm171_vm9 = vcmp.eq.s32.totalorder %v412_v2, 4  ;;  %vm181_vm10 = vcmp.eq.s32.totalorder %v412_v2, 5  ;;  %vm191_vm11 = vcmp.eq.s32.totalorder %v412_v2, 6  ;;  %vm201_vm12 = vcmp.eq.s32.totalorder %v412_v2, 7 }
  0xaa   : > { %v417_v7 = vpop.xlane.xlu0 %117 }
  0xab   : > { %348 = vrcp.f32 %v417_v7  ;;  %vm208_vm13 = vweird.f32 %v417_v7 }
  0xb5   : > { %v349_v8 = vpop.eup %348 }
  0xb6   : > { %v123_v9 = vmul.f32 %v349_v8, %v121_v6 }
  0xb8   : > { %124 = vst [vmem:[#allocation2] sm:$0xff] %v123_v9 }
  0xbf   : > { %v137_v13 = vld [vmem:[#allocation2 + $0x1] ss:$0 sm:$0xff]  ;;  %v147_v16 = vld [vmem:[#allocation2 + $0x2] ss:$0 sm:$0xff]  ;;  %v157_v21 = vld [vmem:[#allocation2 + $0x3] ss:$0 sm:$0xff] }
  0xc0   : > { %v138_v14 = vxor.u32 2147483648, %v137_v13  ;;  %v148_v18 = vxor.u32 2147483648, %v147_v16  ;;  %v158_v23 = vxor.u32 2147483648, %v157_v21  ;;  %v167_v26 = vld [vmem:[#allocation2 + $0x4] ss:$0 sm:$0xff] }
  0xc1   : > { %v168_v28 = vxor.u32 2147483648, %v167_v26  ;;  %v177_v31 = vld [vmem:[#allocation2 + $0x5] ss:$0 sm:$0xff]  ;;  %v187_v36 = vld [vmem:[#allocation2 + $0x6] ss:$0 sm:$0xff] }
  0xc2   : > { %v142_v15 = vmul.f32 %v138_v14, %v135_v12  ;;  %v178_v33 = vxor.u32 2147483648, %v177_v31  ;;  %v188_v38 = vxor.u32 2147483648, %v187_v36  ;;  %v197_v41 = vld [vmem:[#allocation2 + $0x7] ss:$0 sm:$0xff] }
  0xc3   : > { %v198_v43 = vxor.u32 2147483648, %v197_v41 }
  0xc4   : > { %143 = vadd.xlane.f32.xlu0 %v142_v15 }
 0x151   : > { %v144_v17 = vpop.xlane.xlu0 %143 }
 0x152   : > { %v145_v19 = vsel %vm141_vm6, %v144_v17, %v135_v12 }
 0x153   : > { %v152_v20 = vmul.f32 %v148_v18, %v145_v19 }
 0x155   : > { %153 = vadd.xlane.f32.xlu1 %v152_v20 }
 0x1e2   : > { %v154_v22 = vpop.xlane.xlu1 %153 }
 0x1e3   : > { %v155_v24 = vsel %vm151_vm7, %v154_v22, %v145_v19 }
 0x1e4   : > { %v162_v25 = vmul.f32 %v158_v23, %v155_v24 }
 0x1e6   : > { %163 = vadd.xlane.f32.xlu1 %v162_v25 }
 0x273   : > { %v164_v27 = vpop.xlane.xlu1 %163 }
 0x274   : > { %v165_v29 = vsel %vm161_vm8, %v164_v27, %v155_v24 }
 0x275   : > { %v172_v30 = vmul.f32 %v168_v28, %v165_v29 }
 0x277   : > { %173 = vadd.xlane.f32.xlu0 %v172_v30 }
 0x304   : > { %v174_v32 = vpop.xlane.xlu0 %173 }
 0x305   : > { %v175_v34 = vsel %vm171_vm9, %v174_v32, %v165_v29 }
 0x306   : > { %v182_v35 = vmul.f32 %v178_v33, %v175_v34 }
 0x308   : > { %183 = vadd.xlane.f32.xlu1 %v182_v35 }
 0x395   : > { %v184_v37 = vpop.xlane.xlu1 %183 }
 0x396   : > { %v185_v39 = vsel %vm181_vm10, %v184_v37, %v175_v34 }
 0x397   : > { %v192_v40 = vmul.f32 %v188_v38, %v185_v39 }
 0x399   : > { %193 = vadd.xlane.f32.xlu0 %v192_v40 }
 0x426   : > { %v194_v42 = vpop.xlane.xlu0 %193 }
 0x427   : > { %v195_v44 = vsel %vm191_vm11, %v194_v42, %v185_v39 }
 0x428   : > { %v202_v45 = vmul.f32 %v198_v43, %v195_v44 }
 0x42a   : > { %203 = vadd.xlane.f32.xlu1 %v202_v45 }
 0x4b7   : > { %v204_v46 = vpop.xlane.xlu1 %203 }
 0x4b8   : > { %v205_v47 = vsel %vm201_vm12, %v204_v46, %v195_v44 }
 0x4b9   : > { %v207_v48 = vmul.f32 %v349_v8, %v205_v47 }
 0x4bb   : > { %v209_v49 = vsel %vm208_vm13, %v205_v47, %v207_v48 }
 0x4bc   : > { %248 = vst [vmem:[%s219_s24] sm:$0xff] %v209_v49 }
 0x4bd PF: > { %s7_s8 = sadd.s32 1, %s372_s8   ;;  %s445_s6 = smov %s368_s7 }
 0x4be   : > { %p4_p5 = scmp.ge.s32.totalorder %s7_s8, 4   ;;  %s446_s7 = smov %s448_s10 }
 0x4c0   :  { %6 = sbr.rel (!%p4_p5) target bundleno = 2 (0x2), region = 125 }

// kernel: custom-call.25
= control target key start
LH: loop header
LB: loop body
LE: loop exit
PB: predicated region body
PF: predicated region fallthrough
CT: control target
= control target key end

     0   :  { %s384_s6 = smov 0   ;;  %s386_s7 = smov 0   ;;  %s442_s0 = inlined_call_operand.vmem [shape: f32[2,1,8,8], index: 0, kind: input, shape index: {}]   ;;  %s443_s1 = inlined_call_operand.vmem [shape: f32[2,1,8,8], index: 1, kind: output, shape index: {}]  }
   0x1   :  { %s388_s8 = smov 0  }
   0x2 LB: > { %s310_s9 = sadd.s32 4294967295, %s371_s8   ;;  %s33_s10 = sadd.s32 1, %s367_s7  ;;  %s371_s8 = sphi %s388_s8, %s7_s8   ;;  %s367_s7 = sphi %s386_s7, %s445_s7   ;;  %s363_s6 = sphi %s384_s6, %s444_s6  }
   0x3   : > { %p35_p0 = scmp.ge.s32.totalorder %s33_s10, 2  ;;  %p312_p1 = scmp.ge.s32.totalorder %s371_s8, 2 }
   0x4   : > { %s49_s11 = sand.u32 (!%p312_p1), 1, %s371_s8   ;;  %s314_s12 = sshll.u32 (!%p312_p1), %s367_s7, 3 }
   0x5   : > { %s447_s10 = smov (%p35_p0, %s33_s10), 0  ;;  %47 = sbr.rel (%p312_p1) target bundleno = 12 (0xc), region = 16 }
   0x6   : > { %s313_s13 = sshll.u32 (!%p312_p1), %s49_s11, 3  ;;  %s56_s16 = scalar_lea.vmem (!%p312_p1), %s442_s0, %s314_s12 }
   0x7   : > { %v84_v0 = vld [vmem:[%s56_s16] sm:$0xff] (!%p312_p1)  ;;  %s51_s17 = scalar_lea.vmem (!%p312_p1), [#allocation0], %s313_s13 }
   0x8   : > { %85 = vst [vmem:[%s51_s17] sm:$0xff] (!%p312_p1), %v84_v0 }
   0xc PF: > { %p315_p2 = scmp.ge.s32.totalorder %s371_s8, 1  ;;  %p90_p3 = scmp.lt.s32.totalorder %s371_s8, 3 }
   0xe   : > { %p91_p4 = pnand %p315_p2, %p90_p3 }
  0x10   : > { %94 = sbr.rel (%p91_p4) target bundleno = 1213 (0x4bd), region = 54 }
  0x17   : > { %s97_s18 = sand.u32 1, %s310_s9   ;;  %v108_v1 = vlaneseq  ;;  %v373_v10 = vmov -1.0   ;;  %s319_s21 = sshll.u32 %s363_s6, 3 }
  0x18   : > { %s316_s19 = sshll.u32 %s97_s18, 3  ;;  %s218_s24 = scalar_lea.vmem %s443_s1, %s319_s21 }
  0x19   : > { %v411_v2 = vand.u32 127, %v108_v1  ;;  %v112_v3 = vshrl.u32 %v108_v1, 7  ;;  %s99_s20 = scalar_lea.vmem [#allocation0], %s316_s19 }
  0x1a   : > { %v115_v4 = vld [vmem:[%s99_s20] sm:$0xff] }
  0x1b   : > { %vm110_vm0 = vcmp.lt.s32.totalorder %v411_v2, 8  ;;  %vm114_vm1 = vcmp.eq.s32.totalorder %v112_v3, %v411_v2  ;;  %vm119_vm2 = vcmp.le.s32.totalorder %v112_v3, %v411_v2  ;;  %vm133_vm4 = vcmp.eq.s32.totalorder %v411_v2, 7 }
  0x1c   : > { %v116_v5 = vsel %vm114_vm1, %v115_v4, 0.0  ;;  %vm120_vm3 = vmand %vm119_vm2, %vm110_vm0  ;;  %vm130_vm5 = vcmp.eq.s32.totalorder %v411_v2, %v112_v3  ;;  %v134_v11 = vsel %vm133_vm4, 1.0, %v373_v10  ;;  %vm141_vm6 = vcmp.eq.s32.totalorder %v411_v2, 6 }
  0x1d   : > { %v121_v6 = vsel %vm120_vm3, %v115_v4, 0.0  ;;  %117 = vadd.xlane.f32.xlu0 %v116_v5  ;;  %v135_v12 = vsel %vm130_vm5, %v134_v11, 0.0  ;;  %vm151_vm7 = vcmp.eq.s32.totalorder %v411_v2, 5  ;;  %vm161_vm8 = vcmp.eq.s32.totalorder %v411_v2, 4 }
  0x1e   : > { %vm171_vm9 = vcmp.eq.s32.totalorder %v411_v2, 3  ;;  %vm181_vm10 = vcmp.eq.s32.totalorder %v411_v2, 2  ;;  %vm191_vm11 = vcmp.eq.s32.totalorder %v411_v2, 1  ;;  %vm200_vm12 = vcmp.eq.s32.totalorder %v411_v2, 0 }
  0xaa   : > { %v416_v7 = vpop.xlane.xlu0 %117 }
  0xab   : > { %347 = vrcp.f32 %v416_v7  ;;  %vm207_vm13 = vweird.f32 %v416_v7 }
  0xb5   : > { %v348_v8 = vpop.eup %347 }
  0xb6   : > { %v123_v9 = vmul.f32 %v348_v8, %v121_v6 }
  0xb8   : > { %124 = vst [vmem:[#allocation2] sm:$0xff] %v123_v9 }
  0xbf   : > { %v137_v13 = vld [vmem:[#allocation2 + $0x6] ss:$0 sm:$0xff]  ;;  %v147_v16 = vld [vmem:[#allocation2 + $0x5] ss:$0 sm:$0xff]  ;;  %v157_v21 = vld [vmem:[#allocation2 + $0x4] ss:$0 sm:$0xff] }
  0xc0   : > { %v138_v14 = vxor.u32 2147483648, %v137_v13  ;;  %v148_v18 = vxor.u32 2147483648, %v147_v16  ;;  %v158_v23 = vxor.u32 2147483648, %v157_v21  ;;  %v167_v26 = vld [vmem:[#allocation2 + $0x3] ss:$0 sm:$0xff] }
  0xc1   : > { %v168_v28 = vxor.u32 2147483648, %v167_v26  ;;  %v177_v31 = vld [vmem:[#allocation2 + $0x2] ss:$0 sm:$0xff]  ;;  %v187_v36 = vld [vmem:[#allocation2 + $0x1] ss:$0 sm:$0xff] }
  0xc2   : > { %v142_v15 = vmul.f32 %v138_v14, %v135_v12  ;;  %v178_v33 = vxor.u32 2147483648, %v177_v31  ;;  %v188_v38 = vxor.u32 2147483648, %v187_v36  ;;  %v196_v41 = vld [vmem:[#allocation2] ss:$0 sm:$0xff] }
  0xc3   : > { %v197_v43 = vxor.u32 2147483648, %v196_v41 }
  0xc4   : > { %143 = vadd.xlane.f32.xlu0 %v142_v15 }
 0x151   : > { %v144_v17 = vpop.xlane.xlu0 %143 }
 0x152   : > { %v145_v19 = vsel %vm141_vm6, %v144_v17, %v135_v12 }
 0x153   : > { %v152_v20 = vmul.f32 %v148_v18, %v145_v19 }
 0x155   : > { %153 = vadd.xlane.f32.xlu1 %v152_v20 }
 0x1e2   : > { %v154_v22 = vpop.xlane.xlu1 %153 }
 0x1e3   : > { %v155_v24 = vsel %vm151_vm7, %v154_v22, %v145_v19 }
 0x1e4   : > { %v162_v25 = vmul.f32 %v158_v23, %v155_v24 }
 0x1e6   : > { %163 = vadd.xlane.f32.xlu1 %v162_v25 }
 0x273   : > { %v164_v27 = vpop.xlane.xlu1 %163 }
 0x274   : > { %v165_v29 = vsel %vm161_vm8, %v164_v27, %v155_v24 }
 0x275   : > { %v172_v30 = vmul.f32 %v168_v28, %v165_v29 }
 0x277   : > { %173 = vadd.xlane.f32.xlu0 %v172_v30 }
 0x304   : > { %v174_v32 = vpop.xlane.xlu0 %173 }
 0x305   : > { %v175_v34 = vsel %vm171_vm9, %v174_v32, %v165_v29 }
 0x306   : > { %v182_v35 = vmul.f32 %v178_v33, %v175_v34 }
 0x308   : > { %183 = vadd.xlane.f32.xlu1 %v182_v35 }
 0x395   : > { %v184_v37 = vpop.xlane.xlu1 %183 }
 0x396   : > { %v185_v39 = vsel %vm181_vm10, %v184_v37, %v175_v34 }
 0x397   : > { %v192_v40 = vmul.f32 %v188_v38, %v185_v39 }
 0x399   : > { %193 = vadd.xlane.f32.xlu0 %v192_v40 }
 0x426   : > { %v194_v42 = vpop.xlane.xlu0 %193 }
 0x427   : > { %v195_v44 = vsel %vm191_vm11, %v194_v42, %v185_v39 }
 0x428   : > { %v201_v45 = vmul.f32 %v197_v43, %v195_v44 }
 0x42a   : > { %202 = vadd.xlane.f32.xlu1 %v201_v45 }
 0x4b7   : > { %v203_v46 = vpop.xlane.xlu1 %202 }
 0x4b8   : > { %v204_v47 = vsel %vm200_vm12, %v203_v46, %v195_v44 }
 0x4b9   : > { %v206_v48 = vmul.f32 %v348_v8, %v204_v47 }
 0x4bb   : > { %v208_v49 = vsel %vm207_vm13, %v204_v47, %v206_v48 }
 0x4bc   : > { %247 = vst [vmem:[%s218_s24] sm:$0xff] %v208_v49 }
 0x4bd PF: > { %s7_s8 = sadd.s32 1, %s371_s8   ;;  %s444_s6 = smov %s367_s7 }
 0x4be   : > { %p4_p5 = scmp.ge.s32.totalorder %s7_s8, 4   ;;  %s445_s7 = smov %s447_s10 }
 0x4c0   :  { %6 = sbr.rel (!%p4_p5) target bundleno = 2 (0x2), region = 124 }

// kernel: surfmnet_forward.3
= control target key start
LH: loop header
LB: loop body
LE: loop exit
PB: predicated region body
PF: predicated region fallthrough
CT: control target
= control target key end

     0   :  { %s1033_s15 = smov 0   ;;  %s1035_s16 = smov 0   ;;  %s1114_s0 = inlined_call_operand.vmem [shape: bf16[2,24,32], index: 0, kind: input, shape index: {}]   ;;  %s1115_s1 = inlined_call_operand.vmem [shape: bf16[2,24,32], index: 1, kind: input, shape index: {}]   ;;  %s1116_s2 = inlined_call_operand.vmem [shape: bf16[2,8,24], index: 2, kind: input, shape index: {}]   ;;  %s1117_s3 = inlined_call_operand.vmem [shape: bf16[2,8,24], index: 3, kind: input, shape index: {}]   ;;  %s1118_s4 = inlined_call_operand.vmem [shape: f32[2,4,8,8], index: 4, kind: output, shape index: {}]  }
   0x1   :  { %s1037_s17 = smov 0  }
   0x2 LB: > { %s26_s18 = sadd.s32 1, %s1000_s16  ;;  %p874_p0 = scmp.ge.s32.totalorder %s1004_s17, 1  ;;  %s1004_s17 = sphi %s1037_s17, %s14_s17   ;;  %s1000_s16 = sphi %s1035_s16, %s1120_s16   ;;  %s996_s15 = sphi %s1033_s15, %s1119_s15  }
   0x3   : > { %p28_p1 = scmp.ge.s32.totalorder %s26_s18, 2  ;;  %p226_p2 = scmp.lt.s32.totalorder %s1004_s17, 3 }
   0x5   : > { %s1122_s18 = smov (%p28_p1, %s26_s18), 0  ;;  %p227_p3 = pnand %p874_p0, %p226_p2 }
   0x6   : > { %p280_p4 = scmp.lt.s32.totalorder (!%p227_p3), %s996_s15, 1  ;;  %v1006_v0 = vmov (!%p227_p3), 0.0   ;;  %vm323_vm0 = vcmask (!%p227_p3), 261120   ;;  %vm1007_vm1 = vmmov (!%p227_p3), 0   ;;  %vm344_vm2 = vcmask (!%p227_p3), 1043456  }
   0x7   : > { %230 = sbr.rel (%p227_p3) target bundleno = 469 (0x1d5), region = 36  ;;  %915 = vmatprep.subr.bf16.mxu0 (!%p227_p3), %v1006_v0  ;;  %923 = vmatprep.subr.bf16.mxu1 (!%p227_p3), %v1006_v0  ;;  %324 = vst.msk [vmem:[#allocation2] sm:$0xff] (!%p227_p3), %vm323_vm0, %v1006_v0  ;;  %325 = vst.msk [vmem:[#allocation2 + $0x8] sm:$0xff] (!%p227_p3), %vm323_vm0, %v1006_v0  ;;  %vm340_vm3 = vcmask (!%p227_p3), 195584   ;;  %vm532_vm4 = vcmask (!%p227_p3), 64512  }
   0x8   : > { %919 = vmatprep.mubr.msk.bf16.mxu0 (!%p227_p3), %vm1007_vm1, %v1006_v0  ;;  %927 = vmatprep.mubr.msk.bf16.mxu1 (!%p227_p3), %vm1007_vm1, %v1006_v0 }
   0xe   : > { %s1124_s15 = smov (!%p280_p4, %s996_s15), 1  ;;  %v326_v9 = vld [vmem:[#allocation2] sm:$0xff]  ;;  %v392_v10 = vld [vmem:[#allocation2 + $0x8] sm:$0xff] }
   0xf   : > { %s951_s19 = smul.u32 12, %s1124_s15  ;;  %s877_s26 = sshll.u32 %s1124_s15, 2 }
  0x10   : > { %s305_s29 = scalar_lea.vmem %s1116_s2, %s877_s26  ;;  %s312_s6 = scalar_lea.vmem %s1117_s3, %s877_s26 }
  0x11   : > { %s287_s22 = scalar_lea.vmem %s1114_s0, %s951_s19  ;;  %s297_s25 = scalar_lea.vmem %s1115_s1, %s951_s19  ;;  %v327_v7 = vld [vmem:[%s305_s29] sm:$0xf] }
  0x12   : > { %v978_v1 = vld [vmem:[%s287_s22] sm:$0xff]   ;;  %v980_v3 = vld [vmem:[%s287_s22 + $0x8] ss:$0 sps:$4 sm:$0xff]   ;;  %s900_s7 = sshll.u32 %s1124_s15, 5 }
  0x13   : > { %v979_v2 = vld [vmem:[%s297_s25] sm:$0xff]   ;;  %916 = vmatpush3.bf16.msra.mxu0 %v978_v1  ;;  %v981_v4 = vld [vmem:[%s297_s25 + $0x8] ss:$0 sps:$4 sm:$0xff]   ;;  %v346_v5 = vsel %vm344_vm2, %v980_v3, 0  ;;  %s317_s10 = scalar_lea.vmem %s1118_s4, %s900_s7 }
  0x14   : > { %924 = vmatpush3.bf16.msra.mxu1 %v979_v2  ;;  %917 = vmatprep.subr.bf16.mxu0 %v1006_v0  ;;  %v410_v6 = vsel %vm344_vm2, %v981_v4, 0  ;;  %v393_v8 = vld [vmem:[%s312_s6] sm:$0xf] }
  0x15   : > { %925 = vmatprep.subr.bf16.mxu1 %v1006_v0 }
  0x17   : > { %918 = vmatpush3.bf16.msra.mxu0 %v346_v5 }
  0x18   : > { %926 = vmatpush3.bf16.msra.mxu1 %v410_v6  ;;  %931 = vmatprep.subr.mxu0 %v1006_v0 }
  0x19   : > { %936 = vmatprep.subr.mxu1 %v1006_v0 }
  0x1a   : > { %920 = vmatmul.mubr.msk.bf16.vlgmr.msra.gmra.mrb[0].mxu0 %vm340_vm3, %v327_v7 }
  0x1b   : > { %928 = vmatmul.mubr.msk.bf16.vlgmr.msra.gmra.mrb[0].mxu1 %vm340_vm3, %v393_v8  ;;  %933 = vmatprep.mubr.msk.f32.mxu0 %vm1007_vm1, %v1006_v0 }
  0x1c   : > { %938 = vmatprep.mubr.msk.f32.mxu1 %vm1007_vm1, %v1006_v0 }
  0xed   : > { %v382_v11 = vpop.f32.mrb[0].mxu0 }
  0xee   : > { %v388_v12 = vadd.f32 %v382_v11, %v326_v9  ;;  %v446_v13 = vpop.f32.mrb[0].mxu1  ;;  %v921_v14 = vpop.f32.mrb[1].mxu0 }
  0xef   : > { %v452_v15 = vadd.f32 %v446_v13, %v392_v10  ;;  %v929_v16 = vpop.f32.mrb[1].mxu1  ;;  %v385_v17 = vpop.f32.mrb[2].mxu0 }
  0xf0   : > { %390 = vst.msk [vmem:[#allocation2] sm:$0xff] %vm323_vm0, %v388_v12  ;;  %v449_v18 = vpop.f32.mrb[2].mxu1  ;;  %v922_v19 = vpop.f32.mrb[3].mxu0 }
  0xf1   : > { %453 = vst.msk [vmem:[#allocation2 + $0x8] sm:$0xff] %vm323_vm0, %v452_v15  ;;  %v930_v20 = vpop.f32.mrb[3].mxu1 }
  0xf7   : > { %v457_v21 = vld [vmem:[#allocation2] sm:$0xff] }
  0xf8   : > { %932 = vmatpush3.xpose.msk.msra.mxu0 %vm323_vm0, %v457_v21  ;;  %v458_v22 = vld [vmem:[#allocation2 + $0x8] sm:$0xff] }
  0xf9   : > { %937 = vmatpush3.xpose.msk.msra.mxu1 %vm323_vm0, %v458_v22  ;;  %941 = vmatprep.subr.mxu0 %v1006_v0 }
  0xfa   : > { %946 = vmatprep.subr.mxu1 %v1006_v0 }
  0xfb   : > { %934 = vmatmul.mubr.msk.f32.vlgmr.msra.gmra.mrb[4].mxu0 %vm323_vm0, %v457_v21 }
  0xfc   : > { %939 = vmatmul.mubr.msk.f32.vlgmr.msra.gmra.mrb[4].mxu1 %vm323_vm0, %v457_v21  ;;  %942 = vmatpush3.xpose.msk.msra.mxu0 %vm323_vm0, %v458_v22 }
  0xfd   : > { %947 = vmatpush3.xpose.msk.msra.mxu1 %vm323_vm0, %v457_v21  ;;  %943 = vmatprep.mubr.msk.f32.mxu0 %vm1007_vm1, %v1006_v0 }
  0xfe   : > { %948 = vmatprep.mubr.msk.f32.mxu1 %vm1007_vm1, %v1006_v0 }
  0xff   : > { %944 = vmatmul.mubr.msk.f32.vlgmr.msra.gmra.mrb[6].mxu0 %vm323_vm0, %v458_v22 }
 0x100   : > { %949 = vmatmul.mubr.msk.f32.vlgmr.msra.gmra.mrb[6].mxu1 %vm323_vm0, %v458_v22 }
 0x1ce   : > { %v528_v23 = vpop.f32.mrb[4].mxu0 }
 0x1cf   : > { %533 = vst.msk [vmem:[%s317_s10] sm:$0xff] %vm532_vm4, %v528_v23  ;;  %v603_v24 = vpop.f32.mrb[4].mxu1  ;;  %v935_v25 = vpop.f32.mrb[5].mxu0 }
 0x1d0   : > { %891 = vst.msk [vmem:[%s317_s10 + $0x8] sm:$0xff] %vm532_vm4, %v603_v24  ;;  %v940_v26 = vpop.f32.mrb[5].mxu1 }
 0x1d2   : > { %v675_v27 = vpop.f32.mrb[6].mxu0 }
 0x1d3   : > { %894 = vst.msk [vmem:[%s317_s10 + $0x10] sm:$0xff] %vm532_vm4, %v675_v27  ;;  %v747_v28 = vpop.f32.mrb[6].mxu1  ;;  %v945_v29 = vpop.f32.mrb[7].mxu0 }
 0x1d4   : > { %897 = vst.msk [vmem:[%s317_s10 + $0x18] sm:$0xff] %vm532_vm4, %v747_v28  ;;  %v950_v30 = vpop.f32.mrb[7].mxu1 }
 0x1d5 PF: > { %s14_s17 = sadd.s32 1, %s1004_s17   ;;  %s1119_s15 = smov %s1000_s16 }
 0x1d6   : > { %p11_p5 = scmp.ge.s32.totalorder %s14_s17, 4   ;;  %s1120_s16 = smov %s1122_s18 }
 0x1d8   :  { %13 = sbr.rel (!%p11_p5) target bundleno = 2 (0x2), region = 87 }

// kernel: surfmnet_forward.2
= control target key start
LH: loop header
LB: loop body
LE: loop exit
PB: predicated region body
PF: predicated region fallthrough
CT: control target
= control target key end

     0   :  { %s3181_s24 = smov 0   ;;  %s3994_s0 = inlined_call_operand.vmem [shape: bf16[2,40,32], index: 0, kind: input, shape index: {}]   ;;  %s3995_s1 = inlined_call_operand.vmem [shape: bf16[7,32,32], index: 1, kind: input, shape index: {}]   ;;  %s3996_s2 = inlined_call_operand.vmem [shape: f32[7,1,32], index: 2, kind: input, shape index: {}]   ;;  %s3997_s3 = inlined_call_operand.vmem [shape: f32[7,1,32], index: 3, kind: input, shape index: {}]   ;;  %s3998_s4 = inlined_call_operand.vmem [shape: bf16[7,32,32], index: 4, kind: input, shape index: {}]   ;;  %s3999_s5 = inlined_call_operand.vmem [shape: f32[7,1,32], index: 5, kind: input, shape index: {}]   ;;  %s4000_s6 = inlined_call_operand.vmem [shape: f32[7,1,32], index: 6, kind: input, shape index: {}]   ;;  %s4001_s7 = inlined_call_operand.vmem [shape: bf16[2,40,32], index: 7, kind: output, shape index: {}]  }
   0x1 LB: > { %s2608_s25 = sadd.s32 4294967295, %s3136_s24   ;;  %p2610_p0 = scmp.ge.s32.totalorder %s3136_s24, 1  ;;  %s3136_s24 = sphi %s3181_s24, %s17_s24  }
   0x2   : > { %p237_p1 = scmp.lt.s32.totalorder %s3136_s24, 3 }
   0x4   : > { %p238_p2 = pnand %p2610_p0, %p237_p1 }
   0x5   : > { %v3071_v0 = vld [vmem:[%s3995_s1] sm:$0xff] (!%p238_p2)   ;;  %v3138_v1 = vmov (!%p238_p2), 0.0   ;;  %v3072_v2 = vld [vmem:[%s3995_s1 + $0x8] sm:$0xff] (!%p238_p2)   ;;  %vm3139_vm0 = vmmov (!%p238_p2), 0   ;;  %p269_p3 = scmp.lt.s32.totalorder (!%p238_p2), %s2608_s25, 1  ;;  %vm314_vm1 = vcmask (!%p238_p2), 261120   ;;  %v434_v62 = vlaneseq (!%p238_p2) }
   0x6   : > { %241 = sbr.rel (%p238_p2) target bundleno = 3929 (0xf59), region = 48  ;;  %2835 = vmatprep.subr.bf16.mxu0 (!%p238_p2), %v3138_v1  ;;  %2851 = vmatprep.subr.bf16.mxu1 (!%p238_p2), %v3138_v1  ;;  %v3076_v6 = vld [vmem:[%s3998_s4] sm:$0xff] (!%p238_p2)   ;;  %v3077_v7 = vld [vmem:[%s3998_s4 + $0x8] sm:$0xff] (!%p238_p2)   ;;  %vm2547_vm2 = vcmask (!%p238_p2), 257024  }
   0x7   : > { %2836 = vmatpush3.bf16.msra.mxu0 (!%p238_p2), %v3071_v0  ;;  %2839 = vmatprep.mubr.msk.bf16.mxu0 (!%p238_p2), %vm3139_vm0, %v3138_v1  ;;  %v380_v63 = vld [vmem:[%s3996_s2] sm:$0x1] (!%p238_p2)  ;;  %v435_v0 = vshrl.u32 (!%p238_p2), %v434_v62, 7 }
   0x8   : > { %2837 = vmatprep.subr.bf16.mxu0 (!%p238_p2), %v3138_v1  ;;  %2855 = vmatprep.mubr.msk.bf16.mxu1 (!%p238_p2), %vm3139_vm0, %v3138_v1 }
   0x9   : > { %2852 = vmatpush3.bf16.msra.mxu1 (!%p238_p2), %v3076_v6 }
   0xa   : > { %2853 = vmatprep.subr.bf16.mxu1 (!%p238_p2), %v3138_v1 }
   0xb   : > { %2838 = vmatpush3.bf16.msra.mxu0 (!%p238_p2), %v3072_v2 }
   0xc   : > { %2867 = vmatprep.subr.bf16.mxu0 (!%p238_p2), %v3138_v1 }
   0xd   : > { %s4003_s25 = smov (!%p269_p3, %s2608_s25), 1  ;;  %2854 = vmatpush3.bf16.msra.mxu1 %v3077_v7  ;;  %v381_v7 = vld [vmem:[%s3997_s3] sm:$0x1] }
   0xe   : > { %s3059_s30 = smul.u32 20, %s4003_s25  ;;  %2883 = vmatprep.subr.bf16.mxu1 %v3138_v1 }
  0x10   : > { %s273_s10 = scalar_lea.vmem %s3994_s0, %s3059_s30  ;;  %s278_s21 = scalar_lea.vmem %s4001_s7, %s3059_s30 }
  0x11   : > { %v3211_v3 = vld [vmem:[%s273_s10] sm:$0xff]   ;;  %v3217_v4 = vld [vmem:[%s273_s10 + $0x8] sm:$0xff]   ;;  %v3223_v5 = vld [vmem:[%s273_s10 + $0x10] ss:$0 sps:$4 sm:$0xff]  }
  0x12   : > { %2840 = vmatmul.mubr.msk.bf16.vlgmr.msra.gmra.mrb[0].mxu0 %vm314_vm1, %v3211_v3 }
  0x13   : > { %2843 = vmatprep.mubr.msk.bf16.mxu0 %vm3139_vm0, %v3138_v1 }
  0x1a   : > { %2844 = vmatmul.mubr.msk.bf16.gmra.mrb[4].mxu0 %vm314_vm1, %v3217_v4 }
  0x1b   : > { %2847 = vmatprep.mubr.msk.bf16.mxu0 %vm3139_vm0, %v3138_v1 }
  0x22   : > { %2848 = vmatmul.mubr.msk.bf16.gmra.mrb[8].mxu0 %vm314_vm1, %v3223_v5 }
  0x23   : > { %2871 = vmatprep.mubr.msk.bf16.mxu0 %vm3139_vm0, %v3138_v1 }
  0xe5   : > { %v3237_v8 = vpop.f32.mrb[0].mxu0 }
  0xe6   : > { %v397_v9 = vmul.f32 %v3237_v8, %v3237_v8  ;;  %v2841_v10 = vpop.f32.mrb[1].mxu0  ;;  %v382_v12 = vsel %vm314_vm1, %v3237_v8, 0.0 }
  0xe7   : > { %v3241_v11 = vpop.f32.mrb[2].mxu0 }
  0xe8   : > { %v383_v13 = vsel %vm314_vm1, %v3241_v11, 0.0  ;;  %v398_v14 = vmul.f32 %v3241_v11, %v3241_v11  ;;  %v428_v15 = vpack.c.bf16 %v3241_v11, %v3237_v8  ;;  %v2842_v16 = vpop.f32.mrb[3].mxu0  ;;  %v402_v18 = vsel %vm314_vm1, %v397_v9, 0.0  ;;  %v3078_v11 = vld [vmem:[%s3995_s1 + $0x10] sm:$0xff]  }
  0xe9   : > { %v384_v17 = vadd.f32 %v383_v13, %v382_v12  ;;  %v3265_v12 = vsub.s32 0, %v435_v0  ;;  %2868 = vmatpush3.bf16.msra.mxu0 %v3078_v11 }
  0xea   : > { %v403_v19 = vsel %vm314_vm1, %v398_v14, 0.0  ;;  %2869 = vmatprep.subr.bf16.mxu0 %v3138_v1 }
  0xeb   : > { %v404_v20 = vadd.f32 %v403_v19, %v402_v18 }
  0xed   : > { %v366_v21 = vpop.f32.mrb[4].mxu0 }
  0xee   : > { %v385_v22 = vsel %vm314_vm1, %v366_v21, 0.0  ;;  %v399_v23 = vmul.f32 %v366_v21, %v366_v21  ;;  %v2845_v24 = vpop.f32.mrb[5].mxu0 }
  0xef   : > { %v386_v25 = vadd.f32 %v385_v22, %v384_v17  ;;  %v369_v26 = vpop.f32.mrb[6].mxu0 }
  0xf0   : > { %v405_v27 = vsel %vm314_vm1, %v399_v23, 0.0  ;;  %v387_v28 = vsel %vm314_vm1, %v369_v26, 0.0  ;;  %v400_v29 = vmul.f32 %v369_v26, %v369_v26  ;;  %v429_v30 = vpack.c.bf16 %v369_v26, %v366_v21  ;;  %v2846_v31 = vpop.f32.mrb[7].mxu0 }
  0xf1   : > { %v406_v32 = vadd.f32 %v405_v27, %v404_v20  ;;  %v388_v33 = vadd.f32 %v387_v28, %v386_v25  ;;  %v3140_v27 = vmov 0  }
  0xf2   : > { %v407_v34 = vsel %vm314_vm1, %v400_v29, 0.0 }
  0xf3   : > { %v408_v35 = vadd.f32 %v407_v34, %v406_v32 }
  0xf5   : > { %v374_v36 = vpop.f32.mrb[8].mxu0 }
  0xf6   : > { %v389_v37 = vsel %vm314_vm1, %v374_v36, 0.0  ;;  %v401_v38 = vmul.f32 %v374_v36, %v374_v36  ;;  %v2849_v39 = vpop.f32.mrb[9].mxu0  ;;  %v430_v17 = vpack.c.bf16 %v374_v36, %v374_v36 }
  0xf7   : > { %v390_v40 = vadd.f32 %v389_v37, %v388_v33  ;;  %v377_v41 = vpop.f32.mrb[10].mxu0 }
  0xf8   : > { %v409_v42 = vsel %vm314_vm1, %v401_v38, 0.0  ;;  %v2850_v43 = vpop.f32.mrb[11].mxu0 }
  0xf9   : > { %v391_v44 = vrot.slane %v390_v40, 4  ;;  %v410_v45 = vadd.f32 %v409_v42, %v408_v35 }
  0xfb   : > { %v392_v46 = vadd.f32 %v391_v44, %v390_v40  ;;  %v411_v47 = vrot.slane %v410_v45, 4 }
  0xfd   : > { %v393_v48 = vrot.slane %v392_v46, 2  ;;  %v412_v49 = vadd.f32 %v411_v47, %v410_v45 }
  0xff   : > { %v394_v50 = vadd.f32 %v393_v48, %v392_v46  ;;  %v413_v51 = vrot.slane %v412_v49, 2 }
 0x101   : > { %v395_v52 = vrot.slane %v394_v50, 1  ;;  %v414_v53 = vadd.f32 %v413_v51, %v412_v49 }
 0x103   : > { %v396_v54 = vadd.f32 %v395_v52, %v394_v50  ;;  %v415_v55 = vrot.slane %v414_v53, 1 }
 0x105   : > { %v416_v56 = vadd.f32 %v415_v55, %v414_v53  ;;  %v417_v57 = vmul.f32 0.025, %v396_v54 }
 0x107   : > { %v418_v58 = vmul.f32 0.025, %v416_v56  ;;  %v419_v59 = vmul.f32 %v417_v57, %v417_v57 }
 0x109   : > { %v420_v60 = vsub.f32 %v418_v58, %v419_v59 }
 0x10b   : > { %v421_v61 = vadd.f32 0.001, %v420_v60 }
 0x10d   : > { %3102 = vrsqrt.f32 %v421_v61 }
 0x117   : > { %v3103_v2 = vpop.eup %3102 }
 0x118   : > { %v423_v6 = vmul.f32 %v3103_v2, %v380_v63 }
 0x11a   : > { %v424_v9 = vmul.f32 %v423_v6, %v417_v57  ;;  %v426_v10 = vpack.c.bf16 %v423_v6, %v423_v6 }
 0x11c   : > { %v425_v13 = vsub.f32 %v381_v7, %v424_v9  ;;  %v432_v14 = vpack.i.b16 %v426_v10, %v426_v10 }
 0x11e   : > { %v427_v16 = vpack.c.bf16 %v425_v13, %v425_v13  ;;  %v437_v18 = vrot.slane %v432_v14, %v3265_v12 }
 0x120   : > { %v440_v19 = vmul.bf16 %v437_v18, %v430_v17  ;;  %v442_v20 = vpack.i.b16 %v427_v16, %v427_v16  ;;  %v438_v21 = vmul.bf16 %v437_v18, %v428_v15  ;;  %v439_v22 = vmul.bf16 %v437_v18, %v429_v30  ;;  %v3079_v15 = vld [vmem:[%s3995_s1 + $0x18] sm:$0xff]  }
 0x121   : > { %2870 = vmatpush3.bf16.msra.mxu0 %v3079_v15  ;;  %v536_v15 = vld [vmem:[%s4000_s6] sm:$0x1] }
 0x122   : > { %v447_v23 = vrot.slane %v442_v20, %v3265_v12  ;;  %2899 = vmatprep.subr.bf16.mxu0 %v3138_v1 }
 0x124   : > { %v450_v24 = vadd.bf16 %v447_v23, %v440_v19  ;;  %v448_v25 = vadd.bf16 %v447_v23, %v438_v21  ;;  %v449_v26 = vadd.bf16 %v447_v23, %v439_v22 }
 0x126   : > { %v451_v28 = vmax.bf16 %v3140_v27, %v448_v25  ;;  %v452_v29 = vmax.bf16 %v3140_v27, %v449_v26  ;;  %v453_v8 = vmax.bf16 %v3140_v27, %v450_v24 }
 0x128   : > { %2856 = vmatmul.mubr.msk.bf16.vlgmr.msra.gmra.mrb[0].mxu1 %vm314_vm1, %v451_v28 }
 0x129   : > { %2859 = vmatprep.mubr.msk.bf16.mxu1 %vm3139_vm0, %v3138_v1 }
 0x130   : > { %2860 = vmatmul.mubr.msk.bf16.gmra.mrb[4].mxu1 %vm314_vm1, %v452_v29  ;;  %v535_v29 = vld [vmem:[%s3999_s5] sm:$0x1] }
 0x131   : > { %2863 = vmatprep.mubr.msk.bf16.mxu1 %vm3139_vm0, %v3138_v1 }
 0x138   : > { %2864 = vmatmul.mubr.msk.bf16.gmra.mrb[8].mxu1 %vm314_vm1, %v453_v8 }
 0x139   : > { %2887 = vmatprep.mubr.msk.bf16.mxu1 %vm3139_vm0, %v3138_v1 }
 0x1fb   : > { %v3292_v30 = vpop.f32.mrb[0].mxu1 }
 0x1fc   : > { %v552_v31 = vmul.f32 %v3292_v30, %v3292_v30  ;;  %v2857_v32 = vpop.f32.mrb[1].mxu1  ;;  %v537_v34 = vsel %vm314_vm1, %v3292_v30, 0.0 }
 0x1fd   : > { %v3296_v33 = vpop.f32.mrb[2].mxu1 }
 0x1fe   : > { %v538_v35 = vsel %vm314_vm1, %v3296_v33, 0.0  ;;  %v553_v36 = vmul.f32 %v3296_v33, %v3296_v33  ;;  %v583_v37 = vpack.c.bf16 %v3296_v33, %v3292_v30  ;;  %v2858_v38 = vpop.f32.mrb[3].mxu1  ;;  %v557_v40 = vsel %vm314_vm1, %v552_v31, 0.0 }
 0x1ff   : > { %v539_v39 = vadd.f32 %v538_v35, %v537_v34 }
 0x200   : > { %v558_v41 = vsel %vm314_vm1, %v553_v36, 0.0 }
 0x201   : > { %v559_v42 = vadd.f32 %v558_v41, %v557_v40 }
 0x203   : > { %v521_v43 = vpop.f32.mrb[4].mxu1 }
 0x204   : > { %v540_v44 = vsel %vm314_vm1, %v521_v43, 0.0  ;;  %v554_v45 = vmul.f32 %v521_v43, %v521_v43  ;;  %v2861_v46 = vpop.f32.mrb[5].mxu1 }
 0x205   : > { %v541_v47 = vadd.f32 %v540_v44, %v539_v39  ;;  %v524_v48 = vpop.f32.mrb[6].mxu1 }
 0x206   : > { %v560_v49 = vsel %vm314_vm1, %v554_v45, 0.0  ;;  %v542_v50 = vsel %vm314_vm1, %v524_v48, 0.0  ;;  %v555_v51 = vmul.f32 %v524_v48, %v524_v48  ;;  %v584_v52 = vpack.c.bf16 %v524_v48, %v521_v43  ;;  %v2862_v53 = vpop.f32.mrb[7].mxu1 }
 0x207   : > { %v561_v54 = vadd.f32 %v560_v49, %v559_v42  ;;  %v543_v55 = vadd.f32 %v542_v50, %v541_v47 }
 0x208   : > { %v562_v56 = vsel %vm314_vm1, %v555_v51, 0.0 }
 0x209   : > { %v563_v57 = vadd.f32 %v562_v56, %v561_v54 }
 0x20b   : > { %v529_v58 = vpop.f32.mrb[8].mxu1 }
 0x20c   : > { %v544_v59 = vsel %vm314_vm1, %v529_v58, 0.0  ;;  %v556_v60 = vmul.f32 %v529_v58, %v529_v58  ;;  %v2865_v61 = vpop.f32.mrb[9].mxu1  ;;  %v585_v35 = vpack.c.bf16 %v529_v58, %v529_v58 }
 0x20d   : > { %v545_v62 = vadd.f32 %v544_v59, %v543_v55  ;;  %v532_v63 = vpop.f32.mrb[10].mxu1 }
 0x20e   : > { %v564_v0 = vsel %vm314_vm1, %v556_v60, 0.0  ;;  %v2866_v2 = vpop.f32.mrb[11].mxu1 }
 0x20f   : > { %v546_v6 = vrot.slane %v545_v62, 4  ;;  %v565_v7 = vadd.f32 %v564_v0, %v563_v57 }
 0x211   : > { %v547_v9 = vadd.f32 %v546_v6, %v545_v62  ;;  %v566_v10 = vrot.slane %v565_v7, 4 }
 0x213   : > { %v548_v13 = vrot.slane %v547_v9, 2  ;;  %v567_v14 = vadd.f32 %v566_v10, %v565_v7 }
 0x215   : > { %v549_v16 = vadd.f32 %v548_v13, %v547_v9  ;;  %v568_v17 = vrot.slane %v567_v14, 2 }
 0x217   : > { %v550_v18 = vrot.slane %v549_v16, 1  ;;  %v569_v19 = vadd.f32 %v568_v17, %v567_v14 }
 0x219   : > { %v551_v20 = vadd.f32 %v550_v18, %v549_v16  ;;  %v570_v21 = vrot.slane %v569_v19, 1 }
 0x21b   : > { %v571_v22 = vadd.f32 %v570_v21, %v569_v19  ;;  %v572_v23 = vmul.f32 0.025, %v551_v20 }
 0x21d   : > { %v573_v24 = vmul.f32 0.025, %v571_v22  ;;  %v574_v25 = vmul.f32 %v572_v23, %v572_v23 }
 0x21f   : > { %v575_v26 = vsub.f32 %v573_v24, %v574_v25 }
 0x221   : > { %v576_v28 = vadd.f32 0.001, %v575_v26 }
 0x223   : > { %3104 = vrsqrt.f32 %v576_v28 }
 0x22d   : > { %v3105_v8 = vpop.eup %3104 }
 0x22e   : > { %v578_v11 = vmul.f32 %v3105_v8, %v535_v29 }
 0x230   : > { %v579_v30 = vmul.f32 %v578_v11, %v572_v23  ;;  %v581_v31 = vpack.c.bf16 %v578_v11, %v578_v11 }
 0x232   : > { %v580_v32 = vsub.f32 %v536_v15, %v579_v30  ;;  %v587_v33 = vpack.i.b16 %v581_v31, %v581_v31 }
 0x234   : > { %v582_v34 = vpack.c.bf16 %v580_v32, %v580_v32  ;;  %v592_v36 = vrot.slane %v587_v33, %v3265_v12 }
 0x236   : > { %v593_v38 = vmul.bf16 %v592_v36, %v583_v37  ;;  %v595_v39 = vmul.bf16 %v592_v36, %v585_v35  ;;  %v597_v40 = vpack.i.b16 %v582_v34, %v582_v34  ;;  %v594_v41 = vmul.bf16 %v592_v36, %v584_v52 }
 0x238   : > { %v602_v42 = vrot.slane %v597_v40, %v3265_v12 }
 0x23a   : > { %v603_v43 = vadd.bf16 %v602_v42, %v593_v38  ;;  %v605_v44 = vadd.bf16 %v602_v42, %v595_v39  ;;  %v604_v45 = vadd.bf16 %v602_v42, %v594_v41 }
 0x23c   : > { %v609_v46 = vadd.bf16 %v3211_v3, %v603_v43  ;;  %v610_v37 = vadd.bf16 %v3217_v4, %v604_v45  ;;  %v611_v3 = vadd.bf16 %v3223_v5, %v605_v44  ;;  %v3080_v4 = vld [vmem:[%s3998_s4 + $0x10] sm:$0xff]   ;;  %v3081_v5 = vld [vmem:[%s3998_s4 + $0x18] sm:$0xff]  }
 0x23d   : > { %2884 = vmatpush3.bf16.msra.mxu1 %v3080_v4 }
 0x23e   : > { %v3324_v47 = vmax.bf16 %v3140_v27, %v609_v46  ;;  %v3332_v48 = vmax.bf16 %v3140_v27, %v610_v37  ;;  %v3340_v49 = vmax.bf16 %v3140_v27, %v611_v3  ;;  %2885 = vmatprep.subr.bf16.mxu1 %v3138_v1  ;;  %v2635_v37 = vld [vmem:[%s3996_s2 + $0x1] sm:$0x1] }
 0x240   : > { %2872 = vmatmul.mubr.msk.bf16.vlgmr.msra.gmra.mrb[12].mxu0 %vm314_vm1, %v3324_v47 }
 0x241   : > { %2875 = vmatprep.mubr.msk.bf16.mxu0 %vm3139_vm0, %v3138_v1  ;;  %2886 = vmatpush3.bf16.msra.mxu1 %v3081_v5  ;;  %v2636_v5 = vld [vmem:[%s3997_s3 + $0x1] sm:$0x1] }
 0x242   : > { %2915 = vmatprep.subr.bf16.mxu1 %v3138_v1 }
 0x248   : > { %2876 = vmatmul.mubr.msk.bf16.gmra.mrb[16].mxu0 %vm314_vm1, %v3332_v48 }
 0x249   : > { %2879 = vmatprep.mubr.msk.bf16.mxu0 %vm3139_vm0, %v3138_v1 }
 0x250   : > { %2880 = vmatmul.mubr.msk.bf16.gmra.mrb[20].mxu0 %vm314_vm1, %v3340_v49 }
 0x251   : > { %2903 = vmatprep.mubr.msk.bf16.mxu0 %vm3139_vm0, %v3138_v1 }
 0x313   : > { %v3354_v50 = vpop.f32.mrb[12].mxu0 }
 0x314   : > { %v716_v51 = vmul.f32 %v3354_v50, %v3354_v50  ;;  %v2873_v52 = vpop.f32.mrb[13].mxu0  ;;  %v701_v54 = vsel %vm314_vm1, %v3354_v50, 0.0 }
 0x315   : > { %v3358_v53 = vpop.f32.mrb[14].mxu0 }
 0x316   : > { %v702_v55 = vsel %vm314_vm1, %v3358_v53, 0.0  ;;  %v717_v56 = vmul.f32 %v3358_v53, %v3358_v53  ;;  %v747_v57 = vpack.c.bf16 %v3358_v53, %v3354_v50  ;;  %v2874_v58 = vpop.f32.mrb[15].mxu0  ;;  %v721_v60 = vsel %vm314_vm1, %v716_v51, 0.0 }
 0x317   : > { %v703_v59 = vadd.f32 %v702_v55, %v701_v54 }
 0x318   : > { %v722_v61 = vsel %vm314_vm1, %v717_v56, 0.0 }
 0x319   : > { %v723_v62 = vadd.f32 %v722_v61, %v721_v60 }
 0x31b   : > { %v683_v63 = vpop.f32.mrb[16].mxu0 }
 0x31c   : > { %v704_v0 = vsel %vm314_vm1, %v683_v63, 0.0  ;;  %v718_v2 = vmul.f32 %v683_v63, %v683_v63  ;;  %v2877_v6 = vpop.f32.mrb[17].mxu0 }
 0x31d   : > { %v705_v7 = vadd.f32 %v704_v0, %v703_v59  ;;  %v686_v9 = vpop.f32.mrb[18].mxu0 }
 0x31e   : > { %v724_v10 = vsel %vm314_vm1, %v718_v2, 0.0  ;;  %v706_v13 = vsel %vm314_vm1, %v686_v9, 0.0  ;;  %v719_v14 = vmul.f32 %v686_v9, %v686_v9  ;;  %v748_v16 = vpack.c.bf16 %v686_v9, %v683_v63  ;;  %v2878_v17 = vpop.f32.mrb[19].mxu0  ;;  %v3082_v9 = vld [vmem:[%s3995_s1 + $0x20] sm:$0xff]  }
 0x31f   : > { %v725_v18 = vadd.f32 %v724_v10, %v723_v62  ;;  %v707_v19 = vadd.f32 %v706_v13, %v705_v7  ;;  %2900 = vmatpush3.bf16.msra.mxu0 %v3082_v9  ;;  %v3083_v10 = vld [vmem:[%s3995_s1 + $0x28] sm:$0xff]  }
 0x320   : > { %v726_v20 = vsel %vm314_vm1, %v719_v14, 0.0  ;;  %2901 = vmatprep.subr.bf16.mxu0 %v3138_v1 }
 0x321   : > { %v727_v21 = vadd.f32 %v726_v20, %v725_v18 }
 0x323   : > { %v691_v22 = vpop.f32.mrb[20].mxu0  ;;  %2902 = vmatpush3.bf16.msra.mxu0 %v3083_v10  ;;  %v2647_v10 = vld [vmem:[%s4000_s6 + $0x1] sm:$0x1] }
 0x324   : > { %v708_v23 = vsel %vm314_vm1, %v691_v22, 0.0  ;;  %v720_v24 = vmul.f32 %v691_v22, %v691_v22  ;;  %v2881_v25 = vpop.f32.mrb[21].mxu0  ;;  %v749_v55 = vpack.c.bf16 %v691_v22, %v691_v22  ;;  %2931 = vmatprep.subr.bf16.mxu0 %v3138_v1 }
 0x325   : > { %v709_v26 = vadd.f32 %v708_v23, %v707_v19  ;;  %v694_v28 = vpop.f32.mrb[22].mxu0 }
 0x326   : > { %v728_v29 = vsel %vm314_vm1, %v720_v24, 0.0  ;;  %v2882_v8 = vpop.f32.mrb[23].mxu0 }
 0x327   : > { %v710_v11 = vrot.slane %v709_v26, 4  ;;  %v729_v15 = vadd.f32 %v728_v29, %v727_v21 }
 0x329   : > { %v711_v30 = vadd.f32 %v710_v11, %v709_v26  ;;  %v730_v31 = vrot.slane %v729_v15, 4 }
 0x32b   : > { %v712_v32 = vrot.slane %v711_v30, 2  ;;  %v731_v33 = vadd.f32 %v730_v31, %v729_v15 }
 0x32d   : > { %v713_v34 = vadd.f32 %v712_v32, %v711_v30  ;;  %v732_v35 = vrot.slane %v731_v33, 2 }
 0x32f   : > { %v714_v36 = vrot.slane %v713_v34, 1  ;;  %v733_v38 = vadd.f32 %v732_v35, %v731_v33 }
 0x331   : > { %v715_v39 = vadd.f32 %v714_v36, %v713_v34  ;;  %v734_v40 = vrot.slane %v733_v38, 1 }
 0x333   : > { %v735_v41 = vadd.f32 %v734_v40, %v733_v38  ;;  %v736_v42 = vmul.f32 0.025, %v715_v39 }
 0x335   : > { %v737_v43 = vmul.f32 0.025, %v735_v41  ;;  %v738_v44 = vmul.f32 %v736_v42, %v736_v42 }
 0x337   : > { %v739_v45 = vsub.f32 %v737_v43, %v738_v44 }
 0x339   : > { %v740_v46 = vadd.f32 0.001, %v739_v45 }
 0x33b   : > { %3106 = vrsqrt.f32 %v740_v46 }
 0x345   : > { %v3107_v3 = vpop.eup %3106 }
 0x346   : > { %v742_v4 = vmul.f32 %v3107_v3, %v2635_v37 }
 0x348   : > { %v743_v50 = vmul.f32 %v742_v4, %v736_v42  ;;  %v745_v51 = vpack.c.bf16 %v742_v4, %v742_v4 }
 0x34a   : > { %v744_v52 = vsub.f32 %v2636_v5, %v743_v50  ;;  %v751_v53 = vpack.i.b16 %v745_v51, %v745_v51 }
 0x34c   : > { %v746_v54 = vpack.c.bf16 %v744_v52, %v744_v52  ;;  %v756_v56 = vrot.slane %v751_v53, %v3265_v12 }
 0x34e   : > { %v757_v58 = vmul.bf16 %v756_v56, %v747_v57  ;;  %v759_v59 = vmul.bf16 %v756_v56, %v749_v55  ;;  %v761_v60 = vpack.i.b16 %v746_v54, %v746_v54  ;;  %v758_v61 = vmul.bf16 %v756_v56, %v748_v16 }
 0x350   : > { %v766_v62 = vrot.slane %v761_v60, %v3265_v12 }
 0x352   : > { %v767_v63 = vadd.bf16 %v766_v62, %v757_v58  ;;  %v769_v0 = vadd.bf16 %v766_v62, %v759_v59  ;;  %v768_v2 = vadd.bf16 %v766_v62, %v758_v61 }
 0x354   : > { %v770_v6 = vmax.bf16 %v3140_v27, %v767_v63  ;;  %v771_v7 = vmax.bf16 %v3140_v27, %v768_v2  ;;  %v772_v57 = vmax.bf16 %v3140_v27, %v769_v0 }
 0x356   : > { %2888 = vmatmul.mubr.msk.bf16.vlgmr.msra.gmra.mrb[12].mxu1 %vm314_vm1, %v770_v6 }
 0x357   : > { %2891 = vmatprep.mubr.msk.bf16.mxu1 %vm3139_vm0, %v3138_v1 }
 0x35e   : > { %2892 = vmatmul.mubr.msk.bf16.gmra.mrb[16].mxu1 %vm314_vm1, %v771_v7  ;;  %v2646_v7 = vld [vmem:[%s3999_s5 + $0x1] sm:$0x1] }
 0x35f   : > { %2895 = vmatprep.mubr.msk.bf16.mxu1 %vm3139_vm0, %v3138_v1 }
 0x366   : > { %2896 = vmatmul.mubr.msk.bf16.gmra.mrb[20].mxu1 %vm314_vm1, %v772_v57 }
 0x367   : > { %2919 = vmatprep.mubr.msk.bf16.mxu1 %vm3139_vm0, %v3138_v1 }
 0x429   : > { %v3404_v13 = vpop.f32.mrb[12].mxu1 }
 0x42a   : > { %v874_v14 = vmul.f32 %v3404_v13, %v3404_v13  ;;  %v2889_v16 = vpop.f32.mrb[13].mxu1  ;;  %v859_v18 = vsel %vm314_vm1, %v3404_v13, 0.0 }
 0x42b   : > { %v3408_v17 = vpop.f32.mrb[14].mxu1 }
 0x42c   : > { %v860_v19 = vsel %vm314_vm1, %v3408_v17, 0.0  ;;  %v875_v20 = vmul.f32 %v3408_v17, %v3408_v17  ;;  %v905_v21 = vpack.c.bf16 %v3408_v17, %v3404_v13  ;;  %v2890_v22 = vpop.f32.mrb[15].mxu1  ;;  %v879_v24 = vsel %vm314_vm1, %v874_v14, 0.0 }
 0x42d   : > { %v861_v23 = vadd.f32 %v860_v19, %v859_v18 }
 0x42e   : > { %v880_v25 = vsel %vm314_vm1, %v875_v20, 0.0 }
 0x42f   : > { %v881_v26 = vadd.f32 %v880_v25, %v879_v24 }
 0x431   : > { %v841_v28 = vpop.f32.mrb[16].mxu1 }
 0x432   : > { %v862_v29 = vsel %vm314_vm1, %v841_v28, 0.0  ;;  %v876_v8 = vmul.f32 %v841_v28, %v841_v28  ;;  %v2893_v11 = vpop.f32.mrb[17].mxu1 }
 0x433   : > { %v863_v15 = vadd.f32 %v862_v29, %v861_v23  ;;  %v844_v30 = vpop.f32.mrb[18].mxu1 }
 0x434   : > { %v882_v31 = vsel %vm314_vm1, %v876_v8, 0.0  ;;  %v864_v32 = vsel %vm314_vm1, %v844_v30, 0.0  ;;  %v877_v33 = vmul.f32 %v844_v30, %v844_v30  ;;  %v906_v34 = vpack.c.bf16 %v844_v30, %v841_v28  ;;  %v2894_v35 = vpop.f32.mrb[19].mxu1 }
 0x435   : > { %v883_v36 = vadd.f32 %v882_v31, %v881_v26  ;;  %v865_v38 = vadd.f32 %v864_v32, %v863_v15 }
 0x436   : > { %v884_v39 = vsel %vm314_vm1, %v877_v33, 0.0 }
 0x437   : > { %v885_v40 = vadd.f32 %v884_v39, %v883_v36 }
 0x439   : > { %v849_v41 = vpop.f32.mrb[20].mxu1 }
 0x43a   : > { %v866_v42 = vsel %vm314_vm1, %v849_v41, 0.0  ;;  %v878_v43 = vmul.f32 %v849_v41, %v849_v41  ;;  %v2897_v44 = vpop.f32.mrb[21].mxu1  ;;  %v907_v19 = vpack.c.bf16 %v849_v41, %v849_v41 }
 0x43b   : > { %v867_v45 = vadd.f32 %v866_v42, %v865_v38  ;;  %v852_v46 = vpop.f32.mrb[22].mxu1 }
 0x43c   : > { %v886_v37 = vsel %vm314_vm1, %v878_v43, 0.0  ;;  %v2898_v3 = vpop.f32.mrb[23].mxu1 }
 0x43d   : > { %v868_v4 = vrot.slane %v867_v45, 4  ;;  %v887_v5 = vadd.f32 %v886_v37, %v885_v40 }
 0x43f   : > { %v869_v50 = vadd.f32 %v868_v4, %v867_v45  ;;  %v888_v51 = vrot.slane %v887_v5, 4 }
 0x441   : > { %v870_v52 = vrot.slane %v869_v50, 2  ;;  %v889_v53 = vadd.f32 %v888_v51, %v887_v5 }
 0x443   : > { %v871_v54 = vadd.f32 %v870_v52, %v869_v50  ;;  %v890_v55 = vrot.slane %v889_v53, 2 }
 0x445   : > { %v872_v56 = vrot.slane %v871_v54, 1  ;;  %v891_v58 = vadd.f32 %v890_v55, %v889_v53 }
 0x447   : > { %v873_v59 = vadd.f32 %v872_v56, %v871_v54  ;;  %v892_v60 = vrot.slane %v891_v58, 1 }
 0x449   : > { %v893_v61 = vadd.f32 %v892_v60, %v891_v58  ;;  %v894_v62 = vmul.f32 0.025, %v873_v59 }
 0x44b   : > { %v895_v63 = vmul.f32 0.025, %v893_v61  ;;  %v896_v0 = vmul.f32 %v894_v62, %v894_v62 }
 0x44d   : > { %v897_v2 = vsub.f32 %v895_v63, %v896_v0 }
 0x44f   : > { %v898_v6 = vadd.f32 0.001, %v897_v2 }
 0x451   : > { %3108 = vrsqrt.f32 %v898_v6 }
 0x45b   : > { %v3109_v57 = vpop.eup %3108 }
 0x45c   : > { %v900_v9 = vmul.f32 %v3109_v57, %v2646_v7 }
 0x45e   : > { %v901_v13 = vmul.f32 %v900_v9, %v894_v62  ;;  %v903_v14 = vpack.c.bf16 %v900_v9, %v900_v9 }
 0x460   : > { %v902_v16 = vsub.f32 %v2647_v10, %v901_v13  ;;  %v909_v17 = vpack.i.b16 %v903_v14, %v903_v14 }
 0x462   : > { %v904_v18 = vpack.c.bf16 %v902_v16, %v902_v16  ;;  %v914_v20 = vrot.slane %v909_v17, %v3265_v12 }
 0x464   : > { %v915_v22 = vmul.bf16 %v914_v20, %v905_v21  ;;  %v917_v23 = vmul.bf16 %v914_v20, %v907_v19  ;;  %v919_v24 = vpack.i.b16 %v904_v18, %v904_v18  ;;  %v916_v25 = vmul.bf16 %v914_v20, %v906_v34 }
 0x466   : > { %v924_v26 = vrot.slane %v919_v24, %v3265_v12 }
 0x468   : > { %v925_v28 = vadd.bf16 %v924_v26, %v915_v22  ;;  %v927_v29 = vadd.bf16 %v924_v26, %v917_v23  ;;  %v926_v8 = vadd.bf16 %v924_v26, %v916_v25 }
 0x46a   : > { %v928_v11 = vadd.bf16 %v925_v28, %v3324_v47  ;;  %v929_v21 = vadd.bf16 %v926_v8, %v3332_v48  ;;  %v930_v47 = vadd.bf16 %v927_v29, %v3340_v49  ;;  %v3084_v48 = vld [vmem:[%s3998_s4 + $0x20] sm:$0xff]   ;;  %v3085_v49 = vld [vmem:[%s3998_s4 + $0x28] sm:$0xff]  }
 0x46b   : > { %2916 = vmatpush3.bf16.msra.mxu1 %v3084_v48 }
 0x46c   : > { %v3436_v15 = vmax.bf16 %v3140_v27, %v928_v11  ;;  %v3444_v30 = vmax.bf16 %v3140_v27, %v929_v21  ;;  %v3452_v31 = vmax.bf16 %v3140_v27, %v930_v47  ;;  %2917 = vmatprep.subr.bf16.mxu1 %v3138_v1  ;;  %v2657_v21 = vld [vmem:[%s3996_s2 + $0x2] sm:$0x1] }
 0x46e   : > { %2904 = vmatmul.mubr.msk.bf16.vlgmr.msra.gmra.mrb[24].mxu0 %vm314_vm1, %v3436_v15 }
 0x46f   : > { %2907 = vmatprep.mubr.msk.bf16.mxu0 %vm3139_vm0, %v3138_v1  ;;  %2918 = vmatpush3.bf16.msra.mxu1 %v3085_v49  ;;  %v2658_v49 = vld [vmem:[%s3997_s3 + $0x2] sm:$0x1] }
 0x470   : > { %2947 = vmatprep.subr.bf16.mxu1 %v3138_v1 }
 0x476   : > { %2908 = vmatmul.mubr.msk.bf16.gmra.mrb[28].mxu0 %vm314_vm1, %v3444_v30 }
 0x477   : > { %2911 = vmatprep.mubr.msk.bf16.mxu0 %vm3139_vm0, %v3138_v1 }
 0x47e   : > { %2912 = vmatmul.mubr.msk.bf16.gmra.mrb[32].mxu0 %vm314_vm1, %v3452_v31 }
 0x47f   : > { %2935 = vmatprep.mubr.msk.bf16.mxu0 %vm3139_vm0, %v3138_v1 }
 0x541   : > { %v3466_v32 = vpop.f32.mrb[24].mxu0 }
 0x542   : > { %v1035_v33 = vmul.f32 %v3466_v32, %v3466_v32  ;;  %v2905_v34 = vpop.f32.mrb[25].mxu0  ;;  %v1020_v36 = vsel %vm314_vm1, %v3466_v32, 0.0 }
 0x543   : > { %v3470_v35 = vpop.f32.mrb[26].mxu0 }
 0x544   : > { %v1021_v38 = vsel %vm314_vm1, %v3470_v35, 0.0  ;;  %v1036_v39 = vmul.f32 %v3470_v35, %v3470_v35  ;;  %v1066_v40 = vpack.c.bf16 %v3470_v35, %v3466_v32  ;;  %v2906_v41 = vpop.f32.mrb[27].mxu0  ;;  %v1040_v43 = vsel %vm314_vm1, %v1035_v33, 0.0 }
 0x545   : > { %v1022_v42 = vadd.f32 %v1021_v38, %v1020_v36 }
 0x546   : > { %v1041_v44 = vsel %vm314_vm1, %v1036_v39, 0.0 }
 0x547   : > { %v1042_v45 = vadd.f32 %v1041_v44, %v1040_v43 }
 0x549   : > { %v1002_v46 = vpop.f32.mrb[28].mxu0 }
 0x54a   : > { %v1023_v37 = vsel %vm314_vm1, %v1002_v46, 0.0  ;;  %v1037_v3 = vmul.f32 %v1002_v46, %v1002_v46  ;;  %v2909_v4 = vpop.f32.mrb[29].mxu0 }
 0x54b   : > { %v1024_v5 = vadd.f32 %v1023_v37, %v1022_v42  ;;  %v1005_v50 = vpop.f32.mrb[30].mxu0 }
 0x54c   : > { %v1043_v51 = vsel %vm314_vm1, %v1037_v3, 0.0  ;;  %v1025_v52 = vsel %vm314_vm1, %v1005_v50, 0.0  ;;  %v1038_v53 = vmul.f32 %v1005_v50, %v1005_v50  ;;  %v1067_v54 = vpack.c.bf16 %v1005_v50, %v1002_v46  ;;  %v2910_v55 = vpop.f32.mrb[31].mxu0  ;;  %v3086_v50 = vld [vmem:[%s3995_s1 + $0x30] sm:$0xff]  }
 0x54d   : > { %v1044_v56 = vadd.f32 %v1043_v51, %v1042_v45  ;;  %v1026_v58 = vadd.f32 %v1025_v52, %v1024_v5  ;;  %2932 = vmatpush3.bf16.msra.mxu0 %v3086_v50  ;;  %v3087_v51 = vld [vmem:[%s3995_s1 + $0x38] sm:$0xff]  }
 0x54e   : > { %v1045_v59 = vsel %vm314_vm1, %v1038_v53, 0.0  ;;  %2933 = vmatprep.subr.bf16.mxu0 %v3138_v1 }
 0x54f   : > { %v1046_v60 = vadd.f32 %v1045_v59, %v1044_v56 }
 0x551   : > { %v1010_v61 = vpop.f32.mrb[32].mxu0  ;;  %2934 = vmatpush3.bf16.msra.mxu0 %v3087_v51  ;;  %v2669_v51 = vld [vmem:[%s4000_s6 + $0x2] sm:$0x1] }
 0x552   : > { %v1027_v62 = vsel %vm314_vm1, %v1010_v61, 0.0  ;;  %v1039_v63 = vmul.f32 %v1010_v61, %v1010_v61  ;;  %v2913_v0 = vpop.f32.mrb[33].mxu0  ;;  %v1068_v38 = vpack.c.bf16 %v1010_v61, %v1010_v61  ;;  %2963 = vmatprep.subr.bf16.mxu0 %v3138_v1 }
 0x553   : > { %v1028_v2 = vadd.f32 %v1027_v62, %v1026_v58  ;;  %v1013_v6 = vpop.f32.mrb[34].mxu0 }
 0x554   : > { %v1047_v7 = vsel %vm314_vm1, %v1039_v63, 0.0  ;;  %v2914_v57 = vpop.f32.mrb[35].mxu0 }
 0x555   : > { %v1029_v9 = vrot.slane %v1028_v2, 4  ;;  %v1048_v10 = vadd.f32 %v1047_v7, %v1046_v60 }
 0x557   : > { %v1030_v13 = vadd.f32 %v1029_v9, %v1028_v2  ;;  %v1049_v14 = vrot.slane %v1048_v10, 4 }
 0x559   : > { %v1031_v16 = vrot.slane %v1030_v13, 2  ;;  %v1050_v17 = vadd.f32 %v1049_v14, %v1048_v10 }
 0x55b   : > { %v1032_v18 = vadd.f32 %v1031_v16, %v1030_v13  ;;  %v1051_v19 = vrot.slane %v1050_v17, 2 }
 0x55d   : > { %v1033_v20 = vrot.slane %v1032_v18, 1  ;;  %v1052_v22 = vadd.f32 %v1051_v19, %v1050_v17 }
 0x55f   : > { %v1034_v23 = vadd.f32 %v1033_v20, %v1032_v18  ;;  %v1053_v24 = vrot.slane %v1052_v22, 1 }
 0x561   : > { %v1054_v25 = vadd.f32 %v1053_v24, %v1052_v22  ;;  %v1055_v26 = vmul.f32 0.025, %v1034_v23 }
 0x563   : > { %v1056_v28 = vmul.f32 0.025, %v1054_v25  ;;  %v1057_v29 = vmul.f32 %v1055_v26, %v1055_v26 }
 0x565   : > { %v1058_v8 = vsub.f32 %v1056_v28, %v1057_v29 }
 0x567   : > { %v1059_v11 = vadd.f32 0.001, %v1058_v8 }
 0x569   : > { %3110 = vrsqrt.f32 %v1059_v11 }
 0x573   : > { %v3111_v47 = vpop.eup %3110 }
 0x574   : > { %v1061_v48 = vmul.f32 %v3111_v47, %v2657_v21 }
 0x576   : > { %v1062_v32 = vmul.f32 %v1061_v48, %v1055_v26  ;;  %v1064_v33 = vpack.c.bf16 %v1061_v48, %v1061_v48 }
 0x578   : > { %v1063_v34 = vsub.f32 %v2658_v49, %v1062_v32  ;;  %v1070_v35 = vpack.i.b16 %v1064_v33, %v1064_v33 }
 0x57a   : > { %v1065_v36 = vpack.c.bf16 %v1063_v34, %v1063_v34  ;;  %v1075_v39 = vrot.slane %v1070_v35, %v3265_v12 }
 0x57c   : > { %v1076_v41 = vmul.bf16 %v1075_v39, %v1066_v40  ;;  %v1078_v42 = vmul.bf16 %v1075_v39, %v1068_v38  ;;  %v1080_v43 = vpack.i.b16 %v1065_v36, %v1065_v36  ;;  %v1077_v44 = vmul.bf16 %v1075_v39, %v1067_v54 }
 0x57e   : > { %v1085_v45 = vrot.slane %v1080_v43, %v3265_v12 }
 0x580   : > { %v1086_v46 = vadd.bf16 %v1085_v45, %v1076_v41  ;;  %v1088_v37 = vadd.bf16 %v1085_v45, %v1078_v42  ;;  %v1087_v3 = vadd.bf16 %v1085_v45, %v1077_v44 }
 0x582   : > { %v1089_v4 = vmax.bf16 %v3140_v27, %v1086_v46  ;;  %v1090_v5 = vmax.bf16 %v3140_v27, %v1087_v3  ;;  %v1091_v40 = vmax.bf16 %v3140_v27, %v1088_v37 }
 0x584   : > { %2920 = vmatmul.mubr.msk.bf16.vlgmr.msra.gmra.mrb[24].mxu1 %vm314_vm1, %v1089_v4 }
 0x585   : > { %2923 = vmatprep.mubr.msk.bf16.mxu1 %vm3139_vm0, %v3138_v1 }
 0x58c   : > { %2924 = vmatmul.mubr.msk.bf16.gmra.mrb[28].mxu1 %vm314_vm1, %v1090_v5  ;;  %v2668_v5 = vld [vmem:[%s3999_s5 + $0x2] sm:$0x1] }
 0x58d   : > { %2927 = vmatprep.mubr.msk.bf16.mxu1 %vm3139_vm0, %v3138_v1 }
 0x594   : > { %2928 = vmatmul.mubr.msk.bf16.gmra.mrb[32].mxu1 %vm314_vm1, %v1091_v40 }
 0x595   : > { %2951 = vmatprep.mubr.msk.bf16.mxu1 %vm3139_vm0, %v3138_v1 }
 0x657   : > { %v3516_v52 = vpop.f32.mrb[24].mxu1 }
 0x658   : > { %v1193_v53 = vmul.f32 %v3516_v52, %v3516_v52  ;;  %v2921_v54 = vpop.f32.mrb[25].mxu1  ;;  %v1178_v56 = vsel %vm314_vm1, %v3516_v52, 0.0 }
 0x659   : > { %v3520_v55 = vpop.f32.mrb[26].mxu1 }
 0x65a   : > { %v1179_v58 = vsel %vm314_vm1, %v3520_v55, 0.0  ;;  %v1194_v59 = vmul.f32 %v3520_v55, %v3520_v55  ;;  %v1224_v60 = vpack.c.bf16 %v3520_v55, %v3516_v52  ;;  %v2922_v61 = vpop.f32.mrb[27].mxu1  ;;  %v1198_v63 = vsel %vm314_vm1, %v1193_v53, 0.0 }
 0x65b   : > { %v1180_v62 = vadd.f32 %v1179_v58, %v1178_v56 }
 0x65c   : > { %v1199_v0 = vsel %vm314_vm1, %v1194_v59, 0.0 }
 0x65d   : > { %v1200_v2 = vadd.f32 %v1199_v0, %v1198_v63 }
 0x65f   : > { %v1160_v6 = vpop.f32.mrb[28].mxu1 }
 0x660   : > { %v1181_v7 = vsel %vm314_vm1, %v1160_v6, 0.0  ;;  %v1195_v57 = vmul.f32 %v1160_v6, %v1160_v6  ;;  %v2925_v9 = vpop.f32.mrb[29].mxu1 }
 0x661   : > { %v1182_v10 = vadd.f32 %v1181_v7, %v1180_v62  ;;  %v1163_v13 = vpop.f32.mrb[30].mxu1 }
 0x662   : > { %v1201_v14 = vsel %vm314_vm1, %v1195_v57, 0.0  ;;  %v1183_v16 = vsel %vm314_vm1, %v1163_v13, 0.0  ;;  %v1196_v17 = vmul.f32 %v1163_v13, %v1163_v13  ;;  %v1225_v18 = vpack.c.bf16 %v1163_v13, %v1160_v6  ;;  %v2926_v19 = vpop.f32.mrb[31].mxu1 }
 0x663   : > { %v1202_v20 = vadd.f32 %v1201_v14, %v1200_v2  ;;  %v1184_v22 = vadd.f32 %v1183_v16, %v1182_v10 }
 0x664   : > { %v1203_v23 = vsel %vm314_vm1, %v1196_v17, 0.0 }
 0x665   : > { %v1204_v24 = vadd.f32 %v1203_v23, %v1202_v20 }
 0x667   : > { %v1168_v25 = vpop.f32.mrb[32].mxu1 }
 0x668   : > { %v1185_v26 = vsel %vm314_vm1, %v1168_v25, 0.0  ;;  %v1197_v28 = vmul.f32 %v1168_v25, %v1168_v25  ;;  %v2929_v29 = vpop.f32.mrb[33].mxu1  ;;  %v1226_v58 = vpack.c.bf16 %v1168_v25, %v1168_v25 }
 0x669   : > { %v1186_v8 = vadd.f32 %v1185_v26, %v1184_v22  ;;  %v1171_v11 = vpop.f32.mrb[34].mxu1 }
 0x66a   : > { %v1205_v21 = vsel %vm314_vm1, %v1197_v28, 0.0  ;;  %v2930_v47 = vpop.f32.mrb[35].mxu1 }
 0x66b   : > { %v1187_v48 = vrot.slane %v1186_v8, 4  ;;  %v1206_v49 = vadd.f32 %v1205_v21, %v1204_v24 }
 0x66d   : > { %v1188_v32 = vadd.f32 %v1187_v48, %v1186_v8  ;;  %v1207_v33 = vrot.slane %v1206_v49, 4 }
 0x66f   : > { %v1189_v34 = vrot.slane %v1188_v32, 2  ;;  %v1208_v35 = vadd.f32 %v1207_v33, %v1206_v49 }
 0x671   : > { %v1190_v36 = vadd.f32 %v1189_v34, %v1188_v32  ;;  %v1209_v38 = vrot.slane %v1208_v35, 2 }
 0x673   : > { %v1191_v39 = vrot.slane %v1190_v36, 1  ;;  %v1210_v41 = vadd.f32 %v1209_v38, %v1208_v35 }
 0x675   : > { %v1192_v42 = vadd.f32 %v1191_v39, %v1190_v36  ;;  %v1211_v43 = vrot.slane %v1210_v41, 1 }
 0x677   : > { %v1212_v44 = vadd.f32 %v1211_v43, %v1210_v41  ;;  %v1213_v45 = vmul.f32 0.025, %v1192_v42 }
 0x679   : > { %v1214_v46 = vmul.f32 0.025, %v1212_v44  ;;  %v1215_v37 = vmul.f32 %v1213_v45, %v1213_v45 }
 0x67b   : > { %v1216_v3 = vsub.f32 %v1214_v46, %v1215_v37 }
 0x67d   : > { %v1217_v4 = vadd.f32 0.001, %v1216_v3 }
 0x67f   : > { %3112 = vrsqrt.f32 %v1217_v4 }
 0x689   : > { %v3113_v40 = vpop.eup %3112 }
 0x68a   : > { %v1219_v50 = vmul.f32 %v3113_v40, %v2668_v5 }
 0x68c   : > { %v1220_v52 = vmul.f32 %v1219_v50, %v1213_v45  ;;  %v1222_v53 = vpack.c.bf16 %v1219_v50, %v1219_v50 }
 0x68e   : > { %v1221_v54 = vsub.f32 %v2669_v51, %v1220_v52  ;;  %v1228_v55 = vpack.i.b16 %v1222_v53, %v1222_v53 }
 0x690   : > { %v1223_v56 = vpack.c.bf16 %v1221_v54, %v1221_v54  ;;  %v1233_v59 = vrot.slane %v1228_v55, %v3265_v12 }
 0x692   : > { %v1234_v61 = vmul.bf16 %v1233_v59, %v1224_v60  ;;  %v1236_v62 = vmul.bf16 %v1233_v59, %v1226_v58  ;;  %v1238_v63 = vpack.i.b16 %v1223_v56, %v1223_v56  ;;  %v1235_v0 = vmul.bf16 %v1233_v59, %v1225_v18 }
 0x694   : > { %v1243_v2 = vrot.slane %v1238_v63, %v3265_v12 }
 0x696   : > { %v1244_v6 = vadd.bf16 %v1243_v2, %v1234_v61  ;;  %v1246_v7 = vadd.bf16 %v1243_v2, %v1236_v62  ;;  %v1245_v57 = vadd.bf16 %v1243_v2, %v1235_v0 }
 0x698   : > { %v1247_v9 = vadd.bf16 %v1244_v6, %v3436_v15  ;;  %v1248_v60 = vadd.bf16 %v1245_v57, %v3444_v30  ;;  %v1249_v15 = vadd.bf16 %v1246_v7, %v3452_v31  ;;  %v3088_v30 = vld [vmem:[%s3998_s4 + $0x30] sm:$0xff]   ;;  %v3089_v31 = vld [vmem:[%s3998_s4 + $0x38] sm:$0xff]  }
 0x699   : > { %2948 = vmatpush3.bf16.msra.mxu1 %v3088_v30 }
 0x69a   : > { %v3548_v10 = vmax.bf16 %v3140_v27, %v1247_v9  ;;  %v3556_v13 = vmax.bf16 %v3140_v27, %v1248_v60  ;;  %v3564_v14 = vmax.bf16 %v3140_v27, %v1249_v15  ;;  %2949 = vmatprep.subr.bf16.mxu1 %v3138_v1  ;;  %v2679_v60 = vld [vmem:[%s3996_s2 + $0x3] sm:$0x1] }
 0x69c   : > { %2936 = vmatmul.mubr.msk.bf16.vlgmr.msra.gmra.mrb[36].mxu0 %vm314_vm1, %v3548_v10 }
 0x69d   : > { %2939 = vmatprep.mubr.msk.bf16.mxu0 %vm3139_vm0, %v3138_v1  ;;  %2950 = vmatpush3.bf16.msra.mxu1 %v3089_v31  ;;  %v2680_v31 = vld [vmem:[%s3997_s3 + $0x3] sm:$0x1] }
 0x69e   : > { %2979 = vmatprep.subr.bf16.mxu1 %v3138_v1 }
 0x6a4   : > { %2940 = vmatmul.mubr.msk.bf16.gmra.mrb[40].mxu0 %vm314_vm1, %v3556_v13 }
 0x6a5   : > { %2943 = vmatprep.mubr.msk.bf16.mxu0 %vm3139_vm0, %v3138_v1 }
 0x6ac   : > { %2944 = vmatmul.mubr.msk.bf16.gmra.mrb[44].mxu0 %vm314_vm1, %v3564_v14 }
 0x6ad   : > { %2967 = vmatprep.mubr.msk.bf16.mxu0 %vm3139_vm0, %v3138_v1 }
 0x76f   : > { %v3578_v16 = vpop.f32.mrb[36].mxu0 }
 0x770   : > { %v1354_v17 = vmul.f32 %v3578_v16, %v3578_v16  ;;  %v2937_v18 = vpop.f32.mrb[37].mxu0  ;;  %v1339_v20 = vsel %vm314_vm1, %v3578_v16, 0.0 }
 0x771   : > { %v3582_v19 = vpop.f32.mrb[38].mxu0 }
 0x772   : > { %v1340_v22 = vsel %vm314_vm1, %v3582_v19, 0.0  ;;  %v1355_v23 = vmul.f32 %v3582_v19, %v3582_v19  ;;  %v1385_v24 = vpack.c.bf16 %v3582_v19, %v3578_v16  ;;  %v2938_v25 = vpop.f32.mrb[39].mxu0  ;;  %v1359_v28 = vsel %vm314_vm1, %v1354_v17, 0.0 }
 0x773   : > { %v1341_v26 = vadd.f32 %v1340_v22, %v1339_v20 }
 0x774   : > { %v1360_v29 = vsel %vm314_vm1, %v1355_v23, 0.0 }
 0x775   : > { %v1361_v8 = vadd.f32 %v1360_v29, %v1359_v28 }
 0x777   : > { %v1321_v11 = vpop.f32.mrb[40].mxu0 }
 0x778   : > { %v1342_v21 = vsel %vm314_vm1, %v1321_v11, 0.0  ;;  %v1356_v47 = vmul.f32 %v1321_v11, %v1321_v11  ;;  %v2941_v48 = vpop.f32.mrb[41].mxu0 }
 0x779   : > { %v1343_v49 = vadd.f32 %v1342_v21, %v1341_v26  ;;  %v1324_v32 = vpop.f32.mrb[42].mxu0 }
 0x77a   : > { %v1362_v33 = vsel %vm314_vm1, %v1356_v47, 0.0  ;;  %v1344_v34 = vsel %vm314_vm1, %v1324_v32, 0.0  ;;  %v1357_v35 = vmul.f32 %v1324_v32, %v1324_v32  ;;  %v1386_v36 = vpack.c.bf16 %v1324_v32, %v1321_v11  ;;  %v2942_v38 = vpop.f32.mrb[43].mxu0  ;;  %v3090_v32 = vld [vmem:[%s3995_s1 + $0x40] sm:$0xff]  }
 0x77b   : > { %v1363_v39 = vadd.f32 %v1362_v33, %v1361_v8  ;;  %v1345_v41 = vadd.f32 %v1344_v34, %v1343_v49  ;;  %2964 = vmatpush3.bf16.msra.mxu0 %v3090_v32  ;;  %v3091_v33 = vld [vmem:[%s3995_s1 + $0x48] sm:$0xff]  }
 0x77c   : > { %v1364_v42 = vsel %vm314_vm1, %v1357_v35, 0.0  ;;  %2965 = vmatprep.subr.bf16.mxu0 %v3138_v1 }
 0x77d   : > { %v1365_v43 = vadd.f32 %v1364_v42, %v1363_v39 }
 0x77f   : > { %v1329_v44 = vpop.f32.mrb[44].mxu0  ;;  %2966 = vmatpush3.bf16.msra.mxu0 %v3091_v33  ;;  %v2691_v33 = vld [vmem:[%s4000_s6 + $0x3] sm:$0x1] }
 0x780   : > { %v1346_v45 = vsel %vm314_vm1, %v1329_v44, 0.0  ;;  %v1358_v46 = vmul.f32 %v1329_v44, %v1329_v44  ;;  %v2945_v37 = vpop.f32.mrb[45].mxu0  ;;  %v1387_v22 = vpack.c.bf16 %v1329_v44, %v1329_v44  ;;  %2995 = vmatprep.subr.bf16.mxu0 %v3138_v1 }
 0x781   : > { %v1347_v3 = vadd.f32 %v1346_v45, %v1345_v41  ;;  %v1332_v4 = vpop.f32.mrb[46].mxu0 }
 0x782   : > { %v1366_v5 = vsel %vm314_vm1, %v1358_v46, 0.0  ;;  %v2946_v40 = vpop.f32.mrb[47].mxu0 }
 0x783   : > { %v1348_v50 = vrot.slane %v1347_v3, 4  ;;  %v1367_v51 = vadd.f32 %v1366_v5, %v1365_v43 }
 0x785   : > { %v1349_v52 = vadd.f32 %v1348_v50, %v1347_v3  ;;  %v1368_v53 = vrot.slane %v1367_v51, 4 }
 0x787   : > { %v1350_v54 = vrot.slane %v1349_v52, 2  ;;  %v1369_v55 = vadd.f32 %v1368_v53, %v1367_v51 }
 0x789   : > { %v1351_v56 = vadd.f32 %v1350_v54, %v1349_v52  ;;  %v1370_v58 = vrot.slane %v1369_v55, 2 }
 0x78b   : > { %v1352_v59 = vrot.slane %v1351_v56, 1  ;;  %v1371_v61 = vadd.f32 %v1370_v58, %v1369_v55 }
 0x78d   : > { %v1353_v62 = vadd.f32 %v1352_v59, %v1351_v56  ;;  %v1372_v63 = vrot.slane %v1371_v61, 1 }
 0x78f   : > { %v1373_v0 = vadd.f32 %v1372_v63, %v1371_v61  ;;  %v1374_v2 = vmul.f32 0.025, %v1353_v62 }
 0x791   : > { %v1375_v6 = vmul.f32 0.025, %v1373_v0  ;;  %v1376_v7 = vmul.f32 %v1374_v2, %v1374_v2 }
 0x793   : > { %v1377_v57 = vsub.f32 %v1375_v6, %v1376_v7 }
 0x795   : > { %v1378_v9 = vadd.f32 0.001, %v1377_v57 }
 0x797   : > { %3114 = vrsqrt.f32 %v1378_v9 }
 0x7a1   : > { %v3115_v15 = vpop.eup %3114 }
 0x7a2   : > { %v1380_v30 = vmul.f32 %v3115_v15, %v2679_v60 }
 0x7a4   : > { %v1381_v16 = vmul.f32 %v1380_v30, %v1374_v2  ;;  %v1383_v17 = vpack.c.bf16 %v1380_v30, %v1380_v30 }
 0x7a6   : > { %v1382_v18 = vsub.f32 %v2680_v31, %v1381_v16  ;;  %v1389_v19 = vpack.i.b16 %v1383_v17, %v1383_v17 }
 0x7a8   : > { %v1384_v20 = vpack.c.bf16 %v1382_v18, %v1382_v18  ;;  %v1394_v23 = vrot.slane %v1389_v19, %v3265_v12 }
 0x7aa   : > { %v1395_v25 = vmul.bf16 %v1394_v23, %v1385_v24  ;;  %v1397_v26 = vmul.bf16 %v1394_v23, %v1387_v22  ;;  %v1399_v28 = vpack.i.b16 %v1384_v20, %v1384_v20  ;;  %v1396_v29 = vmul.bf16 %v1394_v23, %v1386_v36 }
 0x7ac   : > { %v1404_v8 = vrot.slane %v1399_v28, %v3265_v12 }
 0x7ae   : > { %v1405_v11 = vadd.bf16 %v1404_v8, %v1395_v25  ;;  %v1407_v21 = vadd.bf16 %v1404_v8, %v1397_v26  ;;  %v1406_v47 = vadd.bf16 %v1404_v8, %v1396_v29 }
 0x7b0   : > { %v1408_v48 = vmax.bf16 %v3140_v27, %v1405_v11  ;;  %v1409_v49 = vmax.bf16 %v3140_v27, %v1406_v47  ;;  %v1410_v24 = vmax.bf16 %v3140_v27, %v1407_v21 }
 0x7b2   : > { %2952 = vmatmul.mubr.msk.bf16.vlgmr.msra.gmra.mrb[36].mxu1 %vm314_vm1, %v1408_v48 }
 0x7b3   : > { %2955 = vmatprep.mubr.msk.bf16.mxu1 %vm3139_vm0, %v3138_v1 }
 0x7ba   : > { %2956 = vmatmul.mubr.msk.bf16.gmra.mrb[40].mxu1 %vm314_vm1, %v1409_v49  ;;  %v2690_v49 = vld [vmem:[%s3999_s5 + $0x3] sm:$0x1] }
 0x7bb   : > { %2959 = vmatprep.mubr.msk.bf16.mxu1 %vm3139_vm0, %v3138_v1 }
 0x7c2   : > { %2960 = vmatmul.mubr.msk.bf16.gmra.mrb[44].mxu1 %vm314_vm1, %v1410_v24 }
 0x7c3   : > { %2983 = vmatprep.mubr.msk.bf16.mxu1 %vm3139_vm0, %v3138_v1 }
 0x885   : > { %v3628_v34 = vpop.f32.mrb[36].mxu1 }
 0x886   : > { %v1512_v35 = vmul.f32 %v3628_v34, %v3628_v34  ;;  %v2953_v36 = vpop.f32.mrb[37].mxu1  ;;  %v1497_v39 = vsel %vm314_vm1, %v3628_v34, 0.0 }
 0x887   : > { %v3632_v38 = vpop.f32.mrb[38].mxu1 }
 0x888   : > { %v1498_v41 = vsel %vm314_vm1, %v3632_v38, 0.0  ;;  %v1513_v42 = vmul.f32 %v3632_v38, %v3632_v38  ;;  %v1543_v43 = vpack.c.bf16 %v3632_v38, %v3628_v34  ;;  %v2954_v44 = vpop.f32.mrb[39].mxu1  ;;  %v1517_v46 = vsel %vm314_vm1, %v1512_v35, 0.0 }
 0x889   : > { %v1499_v45 = vadd.f32 %v1498_v41, %v1497_v39 }
 0x88a   : > { %v1518_v37 = vsel %vm314_vm1, %v1513_v42, 0.0 }
 0x88b   : > { %v1519_v3 = vadd.f32 %v1518_v37, %v1517_v46 }
 0x88d   : > { %v1479_v4 = vpop.f32.mrb[40].mxu1 }
 0x88e   : > { %v1500_v5 = vsel %vm314_vm1, %v1479_v4, 0.0  ;;  %v1514_v40 = vmul.f32 %v1479_v4, %v1479_v4  ;;  %v2957_v50 = vpop.f32.mrb[41].mxu1 }
 0x88f   : > { %v1501_v51 = vadd.f32 %v1500_v5, %v1499_v45  ;;  %v1482_v52 = vpop.f32.mrb[42].mxu1 }
 0x890   : > { %v1520_v53 = vsel %vm314_vm1, %v1514_v40, 0.0  ;;  %v1502_v54 = vsel %vm314_vm1, %v1482_v52, 0.0  ;;  %v1515_v55 = vmul.f32 %v1482_v52, %v1482_v52  ;;  %v1544_v56 = vpack.c.bf16 %v1482_v52, %v1479_v4  ;;  %v2958_v58 = vpop.f32.mrb[43].mxu1 }
 0x891   : > { %v1521_v59 = vadd.f32 %v1520_v53, %v1519_v3  ;;  %v1503_v61 = vadd.f32 %v1502_v54, %v1501_v51 }
 0x892   : > { %v1522_v62 = vsel %vm314_vm1, %v1515_v55, 0.0 }
 0x893   : > { %v1523_v63 = vadd.f32 %v1522_v62, %v1521_v59 }
 0x895   : > { %v1487_v0 = vpop.f32.mrb[44].mxu1 }
 0x896   : > { %v1504_v2 = vsel %vm314_vm1, %v1487_v0, 0.0  ;;  %v1516_v6 = vmul.f32 %v1487_v0, %v1487_v0  ;;  %v2961_v7 = vpop.f32.mrb[45].mxu1  ;;  %v1545_v41 = vpack.c.bf16 %v1487_v0, %v1487_v0 }
 0x897   : > { %v1505_v57 = vadd.f32 %v1504_v2, %v1503_v61  ;;  %v1490_v9 = vpop.f32.mrb[46].mxu1 }
 0x898   : > { %v1524_v60 = vsel %vm314_vm1, %v1516_v6, 0.0  ;;  %v2962_v15 = vpop.f32.mrb[47].mxu1 }
 0x899   : > { %v1506_v30 = vrot.slane %v1505_v57, 4  ;;  %v1525_v31 = vadd.f32 %v1524_v60, %v1523_v63 }
 0x89b   : > { %v1507_v16 = vadd.f32 %v1506_v30, %v1505_v57  ;;  %v1526_v17 = vrot.slane %v1525_v31, 4 }
 0x89d   : > { %v1508_v18 = vrot.slane %v1507_v16, 2  ;;  %v1527_v19 = vadd.f32 %v1526_v17, %v1525_v31 }
 0x89f   : > { %v1509_v20 = vadd.f32 %v1508_v18, %v1507_v16  ;;  %v1528_v22 = vrot.slane %v1527_v19, 2 }
 0x8a1   : > { %v1510_v23 = vrot.slane %v1509_v20, 1  ;;  %v1529_v25 = vadd.f32 %v1528_v22, %v1527_v19 }
 0x8a3   : > { %v1511_v26 = vadd.f32 %v1510_v23, %v1509_v20  ;;  %v1530_v28 = vrot.slane %v1529_v25, 1 }
 0x8a5   : > { %v1531_v29 = vadd.f32 %v1530_v28, %v1529_v25  ;;  %v1532_v8 = vmul.f32 0.025, %v1511_v26 }
 0x8a7   : > { %v1533_v11 = vmul.f32 0.025, %v1531_v29  ;;  %v1534_v21 = vmul.f32 %v1532_v8, %v1532_v8 }
 0x8a9   : > { %v1535_v47 = vsub.f32 %v1533_v11, %v1534_v21 }
 0x8ab   : > { %v1536_v48 = vadd.f32 0.001, %v1535_v47 }
 0x8ad   : > { %3116 = vrsqrt.f32 %v1536_v48 }
 0x8b7   : > { %v3117_v24 = vpop.eup %3116 }
 0x8b8   : > { %v1538_v32 = vmul.f32 %v3117_v24, %v2690_v49 }
 0x8ba   : > { %v1539_v34 = vmul.f32 %v1538_v32, %v1532_v8  ;;  %v1541_v35 = vpack.c.bf16 %v1538_v32, %v1538_v32 }
 0x8bc   : > { %v1540_v36 = vsub.f32 %v2691_v33, %v1539_v34  ;;  %v1547_v38 = vpack.i.b16 %v1541_v35, %v1541_v35 }
 0x8be   : > { %v1542_v39 = vpack.c.bf16 %v1540_v36, %v1540_v36  ;;  %v1552_v42 = vrot.slane %v1547_v38, %v3265_v12 }
 0x8c0   : > { %v1553_v44 = vmul.bf16 %v1552_v42, %v1543_v43  ;;  %v1555_v45 = vmul.bf16 %v1552_v42, %v1545_v41  ;;  %v1557_v46 = vpack.i.b16 %v1542_v39, %v1542_v39  ;;  %v1554_v37 = vmul.bf16 %v1552_v42, %v1544_v56 }
 0x8c2   : > { %v1562_v3 = vrot.slane %v1557_v46, %v3265_v12 }
 0x8c4   : > { %v1563_v4 = vadd.bf16 %v1562_v3, %v1553_v44  ;;  %v1565_v5 = vadd.bf16 %v1562_v3, %v1555_v45  ;;  %v1564_v40 = vadd.bf16 %v1562_v3, %v1554_v37 }
 0x8c6   : > { %v1566_v50 = vadd.bf16 %v1563_v4, %v3548_v10  ;;  %v1567_v43 = vadd.bf16 %v1564_v40, %v3556_v13  ;;  %v1568_v10 = vadd.bf16 %v1565_v5, %v3564_v14  ;;  %v3092_v13 = vld [vmem:[%s3998_s4 + $0x40] sm:$0xff]   ;;  %v3093_v14 = vld [vmem:[%s3998_s4 + $0x48] sm:$0xff]  }
 0x8c7   : > { %2980 = vmatpush3.bf16.msra.mxu1 %v3092_v13 }
 0x8c8   : > { %v3660_v51 = vmax.bf16 %v3140_v27, %v1566_v50  ;;  %v3668_v52 = vmax.bf16 %v3140_v27, %v1567_v43  ;;  %v3676_v53 = vmax.bf16 %v3140_v27, %v1568_v10  ;;  %2981 = vmatprep.subr.bf16.mxu1 %v3138_v1  ;;  %v2701_v43 = vld [vmem:[%s3996_s2 + $0x4] sm:$0x1] }
 0x8ca   : > { %2968 = vmatmul.mubr.msk.bf16.vlgmr.msra.gmra.mrb[48].mxu0 %vm314_vm1, %v3660_v51 }
 0x8cb   : > { %2971 = vmatprep.mubr.msk.bf16.mxu0 %vm3139_vm0, %v3138_v1  ;;  %2982 = vmatpush3.bf16.msra.mxu1 %v3093_v14  ;;  %v2702_v14 = vld [vmem:[%s3997_s3 + $0x4] sm:$0x1] }
 0x8cc   : > { %3011 = vmatprep.subr.bf16.mxu1 %v3138_v1 }
 0x8d2   : > { %2972 = vmatmul.mubr.msk.bf16.gmra.mrb[52].mxu0 %vm314_vm1, %v3668_v52 }
 0x8d3   : > { %2975 = vmatprep.mubr.msk.bf16.mxu0 %vm3139_vm0, %v3138_v1 }
 0x8da   : > { %2976 = vmatmul.mubr.msk.bf16.gmra.mrb[56].mxu0 %vm314_vm1, %v3676_v53 }
 0x8db   : > { %2999 = vmatprep.mubr.msk.bf16.mxu0 %vm3139_vm0, %v3138_v1 }
 0x99d   : > { %v3690_v54 = vpop.f32.mrb[48].mxu0 }
 0x99e   : > { %v1673_v55 = vmul.f32 %v3690_v54, %v3690_v54  ;;  %v2969_v56 = vpop.f32.mrb[49].mxu0  ;;  %v1658_v59 = vsel %vm314_vm1, %v3690_v54, 0.0 }
 0x99f   : > { %v3694_v58 = vpop.f32.mrb[50].mxu0 }
 0x9a0   : > { %v1659_v61 = vsel %vm314_vm1, %v3694_v58, 0.0  ;;  %v1674_v62 = vmul.f32 %v3694_v58, %v3694_v58  ;;  %v1704_v63 = vpack.c.bf16 %v3694_v58, %v3690_v54  ;;  %v2970_v0 = vpop.f32.mrb[51].mxu0  ;;  %v1678_v6 = vsel %vm314_vm1, %v1673_v55, 0.0 }
 0x9a1   : > { %v1660_v2 = vadd.f32 %v1659_v61, %v1658_v59 }
 0x9a2   : > { %v1679_v7 = vsel %vm314_vm1, %v1674_v62, 0.0 }
 0x9a3   : > { %v1680_v57 = vadd.f32 %v1679_v7, %v1678_v6 }
 0x9a5   : > { %v1640_v9 = vpop.f32.mrb[52].mxu0 }
 0x9a6   : > { %v1661_v60 = vsel %vm314_vm1, %v1640_v9, 0.0  ;;  %v1675_v15 = vmul.f32 %v1640_v9, %v1640_v9  ;;  %v2973_v30 = vpop.f32.mrb[53].mxu0 }
 0x9a7   : > { %v1662_v31 = vadd.f32 %v1661_v60, %v1660_v2  ;;  %v1643_v16 = vpop.f32.mrb[54].mxu0 }
 0x9a8   : > { %v1681_v17 = vsel %vm314_vm1, %v1675_v15, 0.0  ;;  %v1663_v18 = vsel %vm314_vm1, %v1643_v16, 0.0  ;;  %v1676_v19 = vmul.f32 %v1643_v16, %v1643_v16  ;;  %v1705_v20 = vpack.c.bf16 %v1643_v16, %v1640_v9  ;;  %v2974_v22 = vpop.f32.mrb[55].mxu0  ;;  %v3094_v16 = vld [vmem:[%s3995_s1 + $0x50] sm:$0xff]  }
 0x9a9   : > { %v1682_v23 = vadd.f32 %v1681_v17, %v1680_v57  ;;  %v1664_v25 = vadd.f32 %v1663_v18, %v1662_v31  ;;  %2996 = vmatpush3.bf16.msra.mxu0 %v3094_v16  ;;  %v3095_v17 = vld [vmem:[%s3995_s1 + $0x58] sm:$0xff]  }
 0x9aa   : > { %v1683_v26 = vsel %vm314_vm1, %v1676_v19, 0.0  ;;  %2997 = vmatprep.subr.bf16.mxu0 %v3138_v1 }
 0x9ab   : > { %v1684_v28 = vadd.f32 %v1683_v26, %v1682_v23 }
 0x9ad   : > { %v1648_v29 = vpop.f32.mrb[56].mxu0  ;;  %2998 = vmatpush3.bf16.msra.mxu0 %v3095_v17  ;;  %v2713_v17 = vld [vmem:[%s4000_s6 + $0x4] sm:$0x1] }
 0x9ae   : > { %v1665_v8 = vsel %vm314_vm1, %v1648_v29, 0.0  ;;  %v1677_v11 = vmul.f32 %v1648_v29, %v1648_v29  ;;  %v2977_v21 = vpop.f32.mrb[57].mxu0  ;;  %v1706_v61 = vpack.c.bf16 %v1648_v29, %v1648_v29  ;;  %3027 = vmatprep.subr.bf16.mxu0 %v3138_v1 }
 0x9af   : > { %v1666_v47 = vadd.f32 %v1665_v8, %v1664_v25  ;;  %v1651_v48 = vpop.f32.mrb[58].mxu0 }
 0x9b0   : > { %v1685_v49 = vsel %vm314_vm1, %v1677_v11, 0.0  ;;  %v2978_v24 = vpop.f32.mrb[59].mxu0 }
 0x9b1   : > { %v1667_v32 = vrot.slane %v1666_v47, 4  ;;  %v1686_v33 = vadd.f32 %v1685_v49, %v1684_v28 }
 0x9b3   : > { %v1668_v34 = vadd.f32 %v1667_v32, %v1666_v47  ;;  %v1687_v35 = vrot.slane %v1686_v33, 4 }
 0x9b5   : > { %v1669_v36 = vrot.slane %v1668_v34, 2  ;;  %v1688_v38 = vadd.f32 %v1687_v35, %v1686_v33 }
 0x9b7   : > { %v1670_v39 = vadd.f32 %v1669_v36, %v1668_v34  ;;  %v1689_v41 = vrot.slane %v1688_v38, 2 }
 0x9b9   : > { %v1671_v42 = vrot.slane %v1670_v39, 1  ;;  %v1690_v44 = vadd.f32 %v1689_v41, %v1688_v38 }
 0x9bb   : > { %v1672_v45 = vadd.f32 %v1671_v42, %v1670_v39  ;;  %v1691_v46 = vrot.slane %v1690_v44, 1 }
 0x9bd   : > { %v1692_v37 = vadd.f32 %v1691_v46, %v1690_v44  ;;  %v1693_v3 = vmul.f32 0.025, %v1672_v45 }
 0x9bf   : > { %v1694_v4 = vmul.f32 0.025, %v1692_v37  ;;  %v1695_v5 = vmul.f32 %v1693_v3, %v1693_v3 }
 0x9c1   : > { %v1696_v40 = vsub.f32 %v1694_v4, %v1695_v5 }
 0x9c3   : > { %v1697_v50 = vadd.f32 0.001, %v1696_v40 }
 0x9c5   : > { %3118 = vrsqrt.f32 %v1697_v50 }
 0x9cf   : > { %v3119_v10 = vpop.eup %3118 }
 0x9d0   : > { %v1699_v13 = vmul.f32 %v3119_v10, %v2701_v43 }
 0x9d2   : > { %v1700_v54 = vmul.f32 %v1699_v13, %v1693_v3  ;;  %v1702_v55 = vpack.c.bf16 %v1699_v13, %v1699_v13 }
 0x9d4   : > { %v1701_v56 = vsub.f32 %v2702_v14, %v1700_v54  ;;  %v1708_v58 = vpack.i.b16 %v1702_v55, %v1702_v55 }
 0x9d6   : > { %v1703_v59 = vpack.c.bf16 %v1701_v56, %v1701_v56  ;;  %v1713_v62 = vrot.slane %v1708_v58, %v3265_v12 }
 0x9d8   : > { %v1714_v0 = vmul.bf16 %v1713_v62, %v1704_v63  ;;  %v1716_v2 = vmul.bf16 %v1713_v62, %v1706_v61  ;;  %v1718_v6 = vpack.i.b16 %v1703_v59, %v1703_v59  ;;  %v1715_v7 = vmul.bf16 %v1713_v62, %v1705_v20 }
 0x9da   : > { %v1723_v57 = vrot.slane %v1718_v6, %v3265_v12 }
 0x9dc   : > { %v1724_v9 = vadd.bf16 %v1723_v57, %v1714_v0  ;;  %v1726_v60 = vadd.bf16 %v1723_v57, %v1716_v2  ;;  %v1725_v15 = vadd.bf16 %v1723_v57, %v1715_v7 }
 0x9de   : > { %v1727_v30 = vmax.bf16 %v3140_v27, %v1724_v9  ;;  %v1728_v31 = vmax.bf16 %v3140_v27, %v1725_v15  ;;  %v1729_v63 = vmax.bf16 %v3140_v27, %v1726_v60 }
 0x9e0   : > { %2984 = vmatmul.mubr.msk.bf16.vlgmr.msra.gmra.mrb[48].mxu1 %vm314_vm1, %v1727_v30 }
 0x9e1   : > { %2987 = vmatprep.mubr.msk.bf16.mxu1 %vm3139_vm0, %v3138_v1 }
 0x9e8   : > { %2988 = vmatmul.mubr.msk.bf16.gmra.mrb[52].mxu1 %vm314_vm1, %v1728_v31  ;;  %v2712_v31 = vld [vmem:[%s3999_s5 + $0x4] sm:$0x1] }
 0x9e9   : > { %2991 = vmatprep.mubr.msk.bf16.mxu1 %vm3139_vm0, %v3138_v1 }
 0x9f0   : > { %2992 = vmatmul.mubr.msk.bf16.gmra.mrb[56].mxu1 %vm314_vm1, %v1729_v63 }
 0x9f1   : > { %3015 = vmatprep.mubr.msk.bf16.mxu1 %vm3139_vm0, %v3138_v1 }
 0xab3   : > { %v3740_v18 = vpop.f32.mrb[48].mxu1 }
 0xab4   : > { %v1831_v19 = vmul.f32 %v3740_v18, %v3740_v18  ;;  %v2985_v20 = vpop.f32.mrb[49].mxu1  ;;  %v1816_v23 = vsel %vm314_vm1, %v3740_v18, 0.0 }
 0xab5   : > { %v3744_v22 = vpop.f32.mrb[50].mxu1 }
 0xab6   : > { %v1817_v25 = vsel %vm314_vm1, %v3744_v22, 0.0  ;;  %v1832_v26 = vmul.f32 %v3744_v22, %v3744_v22  ;;  %v1862_v28 = vpack.c.bf16 %v3744_v22, %v3740_v18  ;;  %v2986_v29 = vpop.f32.mrb[51].mxu1  ;;  %v1836_v11 = vsel %vm314_vm1, %v1831_v19, 0.0 }
 0xab7   : > { %v1818_v8 = vadd.f32 %v1817_v25, %v1816_v23 }
 0xab8   : > { %v1837_v21 = vsel %vm314_vm1, %v1832_v26, 0.0 }
 0xab9   : > { %v1838_v47 = vadd.f32 %v1837_v21, %v1836_v11 }
 0xabb   : > { %v1798_v48 = vpop.f32.mrb[52].mxu1 }
 0xabc   : > { %v1819_v49 = vsel %vm314_vm1, %v1798_v48, 0.0  ;;  %v1833_v24 = vmul.f32 %v1798_v48, %v1798_v48  ;;  %v2989_v32 = vpop.f32.mrb[53].mxu1 }
 0xabd   : > { %v1820_v33 = vadd.f32 %v1819_v49, %v1818_v8  ;;  %v1801_v34 = vpop.f32.mrb[54].mxu1 }
 0xabe   : > { %v1839_v35 = vsel %vm314_vm1, %v1833_v24, 0.0  ;;  %v1821_v36 = vsel %vm314_vm1, %v1801_v34, 0.0  ;;  %v1834_v38 = vmul.f32 %v1801_v34, %v1801_v34  ;;  %v1863_v39 = vpack.c.bf16 %v1801_v34, %v1798_v48  ;;  %v2990_v41 = vpop.f32.mrb[55].mxu1 }
 0xabf   : > { %v1840_v42 = vadd.f32 %v1839_v35, %v1838_v47  ;;  %v1822_v44 = vadd.f32 %v1821_v36, %v1820_v33 }
 0xac0   : > { %v1841_v45 = vsel %vm314_vm1, %v1834_v38, 0.0 }
 0xac1   : > { %v1842_v46 = vadd.f32 %v1841_v45, %v1840_v42 }
 0xac3   : > { %v1806_v37 = vpop.f32.mrb[56].mxu1 }
 0xac4   : > { %v1823_v3 = vsel %vm314_vm1, %v1806_v37, 0.0  ;;  %v1835_v4 = vmul.f32 %v1806_v37, %v1806_v37  ;;  %v2993_v5 = vpop.f32.mrb[57].mxu1  ;;  %v1864_v25 = vpack.c.bf16 %v1806_v37, %v1806_v37 }
 0xac5   : > { %v1824_v40 = vadd.f32 %v1823_v3, %v1822_v44  ;;  %v1809_v50 = vpop.f32.mrb[58].mxu1 }
 0xac6   : > { %v1843_v43 = vsel %vm314_vm1, %v1835_v4, 0.0  ;;  %v2994_v10 = vpop.f32.mrb[59].mxu1 }
 0xac7   : > { %v1825_v13 = vrot.slane %v1824_v40, 4  ;;  %v1844_v14 = vadd.f32 %v1843_v43, %v1842_v46 }
 0xac9   : > { %v1826_v54 = vadd.f32 %v1825_v13, %v1824_v40  ;;  %v1845_v55 = vrot.slane %v1844_v14, 4 }
 0xacb   : > { %v1827_v56 = vrot.slane %v1826_v54, 2  ;;  %v1846_v58 = vadd.f32 %v1845_v55, %v1844_v14 }
 0xacd   : > { %v1828_v59 = vadd.f32 %v1827_v56, %v1826_v54  ;;  %v1847_v61 = vrot.slane %v1846_v58, 2 }
 0xacf   : > { %v1829_v62 = vrot.slane %v1828_v59, 1  ;;  %v1848_v0 = vadd.f32 %v1847_v61, %v1846_v58 }
 0xad1   : > { %v1830_v2 = vadd.f32 %v1829_v62, %v1828_v59  ;;  %v1849_v6 = vrot.slane %v1848_v0, 1 }
 0xad3   : > { %v1850_v7 = vadd.f32 %v1849_v6, %v1848_v0  ;;  %v1851_v57 = vmul.f32 0.025, %v1830_v2 }
 0xad5   : > { %v1852_v9 = vmul.f32 0.025, %v1850_v7  ;;  %v1853_v60 = vmul.f32 %v1851_v57, %v1851_v57 }
 0xad7   : > { %v1854_v15 = vsub.f32 %v1852_v9, %v1853_v60 }
 0xad9   : > { %v1855_v30 = vadd.f32 0.001, %v1854_v15 }
 0xadb   : > { %3120 = vrsqrt.f32 %v1855_v30 }
 0xae5   : > { %v3121_v63 = vpop.eup %3120 }
 0xae6   : > { %v1857_v16 = vmul.f32 %v3121_v63, %v2712_v31 }
 0xae8   : > { %v1858_v18 = vmul.f32 %v1857_v16, %v1851_v57  ;;  %v1860_v19 = vpack.c.bf16 %v1857_v16, %v1857_v16 }
 0xaea   : > { %v1859_v20 = vsub.f32 %v2713_v17, %v1858_v18  ;;  %v1866_v22 = vpack.i.b16 %v1860_v19, %v1860_v19 }
 0xaec   : > { %v1861_v23 = vpack.c.bf16 %v1859_v20, %v1859_v20  ;;  %v1871_v26 = vrot.slane %v1866_v22, %v3265_v12 }
 0xaee   : > { %v1872_v29 = vmul.bf16 %v1871_v26, %v1862_v28  ;;  %v1874_v8 = vmul.bf16 %v1871_v26, %v1864_v25  ;;  %v1876_v11 = vpack.i.b16 %v1861_v23, %v1861_v23  ;;  %v1873_v21 = vmul.bf16 %v1871_v26, %v1863_v39 }
 0xaf0   : > { %v1881_v47 = vrot.slane %v1876_v11, %v3265_v12 }
 0xaf2   : > { %v1882_v48 = vadd.bf16 %v1881_v47, %v1872_v29  ;;  %v1884_v49 = vadd.bf16 %v1881_v47, %v1874_v8  ;;  %v1883_v24 = vadd.bf16 %v1881_v47, %v1873_v21 }
 0xaf4   : > { %v1885_v32 = vadd.bf16 %v1882_v48, %v3660_v51  ;;  %v1886_v28 = vadd.bf16 %v1883_v24, %v3668_v52  ;;  %v1887_v51 = vadd.bf16 %v1884_v49, %v3676_v53  ;;  %v3096_v52 = vld [vmem:[%s3998_s4 + $0x50] sm:$0xff]   ;;  %v3097_v53 = vld [vmem:[%s3998_s4 + $0x58] sm:$0xff]  }
 0xaf5   : > { %3012 = vmatpush3.bf16.msra.mxu1 %v3096_v52 }
 0xaf6   : > { %v3772_v33 = vmax.bf16 %v3140_v27, %v1885_v32  ;;  %v3780_v34 = vmax.bf16 %v3140_v27, %v1886_v28  ;;  %v3788_v35 = vmax.bf16 %v3140_v27, %v1887_v51  ;;  %3013 = vmatprep.subr.bf16.mxu1 %v3138_v1  ;;  %v2723_v28 = vld [vmem:[%s3996_s2 + $0x5] sm:$0x1] }
 0xaf8   : > { %3000 = vmatmul.mubr.msk.bf16.vlgmr.msra.gmra.mrb[60].mxu0 %vm314_vm1, %v3772_v33 }
 0xaf9   : > { %3003 = vmatprep.mubr.msk.bf16.mxu0 %vm3139_vm0, %v3138_v1  ;;  %3014 = vmatpush3.bf16.msra.mxu1 %v3097_v53  ;;  %v2724_v53 = vld [vmem:[%s3997_s3 + $0x5] sm:$0x1] }
 0xafa   : > { %3043 = vmatprep.subr.bf16.mxu1 %v3138_v1 }
 0xb00   : > { %3004 = vmatmul.mubr.msk.bf16.gmra.mrb[64].mxu0 %vm314_vm1, %v3780_v34 }
 0xb01   : > { %3007 = vmatprep.mubr.msk.bf16.mxu0 %vm3139_vm0, %v3138_v1 }
 0xb08   : > { %3008 = vmatmul.mubr.msk.bf16.gmra.mrb[68].mxu0 %vm314_vm1, %v3788_v35 }
 0xb09   : > { %3031 = vmatprep.mubr.msk.bf16.mxu0 %vm3139_vm0, %v3138_v1 }
 0xbcb   : > { %v3802_v36 = vpop.f32.mrb[60].mxu0 }
 0xbcc   : > { %v1992_v38 = vmul.f32 %v3802_v36, %v3802_v36  ;;  %v3001_v39 = vpop.f32.mrb[61].mxu0  ;;  %v1977_v42 = vsel %vm314_vm1, %v3802_v36, 0.0 }
 0xbcd   : > { %v3806_v41 = vpop.f32.mrb[62].mxu0 }
 0xbce   : > { %v1978_v44 = vsel %vm314_vm1, %v3806_v41, 0.0  ;;  %v1993_v45 = vmul.f32 %v3806_v41, %v3806_v41  ;;  %v2023_v46 = vpack.c.bf16 %v3806_v41, %v3802_v36  ;;  %v3002_v37 = vpop.f32.mrb[63].mxu0  ;;  %v1997_v4 = vsel %vm314_vm1, %v1992_v38, 0.0 }
 0xbcf   : > { %v1979_v3 = vadd.f32 %v1978_v44, %v1977_v42 }
 0xbd0   : > { %v1998_v5 = vsel %vm314_vm1, %v1993_v45, 0.0 }
 0xbd1   : > { %v1999_v40 = vadd.f32 %v1998_v5, %v1997_v4 }
 0xbd3   : > { %v1959_v50 = vpop.f32.mrb[64].mxu0 }
 0xbd4   : > { %v1980_v43 = vsel %vm314_vm1, %v1959_v50, 0.0  ;;  %v1994_v10 = vmul.f32 %v1959_v50, %v1959_v50  ;;  %v3005_v13 = vpop.f32.mrb[65].mxu0 }
 0xbd5   : > { %v1981_v14 = vadd.f32 %v1980_v43, %v1979_v3  ;;  %v1962_v54 = vpop.f32.mrb[66].mxu0 }
 0xbd6   : > { %v2000_v55 = vsel %vm314_vm1, %v1994_v10, 0.0  ;;  %v1982_v56 = vsel %vm314_vm1, %v1962_v54, 0.0  ;;  %v1995_v58 = vmul.f32 %v1962_v54, %v1962_v54  ;;  %v2024_v59 = vpack.c.bf16 %v1962_v54, %v1959_v50  ;;  %v3006_v61 = vpop.f32.mrb[67].mxu0  ;;  %v3098_v54 = vld [vmem:[%s3995_s1 + $0x60] sm:$0xff]  }
 0xbd7   : > { %v2001_v62 = vadd.f32 %v2000_v55, %v1999_v40  ;;  %v1983_v0 = vadd.f32 %v1982_v56, %v1981_v14  ;;  %3028 = vmatpush3.bf16.msra.mxu0 %v3098_v54  ;;  %v3099_v55 = vld [vmem:[%s3995_s1 + $0x68] sm:$0xff]  }
 0xbd8   : > { %v2002_v2 = vsel %vm314_vm1, %v1995_v58, 0.0  ;;  %3029 = vmatprep.subr.bf16.mxu0 %v3138_v1 }
 0xbd9   : > { %v2003_v6 = vadd.f32 %v2002_v2, %v2001_v62 }
 0xbdb   : > { %v1967_v7 = vpop.f32.mrb[68].mxu0  ;;  %3030 = vmatpush3.bf16.msra.mxu0 %v3099_v55  ;;  %v2735_v55 = vld [vmem:[%s4000_s6 + $0x5] sm:$0x1] }
 0xbdc   : > { %v1984_v57 = vsel %vm314_vm1, %v1967_v7, 0.0  ;;  %v1996_v9 = vmul.f32 %v1967_v7, %v1967_v7  ;;  %v3009_v60 = vpop.f32.mrb[69].mxu0  ;;  %v2025_v44 = vpack.c.bf16 %v1967_v7, %v1967_v7 }
 0xbdd   : > { %v1985_v15 = vadd.f32 %v1984_v57, %v1983_v0  ;;  %v1970_v30 = vpop.f32.mrb[70].mxu0 }
 0xbde   : > { %v2004_v31 = vsel %vm314_vm1, %v1996_v9, 0.0  ;;  %v3010_v63 = vpop.f32.mrb[71].mxu0 }
 0xbdf   : > { %v1986_v16 = vrot.slane %v1985_v15, 4  ;;  %v2005_v17 = vadd.f32 %v2004_v31, %v2003_v6 }
 0xbe1   : > { %v1987_v18 = vadd.f32 %v1986_v16, %v1985_v15  ;;  %v2006_v19 = vrot.slane %v2005_v17, 4 }
 0xbe3   : > { %v1988_v20 = vrot.slane %v1987_v18, 2  ;;  %v2007_v22 = vadd.f32 %v2006_v19, %v2005_v17 }
 0xbe5   : > { %v1989_v23 = vadd.f32 %v1988_v20, %v1987_v18  ;;  %v2008_v25 = vrot.slane %v2007_v22, 2 }
 0xbe7   : > { %v1990_v26 = vrot.slane %v1989_v23, 1  ;;  %v2009_v29 = vadd.f32 %v2008_v25, %v2007_v22 }
 0xbe9   : > { %v1991_v8 = vadd.f32 %v1990_v26, %v1989_v23  ;;  %v2010_v11 = vrot.slane %v2009_v29, 1 }
 0xbeb   : > { %v2011_v21 = vadd.f32 %v2010_v11, %v2009_v29  ;;  %v2012_v47 = vmul.f32 0.025, %v1991_v8 }
 0xbed   : > { %v2013_v48 = vmul.f32 0.025, %v2011_v21  ;;  %v2014_v49 = vmul.f32 %v2012_v47, %v2012_v47 }
 0xbef   : > { %v2015_v24 = vsub.f32 %v2013_v48, %v2014_v49 }
 0xbf1   : > { %v2016_v32 = vadd.f32 0.001, %v2015_v24 }
 0xbf3   : > { %3122 = vrsqrt.f32 %v2016_v32 }
 0xbfd   : > { %v3123_v51 = vpop.eup %3122 }
 0xbfe   : > { %v2018_v52 = vmul.f32 %v3123_v51, %v2723_v28 }
 0xc00   : > { %v2019_v36 = vmul.f32 %v2018_v52, %v2012_v47  ;;  %v2021_v38 = vpack.c.bf16 %v2018_v52, %v2018_v52 }
 0xc02   : > { %v2020_v39 = vsub.f32 %v2724_v53, %v2019_v36  ;;  %v2027_v41 = vpack.i.b16 %v2021_v38, %v2021_v38 }
 0xc04   : > { %v2022_v42 = vpack.c.bf16 %v2020_v39, %v2020_v39  ;;  %v2032_v45 = vrot.slane %v2027_v41, %v3265_v12 }
 0xc06   : > { %v2033_v37 = vmul.bf16 %v2032_v45, %v2023_v46  ;;  %v2035_v3 = vmul.bf16 %v2032_v45, %v2025_v44  ;;  %v2037_v4 = vpack.i.b16 %v2022_v42, %v2022_v42  ;;  %v2034_v5 = vmul.bf16 %v2032_v45, %v2024_v59 }
 0xc08   : > { %v2042_v40 = vrot.slane %v2037_v4, %v3265_v12 }
 0xc0a   : > { %v2043_v50 = vadd.bf16 %v2042_v40, %v2033_v37  ;;  %v2045_v43 = vadd.bf16 %v2042_v40, %v2035_v3  ;;  %v2044_v10 = vadd.bf16 %v2042_v40, %v2034_v5 }
 0xc0c   : > { %v2046_v13 = vmax.bf16 %v3140_v27, %v2043_v50  ;;  %v2047_v14 = vmax.bf16 %v3140_v27, %v2044_v10  ;;  %v2048_v46 = vmax.bf16 %v3140_v27, %v2045_v43 }
 0xc0e   : > { %3016 = vmatmul.mubr.msk.bf16.vlgmr.msra.gmra.mrb[60].mxu1 %vm314_vm1, %v2046_v13 }
 0xc0f   : > { %3019 = vmatprep.mubr.msk.bf16.mxu1 %vm3139_vm0, %v3138_v1 }
 0xc16   : > { %3020 = vmatmul.mubr.msk.bf16.gmra.mrb[64].mxu1 %vm314_vm1, %v2047_v14  ;;  %v2734_v14 = vld [vmem:[%s3999_s5 + $0x5] sm:$0x1] }
 0xc17   : > { %3023 = vmatprep.mubr.msk.bf16.mxu1 %vm3139_vm0, %v3138_v1 }
 0xc1e   : > { %3024 = vmatmul.mubr.msk.bf16.gmra.mrb[68].mxu1 %vm314_vm1, %v2048_v46 }
 0xc1f   : > { %3047 = vmatprep.mubr.msk.bf16.mxu1 %vm3139_vm0, %v3138_v1 }
 0xce1   : > { %v3851_v56 = vpop.f32.mrb[60].mxu1 }
 0xce2   : > { %v2150_v58 = vmul.f32 %v3851_v56, %v3851_v56  ;;  %v3017_v59 = vpop.f32.mrb[61].mxu1  ;;  %v2135_v62 = vsel %vm314_vm1, %v3851_v56, 0.0 }
 0xce3   : > { %v3855_v61 = vpop.f32.mrb[62].mxu1 }
 0xce4   : > { %v2136_v0 = vsel %vm314_vm1, %v3855_v61, 0.0  ;;  %v2151_v2 = vmul.f32 %v3855_v61, %v3855_v61  ;;  %v2181_v6 = vpack.c.bf16 %v3855_v61, %v3851_v56  ;;  %v3018_v7 = vpop.f32.mrb[63].mxu1  ;;  %v2155_v9 = vsel %vm314_vm1, %v2150_v58, 0.0 }
 0xce5   : > { %v2137_v57 = vadd.f32 %v2136_v0, %v2135_v62 }
 0xce6   : > { %v2156_v60 = vsel %vm314_vm1, %v2151_v2, 0.0 }
 0xce7   : > { %v2157_v15 = vadd.f32 %v2156_v60, %v2155_v9 }
 0xce9   : > { %v2117_v30 = vpop.f32.mrb[64].mxu1 }
 0xcea   : > { %v2138_v31 = vsel %vm314_vm1, %v2117_v30, 0.0  ;;  %v2152_v63 = vmul.f32 %v2117_v30, %v2117_v30  ;;  %v3021_v16 = vpop.f32.mrb[65].mxu1 }
 0xceb   : > { %v2139_v17 = vadd.f32 %v2138_v31, %v2137_v57  ;;  %v2120_v18 = vpop.f32.mrb[66].mxu1 }
 0xcec   : > { %v2158_v19 = vsel %vm314_vm1, %v2152_v63, 0.0  ;;  %v2140_v20 = vsel %vm314_vm1, %v2120_v18, 0.0  ;;  %v2153_v22 = vmul.f32 %v2120_v18, %v2120_v18  ;;  %v2182_v23 = vpack.c.bf16 %v2120_v18, %v2117_v30  ;;  %v3022_v25 = vpop.f32.mrb[67].mxu1 }
 0xced   : > { %v2159_v26 = vadd.f32 %v2158_v19, %v2157_v15  ;;  %v2141_v29 = vadd.f32 %v2140_v20, %v2139_v17  ;;  %v3101_v20 = vld [vmem:[%s3998_s4 + $0x68] sm:$0xff]  }
 0xcee   : > { %v2160_v8 = vsel %vm314_vm1, %v2153_v22, 0.0 }
 0xcef   : > { %v2161_v11 = vadd.f32 %v2160_v8, %v2159_v26 }
 0xcf1   : > { %v2125_v21 = vpop.f32.mrb[68].mxu1 }
 0xcf2   : > { %v2142_v47 = vsel %vm314_vm1, %v2125_v21, 0.0  ;;  %v2154_v48 = vmul.f32 %v2125_v21, %v2125_v21  ;;  %v3025_v49 = vpop.f32.mrb[69].mxu1  ;;  %v2183_v0 = vpack.c.bf16 %v2125_v21, %v2125_v21 }
 0xcf3   : > { %v2143_v24 = vadd.f32 %v2142_v47, %v2141_v29  ;;  %v2128_v32 = vpop.f32.mrb[70].mxu1 }
 0xcf4   : > { %v2162_v28 = vsel %vm314_vm1, %v2154_v48, 0.0  ;;  %v3026_v51 = vpop.f32.mrb[71].mxu1 }
 0xcf5   : > { %v2144_v52 = vrot.slane %v2143_v24, 4  ;;  %v2163_v53 = vadd.f32 %v2162_v28, %v2161_v11 }
 0xcf7   : > { %v2145_v36 = vadd.f32 %v2144_v52, %v2143_v24  ;;  %v2164_v38 = vrot.slane %v2163_v53, 4 }
 0xcf9   : > { %v2146_v39 = vrot.slane %v2145_v36, 2  ;;  %v2165_v41 = vadd.f32 %v2164_v38, %v2163_v53 }
 0xcfb   : > { %v2147_v42 = vadd.f32 %v2146_v39, %v2145_v36  ;;  %v2166_v44 = vrot.slane %v2165_v41, 2 }
 0xcfd   : > { %v2148_v45 = vrot.slane %v2147_v42, 1  ;;  %v2167_v37 = vadd.f32 %v2166_v44, %v2165_v41 }
 0xcff   : > { %v2149_v3 = vadd.f32 %v2148_v45, %v2147_v42  ;;  %v2168_v4 = vrot.slane %v2167_v37, 1 }
 0xd01   : > { %v2169_v5 = vadd.f32 %v2168_v4, %v2167_v37  ;;  %v2170_v40 = vmul.f32 0.025, %v2149_v3 }
 0xd03   : > { %v2171_v50 = vmul.f32 0.025, %v2169_v5  ;;  %v2172_v43 = vmul.f32 %v2170_v40, %v2170_v40 }
 0xd05   : > { %v2173_v10 = vsub.f32 %v2171_v50, %v2172_v43 }
 0xd07   : > { %v2174_v13 = vadd.f32 0.001, %v2173_v10 }
 0xd09   : > { %3124 = vrsqrt.f32 %v2174_v13 }
 0xd13   : > { %v3125_v46 = vpop.eup %3124 }
 0xd14   : > { %v2176_v54 = vmul.f32 %v3125_v46, %v2734_v14 }
 0xd16   : > { %v2177_v56 = vmul.f32 %v2176_v54, %v2170_v40  ;;  %v2179_v58 = vpack.c.bf16 %v2176_v54, %v2176_v54 }
 0xd18   : > { %v2178_v59 = vsub.f32 %v2735_v55, %v2177_v56  ;;  %v2185_v61 = vpack.i.b16 %v2179_v58, %v2179_v58 }
 0xd1a   : > { %v2180_v62 = vpack.c.bf16 %v2178_v59, %v2178_v59  ;;  %v2190_v2 = vrot.slane %v2185_v61, %v3265_v12 }
 0xd1c   : > { %v2191_v7 = vmul.bf16 %v2190_v2, %v2181_v6  ;;  %v2193_v57 = vmul.bf16 %v2190_v2, %v2183_v0  ;;  %v2195_v9 = vpack.i.b16 %v2180_v62, %v2180_v62  ;;  %v2192_v60 = vmul.bf16 %v2190_v2, %v2182_v23 }
 0xd1e   : > { %v2200_v15 = vrot.slane %v2195_v9, %v3265_v12 }
 0xd20   : > { %v2201_v30 = vadd.bf16 %v2200_v15, %v2191_v7  ;;  %v2203_v31 = vadd.bf16 %v2200_v15, %v2193_v57  ;;  %v2202_v63 = vadd.bf16 %v2200_v15, %v2192_v60 }
 0xd22   : > { %v2204_v16 = vadd.bf16 %v2201_v30, %v3772_v33  ;;  %v2205_v6 = vadd.bf16 %v2202_v63, %v3780_v34  ;;  %v2206_v33 = vadd.bf16 %v2203_v31, %v3788_v35  ;;  %v3100_v34 = vld [vmem:[%s3998_s4 + $0x60] sm:$0xff]  }
 0xd23   : > { %3044 = vmatpush3.bf16.msra.mxu1 %v3100_v34 }
 0xd24   : > { %v3883_v17 = vmax.bf16 %v3140_v27, %v2204_v16  ;;  %v3891_v18 = vmax.bf16 %v3140_v27, %v2205_v6  ;;  %v3899_v19 = vmax.bf16 %v3140_v27, %v2206_v33  ;;  %3045 = vmatprep.subr.bf16.mxu1 %v3138_v1  ;;  %v2745_v6 = vld [vmem:[%s3996_s2 + $0x6] sm:$0x1] }
 0xd26   : > { %3032 = vmatmul.mubr.msk.bf16.vlgmr.msra.gmra.mrb[72].mxu0 %vm314_vm1, %v3883_v17 }
 0xd27   : > { %3035 = vmatprep.mubr.msk.bf16.mxu0 %vm3139_vm0, %v3138_v1  ;;  %3046 = vmatpush3.bf16.msra.mxu1 %v3101_v20  ;;  %v2746_v20 = vld [vmem:[%s3997_s3 + $0x6] sm:$0x1] }
 0xd2e   : > { %3036 = vmatmul.mubr.msk.bf16.gmra.mrb[76].mxu0 %vm314_vm1, %v3891_v18 }
 0xd2f   : > { %3039 = vmatprep.mubr.msk.bf16.mxu0 %vm3139_vm0, %v3138_v1 }
 0xd36   : > { %3040 = vmatmul.mubr.msk.bf16.gmra.mrb[80].mxu0 %vm314_vm1, %v3899_v19 }
 0xdf9   : > { %v3910_v22 = vpop.f32.mrb[72].mxu0 }
 0xdfa   : > { %v2311_v35 = vmul.f32 %v3910_v22, %v3910_v22  ;;  %v3033_v23 = vpop.f32.mrb[73].mxu0  ;;  %v2296_v26 = vsel %vm314_vm1, %v3910_v22, 0.0 }
 0xdfb   : > { %v3914_v25 = vpop.f32.mrb[74].mxu0 }
 0xdfc   : > { %v2297_v29 = vsel %vm314_vm1, %v3914_v25, 0.0  ;;  %v2312_v8 = vmul.f32 %v3914_v25, %v3914_v25  ;;  %v2342_v11 = vpack.c.bf16 %v3914_v25, %v3910_v22  ;;  %v3034_v21 = vpop.f32.mrb[75].mxu0  ;;  %v2316_v48 = vsel %vm314_vm1, %v2311_v35, 0.0 }
 0xdfd   : > { %v2298_v47 = vadd.f32 %v2297_v29, %v2296_v26 }
 0xdfe   : > { %v2317_v49 = vsel %vm314_vm1, %v2312_v8, 0.0 }
 0xdff   : > { %v2318_v24 = vadd.f32 %v2317_v49, %v2316_v48 }
 0xe01   : > { %v2278_v32 = vpop.f32.mrb[76].mxu0 }
 0xe02   : > { %v2299_v28 = vsel %vm314_vm1, %v2278_v32, 0.0  ;;  %v2313_v51 = vmul.f32 %v2278_v32, %v2278_v32  ;;  %v3037_v52 = vpop.f32.mrb[77].mxu0 }
 0xe03   : > { %v2300_v53 = vadd.f32 %v2299_v28, %v2298_v47  ;;  %v2281_v36 = vpop.f32.mrb[78].mxu0 }
 0xe04   : > { %v2319_v38 = vsel %vm314_vm1, %v2313_v51, 0.0  ;;  %v2301_v39 = vsel %vm314_vm1, %v2281_v36, 0.0  ;;  %v2314_v41 = vmul.f32 %v2281_v36, %v2281_v36  ;;  %v2343_v42 = vpack.c.bf16 %v2281_v36, %v2278_v32  ;;  %v3038_v44 = vpop.f32.mrb[79].mxu0 }
 0xe05   : > { %v2320_v45 = vadd.f32 %v2319_v38, %v2318_v24  ;;  %v2302_v37 = vadd.f32 %v2301_v39, %v2300_v53 }
 0xe06   : > { %v2321_v3 = vsel %vm314_vm1, %v2314_v41, 0.0 }
 0xe07   : > { %v2322_v4 = vadd.f32 %v2321_v3, %v2320_v45 }
 0xe09   : > { %v2286_v5 = vpop.f32.mrb[80].mxu0 }
 0xe0a   : > { %v2303_v40 = vsel %vm314_vm1, %v2286_v5, 0.0  ;;  %v2315_v50 = vmul.f32 %v2286_v5, %v2286_v5  ;;  %v3041_v43 = vpop.f32.mrb[81].mxu0  ;;  %v2344_v29 = vpack.c.bf16 %v2286_v5, %v2286_v5 }
 0xe0b   : > { %v2304_v10 = vadd.f32 %v2303_v40, %v2302_v37  ;;  %v2289_v13 = vpop.f32.mrb[82].mxu0 }
 0xe0c   : > { %v2323_v14 = vsel %vm314_vm1, %v2315_v50, 0.0  ;;  %v3042_v46 = vpop.f32.mrb[83].mxu0 }
 0xe0d   : > { %v2305_v54 = vrot.slane %v2304_v10, 4  ;;  %v2324_v55 = vadd.f32 %v2323_v14, %v2322_v4 }
 0xe0f   : > { %v2306_v56 = vadd.f32 %v2305_v54, %v2304_v10  ;;  %v2325_v58 = vrot.slane %v2324_v55, 4 }
 0xe11   : > { %v2307_v59 = vrot.slane %v2306_v56, 2  ;;  %v2326_v61 = vadd.f32 %v2325_v58, %v2324_v55 }
 0xe13   : > { %v2308_v62 = vadd.f32 %v2307_v59, %v2306_v56  ;;  %v2327_v0 = vrot.slane %v2326_v61, 2 }
 0xe15   : > { %v2309_v2 = vrot.slane %v2308_v62, 1  ;;  %v2328_v7 = vadd.f32 %v2327_v0, %v2326_v61 }
 0xe17   : > { %v2310_v57 = vadd.f32 %v2309_v2, %v2308_v62  ;;  %v2329_v9 = vrot.slane %v2328_v7, 1 }
 0xe19   : > { %v2330_v60 = vadd.f32 %v2329_v9, %v2328_v7  ;;  %v2331_v15 = vmul.f32 0.025, %v2310_v57 }
 0xe1b   : > { %v2332_v30 = vmul.f32 0.025, %v2330_v60  ;;  %v2333_v31 = vmul.f32 %v2331_v15, %v2331_v15 }
 0xe1d   : > { %v2334_v63 = vsub.f32 %v2332_v30, %v2333_v31 }
 0xe1f   : > { %v2335_v16 = vadd.f32 0.001, %v2334_v63 }
 0xe21   : > { %3126 = vrsqrt.f32 %v2335_v16 }
 0xe2b   : > { %v3127_v33 = vpop.eup %3126 }
 0xe2c   : > { %v2337_v34 = vmul.f32 %v3127_v33, %v2745_v6 }
 0xe2e   : > { %v2338_v22 = vmul.f32 %v2337_v34, %v2331_v15  ;;  %v2340_v35 = vpack.c.bf16 %v2337_v34, %v2337_v34 }
 0xe30   : > { %v2339_v23 = vsub.f32 %v2746_v20, %v2338_v22  ;;  %v2346_v25 = vpack.i.b16 %v2340_v35, %v2340_v35 }
 0xe32   : > { %v2341_v26 = vpack.c.bf16 %v2339_v23, %v2339_v23  ;;  %v2351_v8 = vrot.slane %v2346_v25, %v3265_v12 }
 0xe34   : > { %v2352_v21 = vmul.bf16 %v2351_v8, %v2342_v11  ;;  %v2354_v47 = vmul.bf16 %v2351_v8, %v2344_v29  ;;  %v2356_v48 = vpack.i.b16 %v2341_v26, %v2341_v26  ;;  %v2353_v49 = vmul.bf16 %v2351_v8, %v2343_v42 }
 0xe36   : > { %v2361_v24 = vrot.slane %v2356_v48, %v3265_v12 }
 0xe38   : > { %v2362_v32 = vadd.bf16 %v2361_v24, %v2352_v21  ;;  %v2364_v28 = vadd.bf16 %v2361_v24, %v2354_v47  ;;  %v2363_v51 = vadd.bf16 %v2361_v24, %v2353_v49 }
 0xe3a   : > { %v2365_v52 = vmax.bf16 %v3140_v27, %v2362_v32  ;;  %v2366_v53 = vmax.bf16 %v3140_v27, %v2363_v51  ;;  %v2367_v11 = vmax.bf16 %v3140_v27, %v2364_v28  ;;  %v2756_v28 = vld [vmem:[%s3999_s5 + $0x6] sm:$0x1] }
 0xe3c   : > { %3048 = vmatmul.mubr.msk.bf16.vlgmr.msra.gmra.mrb[72].mxu1 %vm314_vm1, %v2365_v52 }
 0xe3d   : > { %3051 = vmatprep.mubr.msk.bf16.mxu1 %vm3139_vm0, %v3138_v1 }
 0xe44   : > { %3052 = vmatmul.mubr.msk.bf16.gmra.mrb[76].mxu1 %vm314_vm1, %v2366_v53  ;;  %v2757_v53 = vld [vmem:[%s4000_s6 + $0x6] sm:$0x1] }
 0xe45   : > { %3055 = vmatprep.mubr.msk.bf16.mxu1 %vm3139_vm0, %v3138_v1 }
 0xe4c   : > { %3056 = vmatmul.mubr.msk.bf16.gmra.mrb[80].mxu1 %vm314_vm1, %v2367_v11 }
 0xf0f   : > { %v3950_v36 = vpop.f32.mrb[72].mxu1 }
 0xf10   : > { %v2469_v38 = vmul.f32 %v3950_v36, %v3950_v36  ;;  %v3049_v39 = vpop.f32.mrb[73].mxu1  ;;  %v2454_v42 = vsel %vm314_vm1, %v3950_v36, 0.0 }
 0xf11   : > { %v3954_v41 = vpop.f32.mrb[74].mxu1 }
 0xf12   : > { %v2455_v44 = vsel %vm314_vm1, %v3954_v41, 0.0  ;;  %v2470_v1 = vmul.f32 %v3954_v41, %v3954_v41  ;;  %v2500_v45 = vpack.c.bf16 %v3954_v41, %v3950_v36  ;;  %v3050_v37 = vpop.f32.mrb[75].mxu1  ;;  %v2474_v4 = vsel %vm314_vm1, %v2469_v38, 0.0 }
 0xf13   : > { %v2456_v3 = vadd.f32 %v2455_v44, %v2454_v42 }
 0xf14   : > { %v2475_v5 = vsel %vm314_vm1, %v2470_v1, 0.0 }
 0xf15   : > { %v2476_v40 = vadd.f32 %v2475_v5, %v2474_v4 }
 0xf17   : > { %v2436_v50 = vpop.f32.mrb[76].mxu1 }
 0xf18   : > { %v2457_v43 = vsel %vm314_vm1, %v2436_v50, 0.0  ;;  %v2471_v10 = vmul.f32 %v2436_v50, %v2436_v50  ;;  %v3053_v13 = vpop.f32.mrb[77].mxu1 }
 0xf19   : > { %v2458_v14 = vadd.f32 %v2457_v43, %v2456_v3  ;;  %v2439_v46 = vpop.f32.mrb[78].mxu1 }
 0xf1a   : > { %v2477_v54 = vsel %vm314_vm1, %v2471_v10, 0.0  ;;  %v2459_v55 = vsel %vm314_vm1, %v2439_v46, 0.0  ;;  %v2472_v56 = vmul.f32 %v2439_v46, %v2439_v46  ;;  %v2501_v58 = vpack.c.bf16 %v2439_v46, %v2436_v50  ;;  %v3054_v59 = vpop.f32.mrb[79].mxu1 }
 0xf1b   : > { %v2478_v61 = vadd.f32 %v2477_v54, %v2476_v40  ;;  %v2460_v62 = vadd.f32 %v2459_v55, %v2458_v14 }
 0xf1c   : > { %v2479_v0 = vsel %vm314_vm1, %v2472_v56, 0.0 }
 0xf1d   : > { %v2480_v2 = vadd.f32 %v2479_v0, %v2478_v61 }
 0xf1f   : > { %v2444_v7 = vpop.f32.mrb[80].mxu1 }
 0xf20   : > { %v2461_v57 = vsel %vm314_vm1, %v2444_v7, 0.0  ;;  %v2473_v9 = vmul.f32 %v2444_v7, %v2444_v7  ;;  %v3057_v60 = vpop.f32.mrb[81].mxu1  ;;  %v2502_v42 = vpack.c.bf16 %v2444_v7, %v2444_v7 }
 0xf21   : > { %v2462_v15 = vadd.f32 %v2461_v57, %v2460_v62  ;;  %v2447_v30 = vpop.f32.mrb[82].mxu1 }
 0xf22   : > { %v2481_v31 = vsel %vm314_vm1, %v2473_v9, 0.0  ;;  %v3058_v63 = vpop.f32.mrb[83].mxu1 }
 0xf23   : > { %v2463_v16 = vrot.slane %v2462_v15, 4  ;;  %v2482_v6 = vadd.f32 %v2481_v31, %v2480_v2 }
 0xf25   : > { %v2464_v33 = vadd.f32 %v2463_v16, %v2462_v15  ;;  %v2483_v34 = vrot.slane %v2482_v6, 4 }
 0xf27   : > { %v2465_v20 = vrot.slane %v2464_v33, 2  ;;  %v2484_v22 = vadd.f32 %v2483_v34, %v2482_v6 }
 0xf29   : > { %v2466_v35 = vadd.f32 %v2465_v20, %v2464_v33  ;;  %v2485_v23 = vrot.slane %v2484_v22, 2 }
 0xf2b   : > { %v2467_v25 = vrot.slane %v2466_v35, 1  ;;  %v2486_v26 = vadd.f32 %v2485_v23, %v2484_v22 }
 0xf2d   : > { %v2468_v29 = vadd.f32 %v2467_v25, %v2466_v35  ;;  %v2487_v8 = vrot.slane %v2486_v26, 1 }
 0xf2f   : > { %v2488_v21 = vadd.f32 %v2487_v8, %v2486_v26  ;;  %v2489_v47 = vmul.f32 0.025, %v2468_v29 }
 0xf31   : > { %v2490_v48 = vmul.f32 0.025, %v2488_v21  ;;  %v2491_v49 = vmul.f32 %v2489_v47, %v2489_v47 }
 0xf33   : > { %v2492_v24 = vsub.f32 %v2490_v48, %v2491_v49 }
 0xf35   : > { %v2493_v32 = vadd.f32 0.001, %v2492_v24 }
 0xf37   : > { %3128 = vrsqrt.f32 %v2493_v32 }
 0xf41   : > { %v3129_v51 = vpop.eup %3128 }
 0xf42   : > { %v2495_v52 = vmul.f32 %v3129_v51, %v2756_v28 }
 0xf44   : > { %v2496_v11 = vmul.f32 %v2495_v52, %v2489_v47  ;;  %v2498_v36 = vpack.c.bf16 %v2495_v52, %v2495_v52 }
 0xf46   : > { %v2497_v38 = vsub.f32 %v2757_v53, %v2496_v11  ;;  %v2504_v39 = vpack.i.b16 %v2498_v36, %v2498_v36 }
 0xf48   : > { %v2499_v41 = vpack.c.bf16 %v2497_v38, %v2497_v38  ;;  %v2509_v44 = vrot.slane %v2504_v39, %v3265_v12 }
 0xf4a   : > { %v2510_v1 = vmul.bf16 %v2509_v44, %v2500_v45  ;;  %v2511_v37 = vmul.bf16 %v2509_v44, %v2501_v58  ;;  %v2512_v3 = vmul.bf16 %v2509_v44, %v2502_v42  ;;  %v2514_v4 = vpack.i.b16 %v2499_v41, %v2499_v41 }
 0xf4c   : > { %v2519_v5 = vrot.slane %v2514_v4, %v3265_v12 }
 0xf4e   : > { %v2520_v40 = vadd.bf16 %v2519_v5, %v2510_v1  ;;  %v2521_v50 = vadd.bf16 %v2519_v5, %v2511_v37  ;;  %v2522_v43 = vadd.bf16 %v2519_v5, %v2512_v3 }
 0xf50   : > { %v2523_v10 = vadd.bf16 %v2520_v40, %v3883_v17  ;;  %v2524_v13 = vadd.bf16 %v2521_v50, %v3891_v18  ;;  %v2525_v14 = vadd.bf16 %v2522_v43, %v3899_v19 }
 0xf52   : > { %v2526_v46 = vmax.bf16 %v3140_v27, %v2523_v10  ;;  %v2527_v54 = vmax.bf16 %v3140_v27, %v2524_v13  ;;  %v2528_v45 = vmax.bf16 %v3140_v27, %v2525_v14 }
 0xf54   : > { %v2758_v12 = vcombine.low %v2526_v46, %v2526_v46  ;;  %v2759_v55 = vcombine.high %v2526_v46, %v2526_v46  ;;  %v2760_v56 = vcombine.low %v2527_v54, %v2527_v54  ;;  %v2761_v17 = vcombine.high %v2527_v54, %v2527_v54 }
 0xf55   : > { %v2762_v58 = vcombine.low %v2528_v45, %v2528_v45 }
 0xf56   : > { %2548 = vst.msk [vmem:[%s278_s21] sm:$0xf] %vm2547_vm2, %v2758_v12  ;;  %2549 = vst.msk [vmem:[%s278_s21 + $0x4] sm:$0xf] %vm2547_vm2, %v2759_v55 }
 0xf57   : > { %2550 = vst.msk [vmem:[%s278_s21 + $0x8] sm:$0xf] %vm2547_vm2, %v2760_v56  ;;  %2551 = vst.msk [vmem:[%s278_s21 + $0xc] sm:$0xf] %vm2547_vm2, %v2761_v17 }
 0xf58   : > { %2552 = vst.msk [vmem:[%s278_s21 + $0x10] sm:$0xf] %vm2547_vm2, %v2762_v58 }
 0xf59 PF: > { %s17_s24 = sadd.s32 1, %s3136_s24  }
 0xf5a   : > { %p14_p4 = scmp.ge.s32.totalorder %s17_s24, 4  }
 0xf5c   :  { %16 = sbr.rel (!%p14_p4) target bundleno = 1 (0x1), region = 114 }

</bundles_post_ra>
